<compile_context>
chip_gen: v5e
topology: v5e:2x2
jax: 0.10.0
libtpu: 0.0.40
codegen_flags: <defaults>
</compile_context>

<pallas_src>
import functools
from math import exp

import numpy as np
import jax
import jax.numpy as jnp
from jax.experimental import pallas as pl
from jax.experimental.pallas import tpu as pltpu

EPS = 1e-15


def _gaussian_1d(window_size, sigma=1.5):
    # Mirrors gaussian() from the PyTorch reference (1D, normalized).
    g = np.array(
        [exp(-(x - window_size // 2) ** 2 / float(2 * sigma ** 2)) for x in range(window_size)],
        dtype=np.float32,
    )
    return g / (g.sum() + EPS)


def _gaussian_window_2d(window_size, sigma=1.5):
    g = jnp.asarray(_gaussian_1d(window_size, sigma), dtype=jnp.float32)
    return jnp.outer(g, g)  # (win, win) == create_window()


def _ssim_kernel(consts_ref, img1_ref, img2_ref, out_ref, *, g, Hc, Wc):
    """One grid step = one batch element (all channels). Writes sum(ssim_map)."""
    x1 = img1_ref[0].astype(jnp.float32)  # (C, H, W)
    x2 = img2_ref[0].astype(jnp.float32)  # (C, H, W)

    win = len(g)

    def sep_conv(p):
        # Separable Gaussian "valid" conv: row pass along W, then col pass
        # along H.  `g` are Python floats -> pure scalar x vector multiplies.
        r = g[0] * p[:, :, 0:Wc]
        for j in range(1, win):
            r = r + g[j] * p[:, :, j:j + Wc]            # (C, H, Wc)
        s = g[0] * r[:, 0:Hc, :]
        for i in range(1, win):
            s = s + g[i] * r[:, i:i + Hc, :]            # (C, Hc, Wc)
        return s

    mu1 = sep_conv(x1)
    mu2 = sep_conv(x2)
    s11 = sep_conv(x1 * x1)
    s22 = sep_conv(x2 * x2)
    s12 = sep_conv(x1 * x2)

    C1 = consts_ref[0]
    C2 = consts_ref[1]

    mu1_sq = mu1 * mu1
    mu2_sq = mu2 * mu2
    mu1_mu2 = mu1 * mu2
    sigma1_sq = s11 - mu1_sq
    sigma2_sq = s22 - mu2_sq
    sigma12 = s12 - mu1_mu2

    v1 = 2.0 * sigma12 + C2
    v2 = sigma1_sq + sigma2_sq + C2
    ssim_map = (2.0 * mu1_mu2 + C1) * v1 / ((mu1_sq + mu2_sq + C1) * v2 + EPS)

    out_ref[...] = jnp.sum(ssim_map).reshape(1, 1, 1)


def ssim_pallas(img1, img2, window_size=11, val_range=None):
    """SSIM with size_average=True (PyTorch SSIM.forward semantics)."""
    B, C, H, W = img1.shape
    win = min(window_size, H, W)
    Hc, Wc = H - win + 1, W - win + 1

    img1 = img1.astype(jnp.float32)
    img2 = img2.astype(jnp.float32)

    # Data-dependent dynamic range L (as in the reference ssim()); skipped if
    # val_range is given (avoids an extra full pass over img1 in HBM).
    if val_range is None:
        max_val = jnp.where(jnp.max(img1) > 128.0, 255.0, 1.0)
        min_val = jnp.where(jnp.min(img1) < -0.5, -1.0, 0.0)
        L = max_val - min_val
    else:
        L = jnp.float32(val_range)
    consts = jnp.stack([(0.01 * L) ** 2, (0.03 * L) ** 2]).astype(jnp.float32)  # [C1, C2]

    # Gaussian taps as compile-time Python floats baked into the kernel.
    g = tuple(float(v) for v in _gaussian_1d(win))
    kernel = functools.partial(_ssim_kernel, g=g, Hc=Hc, Wc=Wc)

    partial_sums = pl.pallas_call(
        kernel,
        out_shape=jax.ShapeDtypeStruct((B, 1, 1), jnp.float32),
        grid_spec=pltpu.PrefetchScalarGridSpec(
            num_scalar_prefetch=0,
            grid=(B,),
            in_specs=[
                pl.BlockSpec(memory_space=pltpu.MemorySpace.SMEM),        # consts [C1, C2]
                pl.BlockSpec((1, C, H, W), lambda b: (b, 0, 0, 0)),       # img1: all channels
                pl.BlockSpec((1, C, H, W), lambda b: (b, 0, 0, 0)),       # img2: all channels
            ],
            out_specs=pl.BlockSpec((1, 1, 1), lambda b: (b, 0, 0)),       # per-batch sum
        ),
        compiler_params=pltpu.CompilerParams(
            dimension_semantics=("parallel",)
        ),
    )(consts, img1, img2)

    return jnp.sum(partial_sums) / (B * C * Hc * Wc)


def ssim_reference(img1, img2, window_size=11):
    """Pure-JAX reference mirroring the PyTorch ssim() for correctness check."""
    B, C, H, W = img1.shape
    win = min(window_size, H, W)
    w2d = _gaussian_window_2d(win)
    kernel = jnp.broadcast_to(w2d, (C, 1, win, win))

    def conv(x):
        return jax.lax.conv_general_dilated(
            x, kernel, window_strides=(1, 1), padding="VALID",
            dimension_numbers=("NCHW", "OIHW", "NCHW"), feature_group_count=C)

    max_val = jnp.where(jnp.max(img1) > 128.0, 255.0, 1.0)
    min_val = jnp.where(jnp.min(img1) < -0.5, -1.0, 0.0)
    L = max_val - min_val
    C1 = (0.01 * L) ** 2
    C2 = (0.03 * L) ** 2

    mu1, mu2 = conv(img1), conv(img2)
    mu1_sq, mu2_sq, mu1_mu2 = mu1 * mu1, mu2 * mu2, mu1 * mu2
    sigma1_sq = conv(img1 * img1) - mu1_sq
    sigma2_sq = conv(img2 * img2) - mu2_sq
    sigma12 = conv(img1 * img2) - mu1_mu2
    v1 = 2.0 * sigma12 + C2
    v2 = sigma1_sq + sigma2_sq + C2
    ssim_map = (2 * mu1_mu2 + C1) * v1 / ((mu1_sq + mu2_sq + C1) * v2 + EPS)
    return jnp.mean(ssim_map)


if __name__ == "__main__":
    key = jax.random.PRNGKey(0)
    k1, k2 = jax.random.split(key)
    # Small NCHW inputs consistent with SSIM's 11x11 window (H, W >= 11).
    img1 = jax.random.uniform(k1, (2, 4, 16, 16), dtype=jnp.float32)
    img2 = jax.random.uniform(k2, (2, 4, 16, 16), dtype=jnp.float32)

    result = jax.jit(ssim_pallas)(img1, img2)
    result = jax.block_until_ready(result)

    ref = jax.block_until_ready(ssim_reference(img1, img2))
    assert jnp.allclose(result, ref, atol=1e-5, rtol=1e-5), (result, ref)

    print("KERNEL_OK")
</pallas_src>

<mosaic_0001>
module attributes {stable_mosaic.version = 11 : i64} {
  func.func @_ssim_kernel(%arg0: i32, %arg1: memref<2xf32, #tpu.memory_space<smem>>, %arg2: memref<1x4x16x16xf32, #tpu.memory_space<vmem>>, %arg3: memref<1x4x16x16xf32, #tpu.memory_space<vmem>>, %arg4: memref<1x1x1xf32, #tpu.memory_space<vmem>>) attributes {dimension_semantics = [#tpu.dimension_semantics<parallel>], iteration_bounds = array<i64: 2>, scalar_prefetch = 0 : i64, scratch_operands = 0 : i64, tpu.core_type = #tpu.core_type<tc>, window_params = [{transform_indices = @transform_0, window_bounds = array<i64: 2>}, {transform_indices = @transform_1, window_bounds = array<i64: 1, 4, 16, 16>}, {transform_indices = @transform_2, window_bounds = array<i64: 1, 4, 16, 16>}, {transform_indices = @transform_3, window_bounds = array<i64: 1, 1, 1>}]} {
    %c0 = arith.constant 0 : index
    %c0_0 = arith.constant 0 : index
    %c0_1 = arith.constant 0 : index
    %c0_2 = arith.constant 0 : index
    %0 = vector.load %arg2[%c0, %c0_0, %c0_1, %c0_2] : memref<1x4x16x16xf32, #tpu.memory_space<vmem>>, vector<1x4x16x16xf32>
    %1 = vector.shape_cast %0 : vector<1x4x16x16xf32> to vector<4x16x16xf32>
    %c0_3 = arith.constant 0 : index
    %c0_4 = arith.constant 0 : index
    %c0_5 = arith.constant 0 : index
    %c0_6 = arith.constant 0 : index
    %2 = vector.load %arg3[%c0_3, %c0_4, %c0_5, %c0_6] : memref<1x4x16x16xf32, #tpu.memory_space<vmem>>, vector<1x4x16x16xf32>
    %3 = vector.shape_cast %2 : vector<1x4x16x16xf32> to vector<4x16x16xf32>
    %4 = vector.extract_strided_slice %1 {offsets = [0, 0, 0], sizes = [4, 16, 6], strides = [1, 1, 1]} : vector<4x16x16xf32> to vector<4x16x6xf32>
    %cst = arith.constant 0.00102838024 : f32
    %5 = vector.broadcast %cst : f32 to vector<4x16x6xf32>
    %6 = arith.mulf %5, %4 : vector<4x16x6xf32>
    %7 = vector.extract_strided_slice %1 {offsets = [0, 0, 1], sizes = [4, 16, 6], strides = [1, 1, 1]} : vector<4x16x16xf32> to vector<4x16x6xf32>
    %cst_7 = arith.constant 0.00759875868 : f32
    %8 = vector.broadcast %cst_7 : f32 to vector<4x16x6xf32>
    %9 = arith.mulf %8, %7 : vector<4x16x6xf32>
    %10 = arith.addf %6, %9 : vector<4x16x6xf32>
    %11 = vector.extract_strided_slice %1 {offsets = [0, 0, 2], sizes = [4, 16, 6], strides = [1, 1, 1]} : vector<4x16x16xf32> to vector<4x16x6xf32>
    %cst_8 = arith.constant 0.0360007733 : f32
    %12 = vector.broadcast %cst_8 : f32 to vector<4x16x6xf32>
    %13 = arith.mulf %12, %11 : vector<4x16x6xf32>
    %14 = arith.addf %10, %13 : vector<4x16x6xf32>
    %15 = vector.extract_strided_slice %1 {offsets = [0, 0, 3], sizes = [4, 16, 6], strides = [1, 1, 1]} : vector<4x16x16xf32> to vector<4x16x6xf32>
    %cst_9 = arith.constant 0.109360695 : f32
    %16 = vector.broadcast %cst_9 : f32 to vector<4x16x6xf32>
    %17 = arith.mulf %16, %15 : vector<4x16x6xf32>
    %18 = arith.addf %14, %17 : vector<4x16x6xf32>
    %19 = vector.extract_strided_slice %1 {offsets = [0, 0, 4], sizes = [4, 16, 6], strides = [1, 1, 1]} : vector<4x16x16xf32> to vector<4x16x6xf32>
    %cst_10 = arith.constant 0.213005543 : f32
    %20 = vector.broadcast %cst_10 : f32 to vector<4x16x6xf32>
    %21 = arith.mulf %20, %19 : vector<4x16x6xf32>
    %22 = arith.addf %18, %21 : vector<4x16x6xf32>
    %23 = vector.extract_strided_slice %1 {offsets = [0, 0, 5], sizes = [4, 16, 6], strides = [1, 1, 1]} : vector<4x16x16xf32> to vector<4x16x6xf32>
    %cst_11 = arith.constant 0.266011745 : f32
    %24 = vector.broadcast %cst_11 : f32 to vector<4x16x6xf32>
    %25 = arith.mulf %24, %23 : vector<4x16x6xf32>
    %26 = arith.addf %22, %25 : vector<4x16x6xf32>
    %27 = vector.extract_strided_slice %1 {offsets = [0, 0, 6], sizes = [4, 16, 6], strides = [1, 1, 1]} : vector<4x16x16xf32> to vector<4x16x6xf32>
    %cst_12 = arith.constant 0.213005543 : f32
    %28 = vector.broadcast %cst_12 : f32 to vector<4x16x6xf32>
    %29 = arith.mulf %28, %27 : vector<4x16x6xf32>
    %30 = arith.addf %26, %29 : vector<4x16x6xf32>
    %31 = vector.extract_strided_slice %1 {offsets = [0, 0, 7], sizes = [4, 16, 6], strides = [1, 1, 1]} : vector<4x16x16xf32> to vector<4x16x6xf32>
    %cst_13 = arith.constant 0.109360695 : f32
    %32 = vector.broadcast %cst_13 : f32 to vector<4x16x6xf32>
    %33 = arith.mulf %32, %31 : vector<4x16x6xf32>
    %34 = arith.addf %30, %33 : vector<4x16x6xf32>
    %35 = vector.extract_strided_slice %1 {offsets = [0, 0, 8], sizes = [4, 16, 6], strides = [1, 1, 1]} : vector<4x16x16xf32> to vector<4x16x6xf32>
    %cst_14 = arith.constant 0.0360007733 : f32
    %36 = vector.broadcast %cst_14 : f32 to vector<4x16x6xf32>
    %37 = arith.mulf %36, %35 : vector<4x16x6xf32>
    %38 = arith.addf %34, %37 : vector<4x16x6xf32>
    %39 = vector.extract_strided_slice %1 {offsets = [0, 0, 9], sizes = [4, 16, 6], strides = [1, 1, 1]} : vector<4x16x16xf32> to vector<4x16x6xf32>
    %cst_15 = arith.constant 0.00759875868 : f32
    %40 = vector.broadcast %cst_15 : f32 to vector<4x16x6xf32>
    %41 = arith.mulf %40, %39 : vector<4x16x6xf32>
    %42 = arith.addf %38, %41 : vector<4x16x6xf32>
    %43 = vector.extract_strided_slice %1 {offsets = [0, 0, 10], sizes = [4, 16, 6], strides = [1, 1, 1]} : vector<4x16x16xf32> to vector<4x16x6xf32>
    %cst_16 = arith.constant 0.00102838024 : f32
    %44 = vector.broadcast %cst_16 : f32 to vector<4x16x6xf32>
    %45 = arith.mulf %44, %43 : vector<4x16x6xf32>
    %46 = arith.addf %42, %45 : vector<4x16x6xf32>
    %47 = vector.extract_strided_slice %46 {offsets = [0, 0, 0], sizes = [4, 6, 6], strides = [1, 1, 1]} : vector<4x16x6xf32> to vector<4x6x6xf32>
    %cst_17 = arith.constant 0.00102838024 : f32
    %48 = vector.broadcast %cst_17 : f32 to vector<4x6x6xf32>
    %49 = arith.mulf %48, %47 : vector<4x6x6xf32>
    %50 = vector.extract_strided_slice %46 {offsets = [0, 1, 0], sizes = [4, 6, 6], strides = [1, 1, 1]} : vector<4x16x6xf32> to vector<4x6x6xf32>
    %cst_18 = arith.constant 0.00759875868 : f32
    %51 = vector.broadcast %cst_18 : f32 to vector<4x6x6xf32>
    %52 = arith.mulf %51, %50 : vector<4x6x6xf32>
    %53 = arith.addf %49, %52 : vector<4x6x6xf32>
    %54 = vector.extract_strided_slice %46 {offsets = [0, 2, 0], sizes = [4, 6, 6], strides = [1, 1, 1]} : vector<4x16x6xf32> to vector<4x6x6xf32>
    %cst_19 = arith.constant 0.0360007733 : f32
    %55 = vector.broadcast %cst_19 : f32 to vector<4x6x6xf32>
    %56 = arith.mulf %55, %54 : vector<4x6x6xf32>
    %57 = arith.addf %53, %56 : vector<4x6x6xf32>
    %58 = vector.extract_strided_slice %46 {offsets = [0, 3, 0], sizes = [4, 6, 6], strides = [1, 1, 1]} : vector<4x16x6xf32> to vector<4x6x6xf32>
    %cst_20 = arith.constant 0.109360695 : f32
    %59 = vector.broadcast %cst_20 : f32 to vector<4x6x6xf32>
    %60 = arith.mulf %59, %58 : vector<4x6x6xf32>
    %61 = arith.addf %57, %60 : vector<4x6x6xf32>
    %62 = vector.extract_strided_slice %46 {offsets = [0, 4, 0], sizes = [4, 6, 6], strides = [1, 1, 1]} : vector<4x16x6xf32> to vector<4x6x6xf32>
    %cst_21 = arith.constant 0.213005543 : f32
    %63 = vector.broadcast %cst_21 : f32 to vector<4x6x6xf32>
    %64 = arith.mulf %63, %62 : vector<4x6x6xf32>
    %65 = arith.addf %61, %64 : vector<4x6x6xf32>
    %66 = vector.extract_strided_slice %46 {offsets = [0, 5, 0], sizes = [4, 6, 6], strides = [1, 1, 1]} : vector<4x16x6xf32> to vector<4x6x6xf32>
    %cst_22 = arith.constant 0.266011745 : f32
    %67 = vector.broadcast %cst_22 : f32 to vector<4x6x6xf32>
    %68 = arith.mulf %67, %66 : vector<4x6x6xf32>
    %69 = arith.addf %65, %68 : vector<4x6x6xf32>
    %70 = vector.extract_strided_slice %46 {offsets = [0, 6, 0], sizes = [4, 6, 6], strides = [1, 1, 1]} : vector<4x16x6xf32> to vector<4x6x6xf32>
    %cst_23 = arith.constant 0.213005543 : f32
    %71 = vector.broadcast %cst_23 : f32 to vector<4x6x6xf32>
    %72 = arith.mulf %71, %70 : vector<4x6x6xf32>
    %73 = arith.addf %69, %72 : vector<4x6x6xf32>
    %74 = vector.extract_strided_slice %46 {offsets = [0, 7, 0], sizes = [4, 6, 6], strides = [1, 1, 1]} : vector<4x16x6xf32> to vector<4x6x6xf32>
    %cst_24 = arith.constant 0.109360695 : f32
    %75 = vector.broadcast %cst_24 : f32 to vector<4x6x6xf32>
    %76 = arith.mulf %75, %74 : vector<4x6x6xf32>
    %77 = arith.addf %73, %76 : vector<4x6x6xf32>
    %78 = vector.extract_strided_slice %46 {offsets = [0, 8, 0], sizes = [4, 6, 6], strides = [1, 1, 1]} : vector<4x16x6xf32> to vector<4x6x6xf32>
    %cst_25 = arith.constant 0.0360007733 : f32
    %79 = vector.broadcast %cst_25 : f32 to vector<4x6x6xf32>
    %80 = arith.mulf %79, %78 : vector<4x6x6xf32>
    %81 = arith.addf %77, %80 : vector<4x6x6xf32>
    %82 = vector.extract_strided_slice %46 {offsets = [0, 9, 0], sizes = [4, 6, 6], strides = [1, 1, 1]} : vector<4x16x6xf32> to vector<4x6x6xf32>
    %cst_26 = arith.constant 0.00759875868 : f32
    %83 = vector.broadcast %cst_26 : f32 to vector<4x6x6xf32>
    %84 = arith.mulf %83, %82 : vector<4x6x6xf32>
    %85 = arith.addf %81, %84 : vector<4x6x6xf32>
    %86 = vector.extract_strided_slice %46 {offsets = [0, 10, 0], sizes = [4, 6, 6], strides = [1, 1, 1]} : vector<4x16x6xf32> to vector<4x6x6xf32>
    %cst_27 = arith.constant 0.00102838024 : f32
    %87 = vector.broadcast %cst_27 : f32 to vector<4x6x6xf32>
    %88 = arith.mulf %87, %86 : vector<4x6x6xf32>
    %89 = arith.addf %85, %88 : vector<4x6x6xf32>
    %90 = vector.extract_strided_slice %3 {offsets = [0, 0, 0], sizes = [4, 16, 6], strides = [1, 1, 1]} : vector<4x16x16xf32> to vector<4x16x6xf32>
    %cst_28 = arith.constant 0.00102838024 : f32
    %91 = vector.broadcast %cst_28 : f32 to vector<4x16x6xf32>
    %92 = arith.mulf %91, %90 : vector<4x16x6xf32>
    %93 = vector.extract_strided_slice %3 {offsets = [0, 0, 1], sizes = [4, 16, 6], strides = [1, 1, 1]} : vector<4x16x16xf32> to vector<4x16x6xf32>
    %cst_29 = arith.constant 0.00759875868 : f32
    %94 = vector.broadcast %cst_29 : f32 to vector<4x16x6xf32>
    %95 = arith.mulf %94, %93 : vector<4x16x6xf32>
    %96 = arith.addf %92, %95 : vector<4x16x6xf32>
    %97 = vector.extract_strided_slice %3 {offsets = [0, 0, 2], sizes = [4, 16, 6], strides = [1, 1, 1]} : vector<4x16x16xf32> to vector<4x16x6xf32>
    %cst_30 = arith.constant 0.0360007733 : f32
    %98 = vector.broadcast %cst_30 : f32 to vector<4x16x6xf32>
    %99 = arith.mulf %98, %97 : vector<4x16x6xf32>
    %100 = arith.addf %96, %99 : vector<4x16x6xf32>
    %101 = vector.extract_strided_slice %3 {offsets = [0, 0, 3], sizes = [4, 16, 6], strides = [1, 1, 1]} : vector<4x16x16xf32> to vector<4x16x6xf32>
    %cst_31 = arith.constant 0.109360695 : f32
    %102 = vector.broadcast %cst_31 : f32 to vector<4x16x6xf32>
    %103 = arith.mulf %102, %101 : vector<4x16x6xf32>
    %104 = arith.addf %100, %103 : vector<4x16x6xf32>
    %105 = vector.extract_strided_slice %3 {offsets = [0, 0, 4], sizes = [4, 16, 6], strides = [1, 1, 1]} : vector<4x16x16xf32> to vector<4x16x6xf32>
    %cst_32 = arith.constant 0.213005543 : f32
    %106 = vector.broadcast %cst_32 : f32 to vector<4x16x6xf32>
    %107 = arith.mulf %106, %105 : vector<4x16x6xf32>
    %108 = arith.addf %104, %107 : vector<4x16x6xf32>
    %109 = vector.extract_strided_slice %3 {offsets = [0, 0, 5], sizes = [4, 16, 6], strides = [1, 1, 1]} : vector<4x16x16xf32> to vector<4x16x6xf32>
    %cst_33 = arith.constant 0.266011745 : f32
    %110 = vector.broadcast %cst_33 : f32 to vector<4x16x6xf32>
    %111 = arith.mulf %110, %109 : vector<4x16x6xf32>
    %112 = arith.addf %108, %111 : vector<4x16x6xf32>
    %113 = vector.extract_strided_slice %3 {offsets = [0, 0, 6], sizes = [4, 16, 6], strides = [1, 1, 1]} : vector<4x16x16xf32> to vector<4x16x6xf32>
    %cst_34 = arith.constant 0.213005543 : f32
    %114 = vector.broadcast %cst_34 : f32 to vector<4x16x6xf32>
    %115 = arith.mulf %114, %113 : vector<4x16x6xf32>
    %116 = arith.addf %112, %115 : vector<4x16x6xf32>
    %117 = vector.extract_strided_slice %3 {offsets = [0, 0, 7], sizes = [4, 16, 6], strides = [1, 1, 1]} : vector<4x16x16xf32> to vector<4x16x6xf32>
    %cst_35 = arith.constant 0.109360695 : f32
    %118 = vector.broadcast %cst_35 : f32 to vector<4x16x6xf32>
    %119 = arith.mulf %118, %117 : vector<4x16x6xf32>
    %120 = arith.addf %116, %119 : vector<4x16x6xf32>
    %121 = vector.extract_strided_slice %3 {offsets = [0, 0, 8], sizes = [4, 16, 6], strides = [1, 1, 1]} : vector<4x16x16xf32> to vector<4x16x6xf32>
    %cst_36 = arith.constant 0.0360007733 : f32
    %122 = vector.broadcast %cst_36 : f32 to vector<4x16x6xf32>
    %123 = arith.mulf %122, %121 : vector<4x16x6xf32>
    %124 = arith.addf %120, %123 : vector<4x16x6xf32>
    %125 = vector.extract_strided_slice %3 {offsets = [0, 0, 9], sizes = [4, 16, 6], strides = [1, 1, 1]} : vector<4x16x16xf32> to vector<4x16x6xf32>
    %cst_37 = arith.constant 0.00759875868 : f32
    %126 = vector.broadcast %cst_37 : f32 to vector<4x16x6xf32>
    %127 = arith.mulf %126, %125 : vector<4x16x6xf32>
    %128 = arith.addf %124, %127 : vector<4x16x6xf32>
    %129 = vector.extract_strided_slice %3 {offsets = [0, 0, 10], sizes = [4, 16, 6], strides = [1, 1, 1]} : vector<4x16x16xf32> to vector<4x16x6xf32>
    %cst_38 = arith.constant 0.00102838024 : f32
    %130 = vector.broadcast %cst_38 : f32 to vector<4x16x6xf32>
    %131 = arith.mulf %130, %129 : vector<4x16x6xf32>
    %132 = arith.addf %128, %131 : vector<4x16x6xf32>
    %133 = vector.extract_strided_slice %132 {offsets = [0, 0, 0], sizes = [4, 6, 6], strides = [1, 1, 1]} : vector<4x16x6xf32> to vector<4x6x6xf32>
    %cst_39 = arith.constant 0.00102838024 : f32
    %134 = vector.broadcast %cst_39 : f32 to vector<4x6x6xf32>
    %135 = arith.mulf %134, %133 : vector<4x6x6xf32>
    %136 = vector.extract_strided_slice %132 {offsets = [0, 1, 0], sizes = [4, 6, 6], strides = [1, 1, 1]} : vector<4x16x6xf32> to vector<4x6x6xf32>
    %cst_40 = arith.constant 0.00759875868 : f32
    %137 = vector.broadcast %cst_40 : f32 to vector<4x6x6xf32>
    %138 = arith.mulf %137, %136 : vector<4x6x6xf32>
    %139 = arith.addf %135, %138 : vector<4x6x6xf32>
    %140 = vector.extract_strided_slice %132 {offsets = [0, 2, 0], sizes = [4, 6, 6], strides = [1, 1, 1]} : vector<4x16x6xf32> to vector<4x6x6xf32>
    %cst_41 = arith.constant 0.0360007733 : f32
    %141 = vector.broadcast %cst_41 : f32 to vector<4x6x6xf32>
    %142 = arith.mulf %141, %140 : vector<4x6x6xf32>
    %143 = arith.addf %139, %142 : vector<4x6x6xf32>
    %144 = vector.extract_strided_slice %132 {offsets = [0, 3, 0], sizes = [4, 6, 6], strides = [1, 1, 1]} : vector<4x16x6xf32> to vector<4x6x6xf32>
    %cst_42 = arith.constant 0.109360695 : f32
    %145 = vector.broadcast %cst_42 : f32 to vector<4x6x6xf32>
    %146 = arith.mulf %145, %144 : vector<4x6x6xf32>
    %147 = arith.addf %143, %146 : vector<4x6x6xf32>
    %148 = vector.extract_strided_slice %132 {offsets = [0, 4, 0], sizes = [4, 6, 6], strides = [1, 1, 1]} : vector<4x16x6xf32> to vector<4x6x6xf32>
    %cst_43 = arith.constant 0.213005543 : f32
    %149 = vector.broadcast %cst_43 : f32 to vector<4x6x6xf32>
    %150 = arith.mulf %149, %148 : vector<4x6x6xf32>
    %151 = arith.addf %147, %150 : vector<4x6x6xf32>
    %152 = vector.extract_strided_slice %132 {offsets = [0, 5, 0], sizes = [4, 6, 6], strides = [1, 1, 1]} : vector<4x16x6xf32> to vector<4x6x6xf32>
    %cst_44 = arith.constant 0.266011745 : f32
    %153 = vector.broadcast %cst_44 : f32 to vector<4x6x6xf32>
    %154 = arith.mulf %153, %152 : vector<4x6x6xf32>
    %155 = arith.addf %151, %154 : vector<4x6x6xf32>
    %156 = vector.extract_strided_slice %132 {offsets = [0, 6, 0], sizes = [4, 6, 6], strides = [1, 1, 1]} : vector<4x16x6xf32> to vector<4x6x6xf32>
    %cst_45 = arith.constant 0.213005543 : f32
    %157 = vector.broadcast %cst_45 : f32 to vector<4x6x6xf32>
    %158 = arith.mulf %157, %156 : vector<4x6x6xf32>
    %159 = arith.addf %155, %158 : vector<4x6x6xf32>
    %160 = vector.extract_strided_slice %132 {offsets = [0, 7, 0], sizes = [4, 6, 6], strides = [1, 1, 1]} : vector<4x16x6xf32> to vector<4x6x6xf32>
    %cst_46 = arith.constant 0.109360695 : f32
    %161 = vector.broadcast %cst_46 : f32 to vector<4x6x6xf32>
    %162 = arith.mulf %161, %160 : vector<4x6x6xf32>
    %163 = arith.addf %159, %162 : vector<4x6x6xf32>
    %164 = vector.extract_strided_slice %132 {offsets = [0, 8, 0], sizes = [4, 6, 6], strides = [1, 1, 1]} : vector<4x16x6xf32> to vector<4x6x6xf32>
    %cst_47 = arith.constant 0.0360007733 : f32
    %165 = vector.broadcast %cst_47 : f32 to vector<4x6x6xf32>
    %166 = arith.mulf %165, %164 : vector<4x6x6xf32>
    %167 = arith.addf %163, %166 : vector<4x6x6xf32>
    %168 = vector.extract_strided_slice %132 {offsets = [0, 9, 0], sizes = [4, 6, 6], strides = [1, 1, 1]} : vector<4x16x6xf32> to vector<4x6x6xf32>
    %cst_48 = arith.constant 0.00759875868 : f32
    %169 = vector.broadcast %cst_48 : f32 to vector<4x6x6xf32>
    %170 = arith.mulf %169, %168 : vector<4x6x6xf32>
    %171 = arith.addf %167, %170 : vector<4x6x6xf32>
    %172 = vector.extract_strided_slice %132 {offsets = [0, 10, 0], sizes = [4, 6, 6], strides = [1, 1, 1]} : vector<4x16x6xf32> to vector<4x6x6xf32>
    %cst_49 = arith.constant 0.00102838024 : f32
    %173 = vector.broadcast %cst_49 : f32 to vector<4x6x6xf32>
    %174 = arith.mulf %173, %172 : vector<4x6x6xf32>
    %175 = arith.addf %171, %174 : vector<4x6x6xf32>
    %176 = arith.mulf %1, %1 : vector<4x16x16xf32>
    %177 = vector.extract_strided_slice %176 {offsets = [0, 0, 0], sizes = [4, 16, 6], strides = [1, 1, 1]} : vector<4x16x16xf32> to vector<4x16x6xf32>
    %cst_50 = arith.constant 0.00102838024 : f32
    %178 = vector.broadcast %cst_50 : f32 to vector<4x16x6xf32>
    %179 = arith.mulf %178, %177 : vector<4x16x6xf32>
    %180 = vector.extract_strided_slice %176 {offsets = [0, 0, 1], sizes = [4, 16, 6], strides = [1, 1, 1]} : vector<4x16x16xf32> to vector<4x16x6xf32>
    %cst_51 = arith.constant 0.00759875868 : f32
    %181 = vector.broadcast %cst_51 : f32 to vector<4x16x6xf32>
    %182 = arith.mulf %181, %180 : vector<4x16x6xf32>
    %183 = arith.addf %179, %182 : vector<4x16x6xf32>
    %184 = vector.extract_strided_slice %176 {offsets = [0, 0, 2], sizes = [4, 16, 6], strides = [1, 1, 1]} : vector<4x16x16xf32> to vector<4x16x6xf32>
    %cst_52 = arith.constant 0.0360007733 : f32
    %185 = vector.broadcast %cst_52 : f32 to vector<4x16x6xf32>
    %186 = arith.mulf %185, %184 : vector<4x16x6xf32>
    %187 = arith.addf %183, %186 : vector<4x16x6xf32>
    %188 = vector.extract_strided_slice %176 {offsets = [0, 0, 3], sizes = [4, 16, 6], strides = [1, 1, 1]} : vector<4x16x16xf32> to vector<4x16x6xf32>
    %cst_53 = arith.constant 0.109360695 : f32
    %189 = vector.broadcast %cst_53 : f32 to vector<4x16x6xf32>
    %190 = arith.mulf %189, %188 : vector<4x16x6xf32>
    %191 = arith.addf %187, %190 : vector<4x16x6xf32>
    %192 = vector.extract_strided_slice %176 {offsets = [0, 0, 4], sizes = [4, 16, 6], strides = [1, 1, 1]} : vector<4x16x16xf32> to vector<4x16x6xf32>
    %cst_54 = arith.constant 0.213005543 : f32
    %193 = vector.broadcast %cst_54 : f32 to vector<4x16x6xf32>
    %194 = arith.mulf %193, %192 : vector<4x16x6xf32>
    %195 = arith.addf %191, %194 : vector<4x16x6xf32>
    %196 = vector.extract_strided_slice %176 {offsets = [0, 0, 5], sizes = [4, 16, 6], strides = [1, 1, 1]} : vector<4x16x16xf32> to vector<4x16x6xf32>
    %cst_55 = arith.constant 0.266011745 : f32
    %197 = vector.broadcast %cst_55 : f32 to vector<4x16x6xf32>
    %198 = arith.mulf %197, %196 : vector<4x16x6xf32>
    %199 = arith.addf %195, %198 : vector<4x16x6xf32>
    %200 = vector.extract_strided_slice %176 {offsets = [0, 0, 6], sizes = [4, 16, 6], strides = [1, 1, 1]} : vector<4x16x16xf32> to vector<4x16x6xf32>
    %cst_56 = arith.constant 0.213005543 : f32
    %201 = vector.broadcast %cst_56 : f32 to vector<4x16x6xf32>
    %202 = arith.mulf %201, %200 : vector<4x16x6xf32>
    %203 = arith.addf %199, %202 : vector<4x16x6xf32>
    %204 = vector.extract_strided_slice %176 {offsets = [0, 0, 7], sizes = [4, 16, 6], strides = [1, 1, 1]} : vector<4x16x16xf32> to vector<4x16x6xf32>
    %cst_57 = arith.constant 0.109360695 : f32
    %205 = vector.broadcast %cst_57 : f32 to vector<4x16x6xf32>
    %206 = arith.mulf %205, %204 : vector<4x16x6xf32>
    %207 = arith.addf %203, %206 : vector<4x16x6xf32>
    %208 = vector.extract_strided_slice %176 {offsets = [0, 0, 8], sizes = [4, 16, 6], strides = [1, 1, 1]} : vector<4x16x16xf32> to vector<4x16x6xf32>
    %cst_58 = arith.constant 0.0360007733 : f32
    %209 = vector.broadcast %cst_58 : f32 to vector<4x16x6xf32>
    %210 = arith.mulf %209, %208 : vector<4x16x6xf32>
    %211 = arith.addf %207, %210 : vector<4x16x6xf32>
    %212 = vector.extract_strided_slice %176 {offsets = [0, 0, 9], sizes = [4, 16, 6], strides = [1, 1, 1]} : vector<4x16x16xf32> to vector<4x16x6xf32>
    %cst_59 = arith.constant 0.00759875868 : f32
    %213 = vector.broadcast %cst_59 : f32 to vector<4x16x6xf32>
    %214 = arith.mulf %213, %212 : vector<4x16x6xf32>
    %215 = arith.addf %211, %214 : vector<4x16x6xf32>
    %216 = vector.extract_strided_slice %176 {offsets = [0, 0, 10], sizes = [4, 16, 6], strides = [1, 1, 1]} : vector<4x16x16xf32> to vector<4x16x6xf32>
    %cst_60 = arith.constant 0.00102838024 : f32
    %217 = vector.broadcast %cst_60 : f32 to vector<4x16x6xf32>
    %218 = arith.mulf %217, %216 : vector<4x16x6xf32>
    %219 = arith.addf %215, %218 : vector<4x16x6xf32>
    %220 = vector.extract_strided_slice %219 {offsets = [0, 0, 0], sizes = [4, 6, 6], strides = [1, 1, 1]} : vector<4x16x6xf32> to vector<4x6x6xf32>
    %cst_61 = arith.constant 0.00102838024 : f32
    %221 = vector.broadcast %cst_61 : f32 to vector<4x6x6xf32>
    %222 = arith.mulf %221, %220 : vector<4x6x6xf32>
    %223 = vector.extract_strided_slice %219 {offsets = [0, 1, 0], sizes = [4, 6, 6], strides = [1, 1, 1]} : vector<4x16x6xf32> to vector<4x6x6xf32>
    %cst_62 = arith.constant 0.00759875868 : f32
    %224 = vector.broadcast %cst_62 : f32 to vector<4x6x6xf32>
    %225 = arith.mulf %224, %223 : vector<4x6x6xf32>
    %226 = arith.addf %222, %225 : vector<4x6x6xf32>
    %227 = vector.extract_strided_slice %219 {offsets = [0, 2, 0], sizes = [4, 6, 6], strides = [1, 1, 1]} : vector<4x16x6xf32> to vector<4x6x6xf32>
    %cst_63 = arith.constant 0.0360007733 : f32
    %228 = vector.broadcast %cst_63 : f32 to vector<4x6x6xf32>
    %229 = arith.mulf %228, %227 : vector<4x6x6xf32>
    %230 = arith.addf %226, %229 : vector<4x6x6xf32>
    %231 = vector.extract_strided_slice %219 {offsets = [0, 3, 0], sizes = [4, 6, 6], strides = [1, 1, 1]} : vector<4x16x6xf32> to vector<4x6x6xf32>
    %cst_64 = arith.constant 0.109360695 : f32
    %232 = vector.broadcast %cst_64 : f32 to vector<4x6x6xf32>
    %233 = arith.mulf %232, %231 : vector<4x6x6xf32>
    %234 = arith.addf %230, %233 : vector<4x6x6xf32>
    %235 = vector.extract_strided_slice %219 {offsets = [0, 4, 0], sizes = [4, 6, 6], strides = [1, 1, 1]} : vector<4x16x6xf32> to vector<4x6x6xf32>
    %cst_65 = arith.constant 0.213005543 : f32
    %236 = vector.broadcast %cst_65 : f32 to vector<4x6x6xf32>
    %237 = arith.mulf %236, %235 : vector<4x6x6xf32>
    %238 = arith.addf %234, %237 : vector<4x6x6xf32>
    %239 = vector.extract_strided_slice %219 {offsets = [0, 5, 0], sizes = [4, 6, 6], strides = [1, 1, 1]} : vector<4x16x6xf32> to vector<4x6x6xf32>
    %cst_66 = arith.constant 0.266011745 : f32
    %240 = vector.broadcast %cst_66 : f32 to vector<4x6x6xf32>
    %241 = arith.mulf %240, %239 : vector<4x6x6xf32>
    %242 = arith.addf %238, %241 : vector<4x6x6xf32>
    %243 = vector.extract_strided_slice %219 {offsets = [0, 6, 0], sizes = [4, 6, 6], strides = [1, 1, 1]} : vector<4x16x6xf32> to vector<4x6x6xf32>
    %cst_67 = arith.constant 0.213005543 : f32
    %244 = vector.broadcast %cst_67 : f32 to vector<4x6x6xf32>
    %245 = arith.mulf %244, %243 : vector<4x6x6xf32>
    %246 = arith.addf %242, %245 : vector<4x6x6xf32>
    %247 = vector.extract_strided_slice %219 {offsets = [0, 7, 0], sizes = [4, 6, 6], strides = [1, 1, 1]} : vector<4x16x6xf32> to vector<4x6x6xf32>
    %cst_68 = arith.constant 0.109360695 : f32
    %248 = vector.broadcast %cst_68 : f32 to vector<4x6x6xf32>
    %249 = arith.mulf %248, %247 : vector<4x6x6xf32>
    %250 = arith.addf %246, %249 : vector<4x6x6xf32>
    %251 = vector.extract_strided_slice %219 {offsets = [0, 8, 0], sizes = [4, 6, 6], strides = [1, 1, 1]} : vector<4x16x6xf32> to vector<4x6x6xf32>
    %cst_69 = arith.constant 0.0360007733 : f32
    %252 = vector.broadcast %cst_69 : f32 to vector<4x6x6xf32>
    %253 = arith.mulf %252, %251 : vector<4x6x6xf32>
    %254 = arith.addf %250, %253 : vector<4x6x6xf32>
    %255 = vector.extract_strided_slice %219 {offsets = [0, 9, 0], sizes = [4, 6, 6], strides = [1, 1, 1]} : vector<4x16x6xf32> to vector<4x6x6xf32>
    %cst_70 = arith.constant 0.00759875868 : f32
    %256 = vector.broadcast %cst_70 : f32 to vector<4x6x6xf32>
    %257 = arith.mulf %256, %255 : vector<4x6x6xf32>
    %258 = arith.addf %254, %257 : vector<4x6x6xf32>
    %259 = vector.extract_strided_slice %219 {offsets = [0, 10, 0], sizes = [4, 6, 6], strides = [1, 1, 1]} : vector<4x16x6xf32> to vector<4x6x6xf32>
    %cst_71 = arith.constant 0.00102838024 : f32
    %260 = vector.broadcast %cst_71 : f32 to vector<4x6x6xf32>
    %261 = arith.mulf %260, %259 : vector<4x6x6xf32>
    %262 = arith.addf %258, %261 : vector<4x6x6xf32>
    %263 = arith.mulf %3, %3 : vector<4x16x16xf32>
    %264 = vector.extract_strided_slice %263 {offsets = [0, 0, 0], sizes = [4, 16, 6], strides = [1, 1, 1]} : vector<4x16x16xf32> to vector<4x16x6xf32>
    %cst_72 = arith.constant 0.00102838024 : f32
    %265 = vector.broadcast %cst_72 : f32 to vector<4x16x6xf32>
    %266 = arith.mulf %265, %264 : vector<4x16x6xf32>
    %267 = vector.extract_strided_slice %263 {offsets = [0, 0, 1], sizes = [4, 16, 6], strides = [1, 1, 1]} : vector<4x16x16xf32> to vector<4x16x6xf32>
    %cst_73 = arith.constant 0.00759875868 : f32
    %268 = vector.broadcast %cst_73 : f32 to vector<4x16x6xf32>
    %269 = arith.mulf %268, %267 : vector<4x16x6xf32>
    %270 = arith.addf %266, %269 : vector<4x16x6xf32>
    %271 = vector.extract_strided_slice %263 {offsets = [0, 0, 2], sizes = [4, 16, 6], strides = [1, 1, 1]} : vector<4x16x16xf32> to vector<4x16x6xf32>
    %cst_74 = arith.constant 0.0360007733 : f32
    %272 = vector.broadcast %cst_74 : f32 to vector<4x16x6xf32>
    %273 = arith.mulf %272, %271 : vector<4x16x6xf32>
    %274 = arith.addf %270, %273 : vector<4x16x6xf32>
    %275 = vector.extract_strided_slice %263 {offsets = [0, 0, 3], sizes = [4, 16, 6], strides = [1, 1, 1]} : vector<4x16x16xf32> to vector<4x16x6xf32>
    %cst_75 = arith.constant 0.109360695 : f32
    %276 = vector.broadcast %cst_75 : f32 to vector<4x16x6xf32>
    %277 = arith.mulf %276, %275 : vector<4x16x6xf32>
    %278 = arith.addf %274, %277 : vector<4x16x6xf32>
    %279 = vector.extract_strided_slice %263 {offsets = [0, 0, 4], sizes = [4, 16, 6], strides = [1, 1, 1]} : vector<4x16x16xf32> to vector<4x16x6xf32>
    %cst_76 = arith.constant 0.213005543 : f32
    %280 = vector.broadcast %cst_76 : f32 to vector<4x16x6xf32>
    %281 = arith.mulf %280, %279 : vector<4x16x6xf32>
    %282 = arith.addf %278, %281 : vector<4x16x6xf32>
    %283 = vector.extract_strided_slice %263 {offsets = [0, 0, 5], sizes = [4, 16, 6], strides = [1, 1, 1]} : vector<4x16x16xf32> to vector<4x16x6xf32>
    %cst_77 = arith.constant 0.266011745 : f32
    %284 = vector.broadcast %cst_77 : f32 to vector<4x16x6xf32>
    %285 = arith.mulf %284, %283 : vector<4x16x6xf32>
    %286 = arith.addf %282, %285 : vector<4x16x6xf32>
    %287 = vector.extract_strided_slice %263 {offsets = [0, 0, 6], sizes = [4, 16, 6], strides = [1, 1, 1]} : vector<4x16x16xf32> to vector<4x16x6xf32>
    %cst_78 = arith.constant 0.213005543 : f32
    %288 = vector.broadcast %cst_78 : f32 to vector<4x16x6xf32>
    %289 = arith.mulf %288, %287 : vector<4x16x6xf32>
    %290 = arith.addf %286, %289 : vector<4x16x6xf32>
    %291 = vector.extract_strided_slice %263 {offsets = [0, 0, 7], sizes = [4, 16, 6], strides = [1, 1, 1]} : vector<4x16x16xf32> to vector<4x16x6xf32>
    %cst_79 = arith.constant 0.109360695 : f32
    %292 = vector.broadcast %cst_79 : f32 to vector<4x16x6xf32>
    %293 = arith.mulf %292, %291 : vector<4x16x6xf32>
    %294 = arith.addf %290, %293 : vector<4x16x6xf32>
    %295 = vector.extract_strided_slice %263 {offsets = [0, 0, 8], sizes = [4, 16, 6], strides = [1, 1, 1]} : vector<4x16x16xf32> to vector<4x16x6xf32>
    %cst_80 = arith.constant 0.0360007733 : f32
    %296 = vector.broadcast %cst_80 : f32 to vector<4x16x6xf32>
    %297 = arith.mulf %296, %295 : vector<4x16x6xf32>
    %298 = arith.addf %294, %297 : vector<4x16x6xf32>
    %299 = vector.extract_strided_slice %263 {offsets = [0, 0, 9], sizes = [4, 16, 6], strides = [1, 1, 1]} : vector<4x16x16xf32> to vector<4x16x6xf32>
    %cst_81 = arith.constant 0.00759875868 : f32
    %300 = vector.broadcast %cst_81 : f32 to vector<4x16x6xf32>
    %301 = arith.mulf %300, %299 : vector<4x16x6xf32>
    %302 = arith.addf %298, %301 : vector<4x16x6xf32>
    %303 = vector.extract_strided_slice %263 {offsets = [0, 0, 10], sizes = [4, 16, 6], strides = [1, 1, 1]} : vector<4x16x16xf32> to vector<4x16x6xf32>
    %cst_82 = arith.constant 0.00102838024 : f32
    %304 = vector.broadcast %cst_82 : f32 to vector<4x16x6xf32>
    %305 = arith.mulf %304, %303 : vector<4x16x6xf32>
    %306 = arith.addf %302, %305 : vector<4x16x6xf32>
    %307 = vector.extract_strided_slice %306 {offsets = [0, 0, 0], sizes = [4, 6, 6], strides = [1, 1, 1]} : vector<4x16x6xf32> to vector<4x6x6xf32>
    %cst_83 = arith.constant 0.00102838024 : f32
    %308 = vector.broadcast %cst_83 : f32 to vector<4x6x6xf32>
    %309 = arith.mulf %308, %307 : vector<4x6x6xf32>
    %310 = vector.extract_strided_slice %306 {offsets = [0, 1, 0], sizes = [4, 6, 6], strides = [1, 1, 1]} : vector<4x16x6xf32> to vector<4x6x6xf32>
    %cst_84 = arith.constant 0.00759875868 : f32
    %311 = vector.broadcast %cst_84 : f32 to vector<4x6x6xf32>
    %312 = arith.mulf %311, %310 : vector<4x6x6xf32>
    %313 = arith.addf %309, %312 : vector<4x6x6xf32>
    %314 = vector.extract_strided_slice %306 {offsets = [0, 2, 0], sizes = [4, 6, 6], strides = [1, 1, 1]} : vector<4x16x6xf32> to vector<4x6x6xf32>
    %cst_85 = arith.constant 0.0360007733 : f32
    %315 = vector.broadcast %cst_85 : f32 to vector<4x6x6xf32>
    %316 = arith.mulf %315, %314 : vector<4x6x6xf32>
    %317 = arith.addf %313, %316 : vector<4x6x6xf32>
    %318 = vector.extract_strided_slice %306 {offsets = [0, 3, 0], sizes = [4, 6, 6], strides = [1, 1, 1]} : vector<4x16x6xf32> to vector<4x6x6xf32>
    %cst_86 = arith.constant 0.109360695 : f32
    %319 = vector.broadcast %cst_86 : f32 to vector<4x6x6xf32>
    %320 = arith.mulf %319, %318 : vector<4x6x6xf32>
    %321 = arith.addf %317, %320 : vector<4x6x6xf32>
    %322 = vector.extract_strided_slice %306 {offsets = [0, 4, 0], sizes = [4, 6, 6], strides = [1, 1, 1]} : vector<4x16x6xf32> to vector<4x6x6xf32>
    %cst_87 = arith.constant 0.213005543 : f32
    %323 = vector.broadcast %cst_87 : f32 to vector<4x6x6xf32>
    %324 = arith.mulf %323, %322 : vector<4x6x6xf32>
    %325 = arith.addf %321, %324 : vector<4x6x6xf32>
    %326 = vector.extract_strided_slice %306 {offsets = [0, 5, 0], sizes = [4, 6, 6], strides = [1, 1, 1]} : vector<4x16x6xf32> to vector<4x6x6xf32>
    %cst_88 = arith.constant 0.266011745 : f32
    %327 = vector.broadcast %cst_88 : f32 to vector<4x6x6xf32>
    %328 = arith.mulf %327, %326 : vector<4x6x6xf32>
    %329 = arith.addf %325, %328 : vector<4x6x6xf32>
    %330 = vector.extract_strided_slice %306 {offsets = [0, 6, 0], sizes = [4, 6, 6], strides = [1, 1, 1]} : vector<4x16x6xf32> to vector<4x6x6xf32>
    %cst_89 = arith.constant 0.213005543 : f32
    %331 = vector.broadcast %cst_89 : f32 to vector<4x6x6xf32>
    %332 = arith.mulf %331, %330 : vector<4x6x6xf32>
    %333 = arith.addf %329, %332 : vector<4x6x6xf32>
    %334 = vector.extract_strided_slice %306 {offsets = [0, 7, 0], sizes = [4, 6, 6], strides = [1, 1, 1]} : vector<4x16x6xf32> to vector<4x6x6xf32>
    %cst_90 = arith.constant 0.109360695 : f32
    %335 = vector.broadcast %cst_90 : f32 to vector<4x6x6xf32>
    %336 = arith.mulf %335, %334 : vector<4x6x6xf32>
    %337 = arith.addf %333, %336 : vector<4x6x6xf32>
    %338 = vector.extract_strided_slice %306 {offsets = [0, 8, 0], sizes = [4, 6, 6], strides = [1, 1, 1]} : vector<4x16x6xf32> to vector<4x6x6xf32>
    %cst_91 = arith.constant 0.0360007733 : f32
    %339 = vector.broadcast %cst_91 : f32 to vector<4x6x6xf32>
    %340 = arith.mulf %339, %338 : vector<4x6x6xf32>
    %341 = arith.addf %337, %340 : vector<4x6x6xf32>
    %342 = vector.extract_strided_slice %306 {offsets = [0, 9, 0], sizes = [4, 6, 6], strides = [1, 1, 1]} : vector<4x16x6xf32> to vector<4x6x6xf32>
    %cst_92 = arith.constant 0.00759875868 : f32
    %343 = vector.broadcast %cst_92 : f32 to vector<4x6x6xf32>
    %344 = arith.mulf %343, %342 : vector<4x6x6xf32>
    %345 = arith.addf %341, %344 : vector<4x6x6xf32>
    %346 = vector.extract_strided_slice %306 {offsets = [0, 10, 0], sizes = [4, 6, 6], strides = [1, 1, 1]} : vector<4x16x6xf32> to vector<4x6x6xf32>
    %cst_93 = arith.constant 0.00102838024 : f32
    %347 = vector.broadcast %cst_93 : f32 to vector<4x6x6xf32>
    %348 = arith.mulf %347, %346 : vector<4x6x6xf32>
    %349 = arith.addf %345, %348 : vector<4x6x6xf32>
    %350 = arith.mulf %1, %3 : vector<4x16x16xf32>
    %351 = vector.extract_strided_slice %350 {offsets = [0, 0, 0], sizes = [4, 16, 6], strides = [1, 1, 1]} : vector<4x16x16xf32> to vector<4x16x6xf32>
    %cst_94 = arith.constant 0.00102838024 : f32
    %352 = vector.broadcast %cst_94 : f32 to vector<4x16x6xf32>
    %353 = arith.mulf %352, %351 : vector<4x16x6xf32>
    %354 = vector.extract_strided_slice %350 {offsets = [0, 0, 1], sizes = [4, 16, 6], strides = [1, 1, 1]} : vector<4x16x16xf32> to vector<4x16x6xf32>
    %cst_95 = arith.constant 0.00759875868 : f32
    %355 = vector.broadcast %cst_95 : f32 to vector<4x16x6xf32>
    %356 = arith.mulf %355, %354 : vector<4x16x6xf32>
    %357 = arith.addf %353, %356 : vector<4x16x6xf32>
    %358 = vector.extract_strided_slice %350 {offsets = [0, 0, 2], sizes = [4, 16, 6], strides = [1, 1, 1]} : vector<4x16x16xf32> to vector<4x16x6xf32>
    %cst_96 = arith.constant 0.0360007733 : f32
    %359 = vector.broadcast %cst_96 : f32 to vector<4x16x6xf32>
    %360 = arith.mulf %359, %358 : vector<4x16x6xf32>
    %361 = arith.addf %357, %360 : vector<4x16x6xf32>
    %362 = vector.extract_strided_slice %350 {offsets = [0, 0, 3], sizes = [4, 16, 6], strides = [1, 1, 1]} : vector<4x16x16xf32> to vector<4x16x6xf32>
    %cst_97 = arith.constant 0.109360695 : f32
    %363 = vector.broadcast %cst_97 : f32 to vector<4x16x6xf32>
    %364 = arith.mulf %363, %362 : vector<4x16x6xf32>
    %365 = arith.addf %361, %364 : vector<4x16x6xf32>
    %366 = vector.extract_strided_slice %350 {offsets = [0, 0, 4], sizes = [4, 16, 6], strides = [1, 1, 1]} : vector<4x16x16xf32> to vector<4x16x6xf32>
    %cst_98 = arith.constant 0.213005543 : f32
    %367 = vector.broadcast %cst_98 : f32 to vector<4x16x6xf32>
    %368 = arith.mulf %367, %366 : vector<4x16x6xf32>
    %369 = arith.addf %365, %368 : vector<4x16x6xf32>
    %370 = vector.extract_strided_slice %350 {offsets = [0, 0, 5], sizes = [4, 16, 6], strides = [1, 1, 1]} : vector<4x16x16xf32> to vector<4x16x6xf32>
    %cst_99 = arith.constant 0.266011745 : f32
    %371 = vector.broadcast %cst_99 : f32 to vector<4x16x6xf32>
    %372 = arith.mulf %371, %370 : vector<4x16x6xf32>
    %373 = arith.addf %369, %372 : vector<4x16x6xf32>
    %374 = vector.extract_strided_slice %350 {offsets = [0, 0, 6], sizes = [4, 16, 6], strides = [1, 1, 1]} : vector<4x16x16xf32> to vector<4x16x6xf32>
    %cst_100 = arith.constant 0.213005543 : f32
    %375 = vector.broadcast %cst_100 : f32 to vector<4x16x6xf32>
    %376 = arith.mulf %375, %374 : vector<4x16x6xf32>
    %377 = arith.addf %373, %376 : vector<4x16x6xf32>
    %378 = vector.extract_strided_slice %350 {offsets = [0, 0, 7], sizes = [4, 16, 6], strides = [1, 1, 1]} : vector<4x16x16xf32> to vector<4x16x6xf32>
    %cst_101 = arith.constant 0.109360695 : f32
    %379 = vector.broadcast %cst_101 : f32 to vector<4x16x6xf32>
    %380 = arith.mulf %379, %378 : vector<4x16x6xf32>
    %381 = arith.addf %377, %380 : vector<4x16x6xf32>
    %382 = vector.extract_strided_slice %350 {offsets = [0, 0, 8], sizes = [4, 16, 6], strides = [1, 1, 1]} : vector<4x16x16xf32> to vector<4x16x6xf32>
    %cst_102 = arith.constant 0.0360007733 : f32
    %383 = vector.broadcast %cst_102 : f32 to vector<4x16x6xf32>
    %384 = arith.mulf %383, %382 : vector<4x16x6xf32>
    %385 = arith.addf %381, %384 : vector<4x16x6xf32>
    %386 = vector.extract_strided_slice %350 {offsets = [0, 0, 9], sizes = [4, 16, 6], strides = [1, 1, 1]} : vector<4x16x16xf32> to vector<4x16x6xf32>
    %cst_103 = arith.constant 0.00759875868 : f32
    %387 = vector.broadcast %cst_103 : f32 to vector<4x16x6xf32>
    %388 = arith.mulf %387, %386 : vector<4x16x6xf32>
    %389 = arith.addf %385, %388 : vector<4x16x6xf32>
    %390 = vector.extract_strided_slice %350 {offsets = [0, 0, 10], sizes = [4, 16, 6], strides = [1, 1, 1]} : vector<4x16x16xf32> to vector<4x16x6xf32>
    %cst_104 = arith.constant 0.00102838024 : f32
    %391 = vector.broadcast %cst_104 : f32 to vector<4x16x6xf32>
    %392 = arith.mulf %391, %390 : vector<4x16x6xf32>
    %393 = arith.addf %389, %392 : vector<4x16x6xf32>
    %394 = vector.extract_strided_slice %393 {offsets = [0, 0, 0], sizes = [4, 6, 6], strides = [1, 1, 1]} : vector<4x16x6xf32> to vector<4x6x6xf32>
    %cst_105 = arith.constant 0.00102838024 : f32
    %395 = vector.broadcast %cst_105 : f32 to vector<4x6x6xf32>
    %396 = arith.mulf %395, %394 : vector<4x6x6xf32>
    %397 = vector.extract_strided_slice %393 {offsets = [0, 1, 0], sizes = [4, 6, 6], strides = [1, 1, 1]} : vector<4x16x6xf32> to vector<4x6x6xf32>
    %cst_106 = arith.constant 0.00759875868 : f32
    %398 = vector.broadcast %cst_106 : f32 to vector<4x6x6xf32>
    %399 = arith.mulf %398, %397 : vector<4x6x6xf32>
    %400 = arith.addf %396, %399 : vector<4x6x6xf32>
    %401 = vector.extract_strided_slice %393 {offsets = [0, 2, 0], sizes = [4, 6, 6], strides = [1, 1, 1]} : vector<4x16x6xf32> to vector<4x6x6xf32>
    %cst_107 = arith.constant 0.0360007733 : f32
    %402 = vector.broadcast %cst_107 : f32 to vector<4x6x6xf32>
    %403 = arith.mulf %402, %401 : vector<4x6x6xf32>
    %404 = arith.addf %400, %403 : vector<4x6x6xf32>
    %405 = vector.extract_strided_slice %393 {offsets = [0, 3, 0], sizes = [4, 6, 6], strides = [1, 1, 1]} : vector<4x16x6xf32> to vector<4x6x6xf32>
    %cst_108 = arith.constant 0.109360695 : f32
    %406 = vector.broadcast %cst_108 : f32 to vector<4x6x6xf32>
    %407 = arith.mulf %406, %405 : vector<4x6x6xf32>
    %408 = arith.addf %404, %407 : vector<4x6x6xf32>
    %409 = vector.extract_strided_slice %393 {offsets = [0, 4, 0], sizes = [4, 6, 6], strides = [1, 1, 1]} : vector<4x16x6xf32> to vector<4x6x6xf32>
    %cst_109 = arith.constant 0.213005543 : f32
    %410 = vector.broadcast %cst_109 : f32 to vector<4x6x6xf32>
    %411 = arith.mulf %410, %409 : vector<4x6x6xf32>
    %412 = arith.addf %408, %411 : vector<4x6x6xf32>
    %413 = vector.extract_strided_slice %393 {offsets = [0, 5, 0], sizes = [4, 6, 6], strides = [1, 1, 1]} : vector<4x16x6xf32> to vector<4x6x6xf32>
    %cst_110 = arith.constant 0.266011745 : f32
    %414 = vector.broadcast %cst_110 : f32 to vector<4x6x6xf32>
    %415 = arith.mulf %414, %413 : vector<4x6x6xf32>
    %416 = arith.addf %412, %415 : vector<4x6x6xf32>
    %417 = vector.extract_strided_slice %393 {offsets = [0, 6, 0], sizes = [4, 6, 6], strides = [1, 1, 1]} : vector<4x16x6xf32> to vector<4x6x6xf32>
    %cst_111 = arith.constant 0.213005543 : f32
    %418 = vector.broadcast %cst_111 : f32 to vector<4x6x6xf32>
    %419 = arith.mulf %418, %417 : vector<4x6x6xf32>
    %420 = arith.addf %416, %419 : vector<4x6x6xf32>
    %421 = vector.extract_strided_slice %393 {offsets = [0, 7, 0], sizes = [4, 6, 6], strides = [1, 1, 1]} : vector<4x16x6xf32> to vector<4x6x6xf32>
    %cst_112 = arith.constant 0.109360695 : f32
    %422 = vector.broadcast %cst_112 : f32 to vector<4x6x6xf32>
    %423 = arith.mulf %422, %421 : vector<4x6x6xf32>
    %424 = arith.addf %420, %423 : vector<4x6x6xf32>
    %425 = vector.extract_strided_slice %393 {offsets = [0, 8, 0], sizes = [4, 6, 6], strides = [1, 1, 1]} : vector<4x16x6xf32> to vector<4x6x6xf32>
    %cst_113 = arith.constant 0.0360007733 : f32
    %426 = vector.broadcast %cst_113 : f32 to vector<4x6x6xf32>
    %427 = arith.mulf %426, %425 : vector<4x6x6xf32>
    %428 = arith.addf %424, %427 : vector<4x6x6xf32>
    %429 = vector.extract_strided_slice %393 {offsets = [0, 9, 0], sizes = [4, 6, 6], strides = [1, 1, 1]} : vector<4x16x6xf32> to vector<4x6x6xf32>
    %cst_114 = arith.constant 0.00759875868 : f32
    %430 = vector.broadcast %cst_114 : f32 to vector<4x6x6xf32>
    %431 = arith.mulf %430, %429 : vector<4x6x6xf32>
    %432 = arith.addf %428, %431 : vector<4x6x6xf32>
    %433 = vector.extract_strided_slice %393 {offsets = [0, 10, 0], sizes = [4, 6, 6], strides = [1, 1, 1]} : vector<4x16x6xf32> to vector<4x6x6xf32>
    %cst_115 = arith.constant 0.00102838024 : f32
    %434 = vector.broadcast %cst_115 : f32 to vector<4x6x6xf32>
    %435 = arith.mulf %434, %433 : vector<4x6x6xf32>
    %436 = arith.addf %432, %435 : vector<4x6x6xf32>
    %c0_116 = arith.constant 0 : index
    %437 = memref.load %arg1[%c0_116] : memref<2xf32, #tpu.memory_space<smem>>
    %c1 = arith.constant 1 : index
    %438 = memref.load %arg1[%c1] : memref<2xf32, #tpu.memory_space<smem>>
    %439 = arith.mulf %89, %89 : vector<4x6x6xf32>
    %440 = arith.mulf %175, %175 : vector<4x6x6xf32>
    %441 = arith.mulf %89, %175 : vector<4x6x6xf32>
    %442 = arith.subf %262, %439 : vector<4x6x6xf32>
    %443 = arith.subf %349, %440 : vector<4x6x6xf32>
    %444 = arith.subf %436, %441 : vector<4x6x6xf32>
    %cst_117 = arith.constant 2.000000e+00 : f32
    %445 = vector.broadcast %cst_117 : f32 to vector<4x6x6xf32>
    %446 = arith.mulf %445, %444 : vector<4x6x6xf32>
    %447 = vector.broadcast %438 : f32 to vector<4x6x6xf32>
    %448 = arith.addf %446, %447 : vector<4x6x6xf32>
    %449 = arith.addf %442, %443 : vector<4x6x6xf32>
    %450 = vector.broadcast %438 : f32 to vector<4x6x6xf32>
    %451 = arith.addf %449, %450 : vector<4x6x6xf32>
    %cst_118 = arith.constant 2.000000e+00 : f32
    %452 = vector.broadcast %cst_118 : f32 to vector<4x6x6xf32>
    %453 = arith.mulf %452, %441 : vector<4x6x6xf32>
    %454 = vector.broadcast %437 : f32 to vector<4x6x6xf32>
    %455 = arith.addf %453, %454 : vector<4x6x6xf32>
    %456 = arith.mulf %455, %448 : vector<4x6x6xf32>
    %457 = arith.addf %439, %440 : vector<4x6x6xf32>
    %458 = vector.broadcast %437 : f32 to vector<4x6x6xf32>
    %459 = arith.addf %457, %458 : vector<4x6x6xf32>
    %460 = arith.mulf %459, %451 : vector<4x6x6xf32>
    %cst_119 = arith.constant 1.000000e-15 : f32
    %461 = vector.broadcast %cst_119 : f32 to vector<4x6x6xf32>
    %462 = arith.addf %460, %461 : vector<4x6x6xf32>
    %463 = arith.divf %456, %462 : vector<4x6x6xf32>
    %464 = vector.shape_cast %463 : vector<4x6x6xf32> to vector<1x4x6x6xf32>
    %cst_120 = arith.constant dense<0.000000e+00> : vector<1xf32>
    %465 = vector.multi_reduction <add>, %464, %cst_120 [1, 2, 3] : vector<1x4x6x6xf32> to vector<1xf32>
    %466 = vector.shape_cast %465 : vector<1xf32> to vector<1x1x1x1xf32>
    %467 = vector.extract %466[0, 0, 0, 0] : f32 from vector<1x1x1x1xf32>
    %468 = vector.broadcast %467 : f32 to vector<1x1x1xf32>
    %c0_121 = arith.constant 0 : index
    %c0_122 = arith.constant 0 : index
    %c0_123 = arith.constant 0 : index
    %469 = vector.load %arg4[%c0_121, %c0_122, %c0_123] : memref<1x1x1xf32, #tpu.memory_space<vmem>>, vector<1x1x1xf32>
    tpu.vector_store %arg4[%c0_121, %c0_122, %c0_123], %468 {strides = array<i32>} : memref<1x1x1xf32, #tpu.memory_space<vmem>>, vector<1x1x1xf32>,
    return
  }
  func.func @transform_0(%arg0: i32) -> i32 {
    %c0_i32 = arith.constant 0 : i32
    %c0_i32_0 = arith.constant 0 : i32
    return %c0_i32 : i32
  }
  func.func @transform_1(%arg0: i32) -> (i32, i32, i32, i32) {
    %c0_i32 = arith.constant 0 : i32
    %c0_i32_0 = arith.constant 0 : i32
    %c0_i32_1 = arith.constant 0 : i32
    %c0_i32_2 = arith.constant 0 : i32
    return %arg0, %c0_i32, %c0_i32_0, %c0_i32_1 : i32, i32, i32, i32
  }
  func.func @transform_2(%arg0: i32) -> (i32, i32, i32, i32) {
    %c0_i32 = arith.constant 0 : i32
    %c0_i32_0 = arith.constant 0 : i32
    %c0_i32_1 = arith.constant 0 : i32
    %c0_i32_2 = arith.constant 0 : i32
    return %arg0, %c0_i32, %c0_i32_0, %c0_i32_1 : i32, i32, i32, i32
  }
  func.func @transform_3(%arg0: i32) -> (i32, i32, i32) {
    %c0_i32 = arith.constant 0 : i32
    %c0_i32_0 = arith.constant 0 : i32
    %c0_i32_1 = arith.constant 0 : i32
    return %arg0, %c0_i32, %c0_i32_0 : i32, i32, i32
  }
}

</mosaic_0001>

<bundles_post_ra>
// kernel: ssim_pallas.1
= control target key start
LH: loop header
LB: loop body
LE: loop exit
PB: predicated region body
PF: predicated region fallthrough
CT: control target
= control target key end

     0   :  { %8 = vsyncpa [#allocation4], 0  ;;  %s7488_s0 = inlined_call_operand.vmem [shape: f32[2], index: 0, kind: input, shape index: {}]   ;;  %s7489_s1 = inlined_call_operand.vmem [shape: f32[2,4,16,16], index: 1, kind: input, shape index: {}]   ;;  %s7490_s2 = inlined_call_operand.hbm [shape: f32[2,4,16,16], index: 2, kind: input, shape index: {}]   ;;  %s7491_s3 = inlined_call_operand.vmem [shape: f32[2,1,1], index: 3, kind: output, shape index: {}]  }
   0x1   :  { %9 = vsyncpa [#allocation3], 0 }
   0x2   :  { %11 = vsyncpa [#allocation3 + $0x1], 0  ;;  %s4006_s12 = smov 0   ;;  %s4008_s13 = smov 0  }
   0x3   :  { %s4010_s14 = smov 0   ;;  %s4012_s15 = smov 0  }
   0x4 LB: > { %s4022_s16 = sadd.s32 4294967295, %s3971_s15   ;;  %s4024_s17 = sadd.s32 1, %s3971_s15   ;;  %s3971_s15 = sphi %s4012_s15, %s8263_s15   ;;  %s3967_s14 = sphi %s4010_s14, %s8262_s14   ;;  %s3963_s13 = sphi %s4008_s13, %s8261_s13   ;;  %s3959_s12 = sphi %s4006_s12, %s8260_s12  }
   0x5   : > { %s68_s18 = ssub.s32 %s3971_s15, %s4024_s17  ;;  %s71_s19 = sadd.s32 1, %s3967_s14 }
   0x6   : > { %p69_p0 = scmp.eq.s32.totalorder %s68_s18, 0  ;;  %p78_p1 = scmp.ne.s32.totalorder %s3967_s14, %s3963_s13 }
   0x7   : > { %p79_p2 = scmp.eq.s32.totalorder %s3971_s15, 0  ;;  %p84_p3 = scmp.ne.s32.totalorder %s3963_s13, %s3959_s12 }
   0x8   : > { %s4032_s20 = scalar_select %p69_p0, %s3967_s14, %s71_s19  }
   0x9   : > { %p80_p4 = por %p79_p2, %p78_p1  ;;  %p85_p5 = scmp.eq.s32.totalorder %s4022_s16, 0 }
   0xa   : > { %p3784_p6 = scmp.ge.s32.totalorder %s3971_s15, 1  ;;  %p121_p7 = scmp.lt.s32.totalorder %s3971_s15, 3 }
   0xb   : > { %p4037_p8 = por %p85_p5, %p84_p3  ;;  %s133_s25 = sshll.u32 %s7488_s0, 4  ;;  %s134_s25 = int_to_ptr.vmem [resolvable:$true] %s133_s25 }
   0xc   : > { %p4041_p9 = pnand %p3784_p6, %p121_p7  ;;  %p3817_p11 = scmp.lt.s32.totalorder %s3971_s15, 2 }
   0xd   : > { %s152_s26 = sand.u32 1, %s3967_s14   ;;  %s3973_s29 = smov [#allocation2]  }
   0xe   : > { %p3808_p10 = pneg %p4041_p9  ;;  %p4053_p13 = pnand %p3817_p11, %p80_p4 }
   0xf   : > { %s3787_s28 = sshll.u32 %s152_s26, 6  ;;  %s3798_s30 = sshll.u32 %s3971_s15, 6 }
  0x10   : > { %p3809_p12 = pnand %p3808_p10, %p85_p5  ;;  %s161_s6 = scalar_lea.hbm %s7490_s2, %s3798_s30 }
  0x11   : > { %s156_s7 = scalar_lea.vmem [#allocation5], %s3787_s28  ;;  %s162_s9 = sshll.u32 %s161_s6, 4  ;;  %s163_s9 = int_to_ptr.hbm [resolvable:$true] %s162_s9 }
  0x12   : > { %3811 = dma.vmem_to_smem (!%p3809_p12), %s134_s25, 16, %s3973_s29, [#allocation4]  }
  0x13   : > { %s164_s8 = sshll.u32 %s156_s7, 4  ;;  %s153_s10 = scalar_lea.sflag [#allocation3], %s152_s26  ;;  %s165_s8 = int_to_ptr.vmem [resolvable:$true] %s164_s8 }
  0x14   : > { %s3903_s11 = sshra.s32 %s163_s9, 4  ;;  %p3907_p1 = pneg %p4053_p13  ;;  %s3904_s11 = int_to_ptr.hbm [resolvable:$true] %s3903_s11 }
  0x15   : > { %s3905_s12 = scalar_lea.hbm %s3904_s11, 64  ;;  %s3910_s19 = scalar_lea.hbm %s7490_s2, 128 }
  0x16   : > { %p3906_p0 = scmp.ne.s32.totalorder %s3904_s11, %s3905_s12  ;;  %p3911_p4 = scmp.lt.s32.totalorder %s3904_s11, %s7490_s2 }
  0x17   : > { %p3912_p6 = scmp.lt.s32.totalorder %s3910_s19, %s3905_s12 }
  0x18   : > { %p3908_p2 = pnand %p3907_p1, %p3906_p0 }
  0x19   : > { %p3913_p7 = por %p3912_p6, %p3911_p4 }
  0x1a   : > { %p3909_p3 = pneg %p3908_p2 }
  0x1c   : > { %p3914_p10 = pnand %p3913_p7, %p3909_p3 }
  0x1e   : > { %3917 = shalt.err (!%p3914_p10)
}
  0x1f   : > { %s3974_s25 = smov 128   ;;  %s3975_s26 = smov 8  }
  0x20   : > { %3815 = dma.hbm_to_vmem [thread:$0]  (!%p4053_p13), %s163_s9, 1024, %s165_s8, %s153_s10, %s3974_s25, %s3974_s25, %s3975_s26  }
  0x21   : > { %176 = sbr.rel (%p4041_p9) target bundleno = 1462 (0x5b6), region = 32 }
  0x26   : > { %3950 = dma.done.wait (%p85_p5), [#allocation4], 16  }
  0x27   : > { %3952 = vsyncadd (%p85_p5), [#allocation4], 4294967280  ;;  %s183_s28 = sand.u32 1, %s3963_s13  }
  0x28   : > { %s3792_s29 = sshll.u32 %s183_s28, 6  ;;  %s184_s30 = scalar_lea.sflag [#allocation3], %s183_s28 }
  0x29   : > { %s4077_s4 = scalar_lea.vmem [#allocation5], %s3792_s29 }
  0x2a   : > { %3954 = dma.done.wait (%p4037_p8), %s184_s30, 1024  }
  0x2b   : > { %3956 = vsyncadd (%p4037_p8), %s184_s30, 4294966272 }
  0x2c   : > { %193 = sfence }
  0x2d   : > { %p215_p9 = scmp.lt.s32.totalorder %s4022_s16, 1  ;;  %s3976_s21 = smov 127   ;;  %vm715_vm0 = vcmask 1044480   ;;  %vm752_vm1 = vcmask 1043456   ;;  %vm789_vm2 = vcmask 1042432   ;;  %vm810_vm3 = vcmask 1041408  }
  0x2e   : > { %s3977_s7 = smov 126   ;;  %s3978_s8 = smov 125   ;;  %vm831_vm4 = vcmask 1040384  }
  0x2f   : > { %s8265_s16 = smov (!%p215_p9, %s4022_s16), 1  ;;  %s3979_s9 = smov 124  }
  0x30   : > { %s3799_s22 = sshll.u32 %s8265_s16, 6  ;;  %s3980_s10 = smov 123  }
  0x31   : > { %s4091_s6 = scalar_lea.vmem %s7489_s1, %s3799_s22  ;;  %s3981_s11 = smov 122  }
  0x32   : > { %v4094_v0 = vld [vmem:[%s4091_s6 + $0x20] sm:$0xff]  ;;  %v4097_v1 = vld [vmem:[%s4091_s6 + $0x10] sm:$0xff]  ;;  %v4118_v6 = vld [vmem:[%s4091_s6 + $0x28] sm:$0xff]  ;;  %s3982_s12 = smov 121   ;;  %s3983_s18 = smov 120  }
  0x33   : > { %v4100_v2 = vld [vmem:[%s4091_s6] sm:$0xff]  ;;  %v4103_v3 = vmul.f32 0.0075987587, %v4094_v0  ;;  %v4106_v4 = vmul.f32 0.0075987587, %v4097_v1  ;;  %v4121_v7 = vld [vmem:[%s4091_s6 + $0x18] sm:$0xff]  ;;  %s222_s28 = scalar_lea.vmem %s7491_s3, %s8265_s16 }
  0x34   : > { %v4109_v5 = vmul.f32 0.0075987587, %v4100_v2  ;;  %v4124_v8 = vld [vmem:[%s4091_s6 + $0x8] sm:$0xff]  ;;  %v4127_v9 = vmul.f32 0.0075987587, %v4118_v6  ;;  %v4142_v12 = vld [vmem:[%s4091_s6 + $0x38] sm:$0xff] }
  0x35   : > { %271 = vrot.lane.b32.xlu2 %v4103_v3, %s3976_s21  ;;  %267 = vrot.lane.b32.xlu1 %v4106_v4, %s3976_s21  ;;  %v4130_v10 = vmul.f32 0.0075987587, %v4121_v7  ;;  %v4133_v11 = vmul.f32 0.0075987587, %v4124_v8  ;;  %v4145_v13 = vld [vmem:[%s4091_s6 + $0x30] sm:$0xff]  ;;  %s3984_s15 = smov 119  }
  0x36   : > { %263 = vrot.lane.b32.xlu0 %v4109_v5, %s3976_s21  ;;  %v4148_v14 = vmul.f32 0.0075987587, %v4142_v12  ;;  %v4151_v15 = vmul.f32 0.036000773, %v4100_v2  ;;  %v4154_v16 = vmul.f32 0.0075987587, %v4145_v13 }
  0x37   : > { %v4163_v17 = vmul.f32 0.036000773, %v4097_v1  ;;  %v4166_v18 = vmul.f32 0.036000773, %v4121_v7  ;;  %v4169_v19 = vmul.f32 0.036000773, %v4124_v8 }
  0x38   : > { %v4178_v20 = vmul.f32 0.036000773, %v4118_v6  ;;  %v4181_v21 = vmul.f32 0.036000773, %v4145_v13  ;;  %v4184_v22 = vmul.f32 0.036000773, %v4094_v0 }
  0x39   : > { %v4193_v23 = vmul.f32 0.109360695, %v4100_v2  ;;  %v4196_v24 = vmul.f32 0.109360695, %v4124_v8  ;;  %v4199_v25 = vmul.f32 0.036000773, %v4142_v12 }
  0x3a   : > { %v4208_v26 = vmul.f32 0.109360695, %v4121_v7  ;;  %v4211_v27 = vmul.f32 0.109360695, %v4094_v0  ;;  %v4214_v28 = vmul.f32 0.109360695, %v4097_v1 }
  0x3b   : > { %v4223_v29 = vmul.f32 0.109360695, %v4145_v13  ;;  %v4226_v30 = vmul.f32 0.109360695, %v4142_v12  ;;  %v4229_v31 = vmul.f32 0.109360695, %v4118_v6 }
  0x3c   : > { %v392_v32 = vmul.f32 0.21300554, %v4124_v8  ;;  %v393_v33 = vmul.f32 0.21300554, %v4097_v1  ;;  %v391_v34 = vmul.f32 0.21300554, %v4100_v2 }
  0x3d   : > { %273 = vrot.lane.b32.xlu2 %v4127_v9, %s3976_s21  ;;  %269 = vrot.lane.b32.xlu1 %v4130_v10, %s3976_s21  ;;  %v395_v35 = vmul.f32 0.21300554, %v4094_v0  ;;  %v396_v36 = vmul.f32 0.21300554, %v4118_v6  ;;  %v394_v37 = vmul.f32 0.21300554, %v4121_v7 }
  0x3e   : > { %265 = vrot.lane.b32.xlu0 %v4133_v11, %s3976_s21  ;;  %v398_v38 = vmul.f32 0.21300554, %v4142_v12  ;;  %v439_v39 = vmul.f32 0.26601174, %v4100_v2  ;;  %v397_v40 = vmul.f32 0.21300554, %v4145_v13 }
  0x3f   : > { %v441_v41 = vmul.f32 0.26601174, %v4097_v1  ;;  %v442_v42 = vmul.f32 0.26601174, %v4121_v7  ;;  %v440_v43 = vmul.f32 0.26601174, %v4124_v8 }
  0x40   : > { %v444_v45 = vmul.f32 0.26601174, %v4118_v6  ;;  %v445_v46 = vmul.f32 0.26601174, %v4145_v13  ;;  %v443_v47 = vmul.f32 0.26601174, %v4094_v0 }
  0x41   : > { %v446_v49 = vmul.f32 0.26601174, %v4142_v12  ;;  %s3985_s19 = smov 118   ;;  %s7164_s23 = sld [smem:[#allocation2 + $0x1]] }
  0x42   : > { %s7171_s24 = sld [smem:[#allocation2]] }
  0x45   : > { %277 = vrot.lane.b32.xlu1 %v4148_v14, %s3976_s21  ;;  %311 = vrot.lane.b32.xlu2 %v4151_v15, %s3977_s7 }
  0x46   : > { %275 = vrot.lane.b32.xlu0 %v4154_v16, %s3976_s21 }
  0x4d   : > { %315 = vrot.lane.b32.xlu1 %v4163_v17, %s3977_s7  ;;  %317 = vrot.lane.b32.xlu2 %v4166_v18, %s3977_s7 }
  0x4e   : > { %313 = vrot.lane.b32.xlu0 %v4169_v19, %s3977_s7 }
  0x55   : > { %321 = vrot.lane.b32.xlu1 %v4178_v20, %s3977_s7  ;;  %323 = vrot.lane.b32.xlu2 %v4181_v21, %s3977_s7 }
  0x56   : > { %319 = vrot.lane.b32.xlu0 %v4184_v22, %s3977_s7 }
  0x5d   : > { %359 = vrot.lane.b32.xlu1 %v4193_v23, %s3978_s8  ;;  %361 = vrot.lane.b32.xlu2 %v4196_v24, %s3978_s8 }
  0x5e   : > { %325 = vrot.lane.b32.xlu0 %v4199_v25, %s3977_s7 }
  0x65   : > { %365 = vrot.lane.b32.xlu1 %v4208_v26, %s3978_s8  ;;  %367 = vrot.lane.b32.xlu2 %v4211_v27, %s3978_s8 }
  0x66   : > { %363 = vrot.lane.b32.xlu0 %v4214_v28, %s3978_s8 }
  0x6d   : > { %371 = vrot.lane.b32.xlu1 %v4223_v29, %s3978_s8  ;;  %373 = vrot.lane.b32.xlu2 %v4226_v30, %s3978_s8 }
  0x6e   : > { %369 = vrot.lane.b32.xlu0 %v4229_v31, %s3978_s8 }
  0x75   : > { %409 = vrot.lane.b32.xlu1 %v392_v32, %s3979_s9  ;;  %411 = vrot.lane.b32.xlu2 %v393_v33, %s3979_s9 }
  0x76   : > { %407 = vrot.lane.b32.xlu0 %v391_v34, %s3979_s9 }
  0x7d   : > { %415 = vrot.lane.b32.xlu1 %v395_v35, %s3979_s9  ;;  %417 = vrot.lane.b32.xlu2 %v396_v36, %s3979_s9 }
  0x7e   : > { %413 = vrot.lane.b32.xlu0 %v394_v37, %s3979_s9 }
  0x85   : > { %421 = vrot.lane.b32.xlu1 %v398_v38, %s3979_s9  ;;  %455 = vrot.lane.b32.xlu2 %v439_v39, %s3980_s10  ;;  %v4440_v39 = vmul.f32 0.0010283802, %v4142_v12 }
  0x86   : > { %419 = vrot.lane.b32.xlu0 %v397_v40, %s3979_s9 }
  0x87   : > { %7598 = vst [vmem:[#allocation46_spill] sm:$0xff] %v4440_v39 }
  0x8d   : > { %459 = vrot.lane.b32.xlu1 %v441_v41, %s3980_s10  ;;  %461 = vrot.lane.b32.xlu2 %v442_v42, %s3980_s10  ;;  %v4452_v41 = vld [vmem:[%s4077_s4 + $0x18] sm:$0xff]  ;;  %v4455_v42 = vld [vmem:[%s4077_s4 + $0x10] sm:$0xff] }
  0x8e   : > { %457 = vrot.lane.b32.xlu0 %v440_v43, %s3980_s10 }
  0x8f   : > { %v4261_v44 = vpop.permute.xlu2 %271 }
  0x90   : > { %7560 = vst [vmem:[#allocation8_spill] sm:$0xff] %v4261_v44  ;;  %v1102_v44 = vmul.f32 0.26601174, %v4455_v42 }
  0x95   : > { %465 = vrot.lane.b32.xlu1 %v444_v45, %s3980_s10  ;;  %467 = vrot.lane.b32.xlu2 %v445_v46, %s3980_s10  ;;  %v4462_v46 = vld [vmem:[%s4077_s4 + $0x8] sm:$0xff] }
  0x96   : > { %463 = vrot.lane.b32.xlu0 %v443_v47, %s3980_s10 }
  0x97   : > { %v4269_v48 = vpop.permute.xlu2 %273 }
  0x9d   : > { %487 = vrot.lane.b32.xlu1 %v391_v34, %s3981_s11  ;;  %489 = vrot.lane.b32.xlu2 %v392_v32, %s3981_s11  ;;  %v4416_v32 = vmul.f32 0.0010283802, %v4118_v6  ;;  %v4428_v34 = vld [vmem:[%s4077_s4] sm:$0xff] }
  0x9e   : > { %469 = vrot.lane.b32.xlu0 %v446_v49, %s3980_s10  ;;  %v4467_v49 = vmul.f32 0.0075987587, %v4452_v41 }
  0x9f   : > { %v4275_v50 = vpop.permute.xlu2 %311 }
  0xa0   : > { %7561 = vst [vmem:[#allocation9_spill] sm:$0xff] %v4275_v50  ;;  %v4590_v50 = vmul.f32 0.109360695, %v4428_v34 }
  0xa5   : > { %493 = vrot.lane.b32.xlu1 %v394_v37, %s3981_s11  ;;  %495 = vrot.lane.b32.xlu2 %v395_v35, %s3981_s11 }
  0xa6   : > { %491 = vrot.lane.b32.xlu0 %v393_v33, %s3981_s11  ;;  %v4419_v33 = vmul.f32 0.0010283802, %v4121_v7 }
  0xa7   : > { %v4280_v51 = vpop.permute.xlu1 %267  ;;  %v4282_v52 = vpop.permute.xlu2 %317 }
  0xa8   : > { %7562 = vst [vmem:[#allocation10_spill] sm:$0xff] %v4282_v52  ;;  %v4284_v53 = vpop.permute.xlu0 %263  ;;  %v4587_v52 = vmul.f32 0.109360695, %v4462_v46 }
  0xa9   : > { %7563 = vst [vmem:[#allocation11_spill] sm:$0xff] %v4284_v53 }
  0xaa   : > { %7594 = vst [vmem:[#allocation42_spill] sm:$0xff] %v4419_v33 }
  0xad   : > { %499 = vrot.lane.b32.xlu1 %v397_v40, %s3981_s11  ;;  %501 = vrot.lane.b32.xlu2 %v398_v38, %s3981_s11  ;;  %v4437_v38 = vmul.f32 0.0075987587, %v4428_v34  ;;  %v4443_v40 = vmul.f32 0.0010283802, %v4145_v13 }
  0xae   : > { %497 = vrot.lane.b32.xlu0 %v396_v36, %s3981_s11 }
  0xaf   : > { %v4289_v54 = vpop.permute.xlu1 %269  ;;  %v4291_v55 = vpop.permute.xlu2 %323  ;;  %7599 = vst [vmem:[#allocation47_spill] sm:$0xff] %v4443_v40 }
  0xb0   : > { %7564 = vst [vmem:[#allocation12_spill] sm:$0xff] %v4289_v54  ;;  %v4293_v56 = vpop.permute.xlu0 %265 }
  0xb1   : > { %7565 = vst [vmem:[#allocation13_spill] sm:$0xff] %v4291_v55  ;;  %v4584_v55 = vmul.f32 0.109360695, %v4455_v42 }
  0xb2   : > { %7566 = vst [vmem:[#allocation14_spill] sm:$0xff] %v4293_v56 }
  0xb5   : > { %521 = vrot.lane.b32.xlu1 %v4196_v24, %s3982_s12  ;;  %523 = vrot.lane.b32.xlu2 %v4214_v28, %s3982_s12  ;;  %v4392_v28 = vmul.f32 0.0010283802, %v4097_v1 }
  0xb6   : > { %519 = vrot.lane.b32.xlu0 %v4193_v23, %s3982_s12 }
  0xb7   : > { %v4301_v57 = vpop.permute.xlu1 %277  ;;  %v4303_v58 = vpop.permute.xlu2 %361 }
  0xb8   : > { %7567 = vst [vmem:[#allocation15_spill] sm:$0xff] %v4301_v57  ;;  %v4305_v59 = vpop.permute.xlu0 %275 }
  0xb9   : > { %7568 = vst [vmem:[#allocation16_spill] sm:$0xff] %v4303_v58 }
  0xba   : > { %7569 = vst [vmem:[#allocation17_spill] sm:$0xff] %v4305_v59 }
  0xbd   : > { %527 = vrot.lane.b32.xlu1 %v4211_v27, %s3982_s12  ;;  %529 = vrot.lane.b32.xlu2 %v4229_v31, %s3982_s12  ;;  %v4413_v31 = vmul.f32 0.0010283802, %v4094_v0 }
  0xbe   : > { %525 = vrot.lane.b32.xlu0 %v4208_v26, %s3982_s12 }
  0xbf   : > { %v4313_v60 = vpop.permute.xlu1 %315  ;;  %v4315_v61 = vpop.permute.xlu2 %367  ;;  %7593 = vst [vmem:[#allocation41_spill] sm:$0xff] %v4413_v31 }
  0xc0   : > { %7570 = vst [vmem:[#allocation18_spill] sm:$0xff] %v4315_v61  ;;  %v4317_v62 = vpop.permute.xlu0 %313 }
  0xc1   : > { %7571 = vst [vmem:[#allocation19_spill] sm:$0xff] %v4317_v62 }
  0xc5   : > { %533 = vrot.lane.b32.xlu1 %v4226_v30, %s3982_s12  ;;  %551 = vrot.lane.b32.xlu2 %v4151_v15, %s3983_s18 }
  0xc6   : > { %531 = vrot.lane.b32.xlu0 %v4223_v29, %s3982_s12  ;;  %v4395_v29 = vmul.f32 0.0010283802, %v4124_v8 }
  0xc7   : > { %v4325_v63 = vpop.permute.xlu1 %321  ;;  %v4327_v23 = vpop.permute.xlu2 %373 }
  0xc8   : > { %7572 = vst [vmem:[#allocation20_spill] sm:$0xff] %v4325_v63  ;;  %v4329_v24 = vpop.permute.xlu0 %319  ;;  %v1053_v63 = vmul.f32 0.21300554, %v4462_v46 }
  0xc9   : > { %7573 = vst [vmem:[#allocation21_spill] sm:$0xff] %v4327_v23  ;;  %v4548_v23 = vmul.f32 0.036000773, %v4455_v42 }
  0xca   : > { %7574 = vst [vmem:[#allocation22_spill] sm:$0xff] %v4329_v24  ;;  %v1052_v24 = vmul.f32 0.21300554, %v4428_v34 }
  0xcb   : > { %7588 = vst [vmem:[#allocation36_spill] sm:$0xff] %v4395_v29 }
  0xcd   : > { %555 = vrot.lane.b32.xlu1 %v4163_v17, %s3983_s18  ;;  %557 = vrot.lane.b32.xlu2 %v4166_v18, %s3983_s18 }
  0xce   : > { %553 = vrot.lane.b32.xlu0 %v4169_v19, %s3983_s18 }
  0xcf   : > { %v4337_v26 = vpop.permute.xlu1 %359  ;;  %v4339_v15 = vpop.permute.xlu2 %411 }
  0xd0   : > { %7575 = vst [vmem:[#allocation23_spill] sm:$0xff] %v4337_v26  ;;  %v4341_v27 = vpop.permute.xlu0 %325 }
  0xd1   : > { %7576 = vst [vmem:[#allocation24_spill] sm:$0xff] %v4341_v27  ;;  %v4611_v27 = vmul.f32 0.109360695, %v4452_v41 }
  0xd5   : > { %561 = vrot.lane.b32.xlu1 %v4178_v20, %s3983_s18  ;;  %563 = vrot.lane.b32.xlu2 %v4181_v21, %s3983_s18 }
  0xd6   : > { %559 = vrot.lane.b32.xlu0 %v4184_v22, %s3983_s18 }
  0xd7   : > { %v4349_v17 = vpop.permute.xlu1 %365  ;;  %v4351_v18 = vpop.permute.xlu2 %417 }
  0xd8   : > { %7577 = vst [vmem:[#allocation25_spill] sm:$0xff] %v4349_v17  ;;  %v4353_v19 = vpop.permute.xlu0 %363 }
  0xd9   : > { %7578 = vst [vmem:[#allocation26_spill] sm:$0xff] %v4351_v18  ;;  %v4545_v18 = vmul.f32 0.036000773, %v4452_v41 }
  0xdd   : > { %585 = vrot.lane.b32.xlu2 %v4133_v11, %s3984_s15  ;;  %583 = vrot.lane.b32.xlu1 %v4109_v5, %s3984_s15 }
  0xde   : > { %565 = vrot.lane.b32.xlu0 %v4199_v25, %s3983_s18 }
  0xdf   : > { %v4361_v20 = vpop.permute.xlu1 %371  ;;  %v4363_v21 = vpop.permute.xlu2 %455 }
  0xe0   : > { %7579 = vst [vmem:[#allocation27_spill] sm:$0xff] %v4361_v20  ;;  %v4365_v22 = vpop.permute.xlu0 %369 }
  0xe1   : > { %7580 = vst [vmem:[#allocation28_spill] sm:$0xff] %v4363_v21 }
  0xe2   : > { %7581 = vst [vmem:[#allocation29_spill] sm:$0xff] %v4365_v22 }
  0xe5   : > { %591 = vrot.lane.b32.xlu2 %v4103_v3, %s3984_s15  ;;  %589 = vrot.lane.b32.xlu1 %v4130_v10, %s3984_s15 }
  0xe6   : > { %587 = vrot.lane.b32.xlu0 %v4106_v4, %s3984_s15 }
  0xe7   : > { %v4373_v11 = vpop.permute.xlu1 %409  ;;  %v4375_v5 = vpop.permute.xlu2 %461 }
  0xe8   : > { %7582 = vst [vmem:[#allocation30_spill] sm:$0xff] %v4373_v11  ;;  %v4377_v25 = vpop.permute.xlu0 %407  ;;  %v4524_v11 = vmul.f32 0.036000773, %v4428_v34 }
  0xe9   : > { %7583 = vst [vmem:[#allocation31_spill] sm:$0xff] %v4375_v5 }
  0xea   : > { %7584 = vst [vmem:[#allocation32_spill] sm:$0xff] %v4377_v25  ;;  %v4521_v25 = vmul.f32 0.036000773, %v4462_v46 }
  0xed   : > { %597 = vrot.lane.b32.xlu2 %v4148_v14, %s3984_s15  ;;  %595 = vrot.lane.b32.xlu1 %v4154_v16, %s3984_s15  ;;  %v4398_v14 = vmul.f32 0.0010283802, %v4100_v2 }
  0xee   : > { %593 = vrot.lane.b32.xlu0 %v4127_v9, %s3984_s15 }
  0xef   : > { %v4385_v3 = vpop.permute.xlu1 %415  ;;  %v4387_v10 = vpop.permute.xlu2 %467  ;;  %7589 = vst [vmem:[#allocation37_spill] sm:$0xff] %v4398_v14 }
  0xf0   : > { %7585 = vst [vmem:[#allocation33_spill] sm:$0xff] %v4385_v3  ;;  %v4389_v4 = vpop.permute.xlu0 %413 }
  0xf1   : > { %7586 = vst [vmem:[#allocation34_spill] sm:$0xff] %v4387_v10  ;;  %v4485_v10 = vld [vmem:[%s4077_s4 + $0x28] sm:$0xff] }
  0xf2   : > { %7587 = vst [vmem:[#allocation35_spill] sm:$0xff] %v4389_v4  ;;  %v4569_v58 = vmul.f32 0.036000773, %v4485_v10 }
  0xf5   : > { %627 = vrot.lane.b32.xlu2 %v4392_v28, %s3985_s19  ;;  %625 = vrot.lane.b32.xlu1 %v4395_v29, %s3985_s19 }
  0xf6   : > { %623 = vrot.lane.b32.xlu0 %v4398_v14, %s3985_s19 }
  0xf7   : > { %v4406_v9 = vpop.permute.xlu1 %421  ;;  %v4408_v16 = vpop.permute.xlu2 %489 }
  0xf8   : > { %7590 = vst [vmem:[#allocation38_spill] sm:$0xff] %v4406_v9  ;;  %v4410_v30 = vpop.permute.xlu0 %419  ;;  %v4500_v9 = vmul.f32 0.0075987587, %v4485_v10 }
  0xf9   : > { %7591 = vst [vmem:[#allocation39_spill] sm:$0xff] %v4408_v16  ;;  %v4473_v16 = vmul.f32 0.0075987587, %v4462_v46 }
  0xfa   : > { %7592 = vst [vmem:[#allocation40_spill] sm:$0xff] %v4410_v30 }
  0xfd   : > { %633 = vrot.lane.b32.xlu2 %v4416_v32, %s3985_s19  ;;  %631 = vrot.lane.b32.xlu1 %v4413_v31, %s3985_s19  ;;  %v1105_v31 = vmul.f32 0.26601174, %v4485_v10 }
  0xfe   : > { %629 = vrot.lane.b32.xlu0 %v4419_v33, %s3985_s19 }
  0xff   : > { %v4430_v35 = vpop.permute.xlu1 %459  ;;  %v4432_v36 = vpop.permute.xlu2 %495 }
 0x100   : > { %7595 = vst [vmem:[#allocation43_spill] sm:$0xff] %v4430_v35  ;;  %v4434_v37 = vpop.permute.xlu0 %457  ;;  %v1054_v35 = vmul.f32 0.21300554, %v4455_v42 }
 0x101   : > { %7596 = vst [vmem:[#allocation44_spill] sm:$0xff] %v4432_v36  ;;  %v4470_v36 = vmul.f32 0.0075987587, %v4455_v42 }
 0x102   : > { %7597 = vst [vmem:[#allocation45_spill] sm:$0xff] %v4434_v37 }
 0x105   : > { %924 = vrot.lane.b32.xlu2 %v4437_v38, %s3976_s21  ;;  %637 = vrot.lane.b32.xlu1 %v4440_v39, %s3985_s19 }
 0x106   : > { %635 = vrot.lane.b32.xlu0 %v4443_v40, %s3985_s19  ;;  %v1055_v40 = vmul.f32 0.21300554, %v4452_v41 }
 0x107   : > { %v4457_v43 = vpop.permute.xlu1 %465  ;;  %v4459_v45 = vpop.permute.xlu2 %501 }
 0x108   : > { %7600 = vst [vmem:[#allocation48_spill] sm:$0xff] %v4457_v43  ;;  %v4464_v47 = vpop.permute.xlu0 %463  ;;  %v4516_v43 = vld [vmem:[%s4077_s4 + $0x38] sm:$0xff] }
 0x109   : > { %7601 = vst [vmem:[#allocation49_spill] sm:$0xff] %v4459_v45  ;;  %v4482_v45 = vld [vmem:[%s4077_s4 + $0x30] sm:$0xff]  ;;  %v4527_v20 = vmul.f32 0.0075987587, %v4516_v43  ;;  %v4563_v26 = vmul.f32 0.036000773, %v4516_v43 }
 0x10a   : > { %7602 = vst [vmem:[#allocation50_spill] sm:$0xff] %v4464_v47  ;;  %v4492_v47 = vld [vmem:[%s4077_s4 + $0x20] sm:$0xff]  ;;  %v4497_v30 = vmul.f32 0.0075987587, %v4482_v45  ;;  %v4566_v61 = vmul.f32 0.036000773, %v4482_v45 }
 0x10b   : > { %v4503_v4 = vmul.f32 0.0075987587, %v4492_v47  ;;  %v4608_v22 = vmul.f32 0.109360695, %v4492_v47  ;;  %v4627_v62 = vmul.f32 0.109360695, %v4516_v43 }
 0x10c   : > { %v4630_v59 = vmul.f32 0.109360695, %v4482_v45  ;;  %v1056_v54 = vmul.f32 0.21300554, %v4492_v47  ;;  %v1059_v29 = vmul.f32 0.21300554, %v4516_v43 }
 0x10d   : > { %930 = vrot.lane.b32.xlu2 %v4467_v49, %s3976_s21  ;;  %928 = vrot.lane.b32.xlu1 %v4470_v36, %s3976_s21 }
 0x10e   : > { %926 = vrot.lane.b32.xlu0 %v4473_v16, %s3976_s21 }
 0x10f   : > { %v4487_v5 = vpop.permute.xlu1 %487  ;;  %v4489_v21 = vpop.permute.xlu2 %523 }
 0x110   : > { %7603 = vst [vmem:[#allocation51_spill] sm:$0xff] %v4487_v5  ;;  %v4494_v37 = vpop.permute.xlu0 %469 }
 0x111   : > { %7604 = vst [vmem:[#allocation52_spill] sm:$0xff] %v4489_v21  ;;  %v4542_v21 = vmul.f32 0.036000773, %v4492_v47 }
 0x112   : > { %7605 = vst [vmem:[#allocation53_spill] sm:$0xff] %v4494_v37 }
 0x115   : > { %936 = vrot.lane.b32.xlu2 %v4497_v30, %s3976_s21  ;;  %934 = vrot.lane.b32.xlu1 %v4500_v9, %s3976_s21 }
 0x116   : > { %932 = vrot.lane.b32.xlu0 %v4503_v4, %s3976_s21 }
 0x117   : > { %v4511_v5 = vpop.permute.xlu1 %493  ;;  %v4513_v37 = vpop.permute.xlu2 %529 }
 0x118   : > { %7606 = vst [vmem:[#allocation54_spill] sm:$0xff] %v4511_v5  ;;  %v4518_v3 = vpop.permute.xlu0 %491 }
 0x119   : > { %7607 = vst [vmem:[#allocation55_spill] sm:$0xff] %v4513_v37 }
 0x11a   : > { %7608 = vst [vmem:[#allocation56_spill] sm:$0xff] %v4518_v3  ;;  %v4605_v3 = vmul.f32 0.109360695, %v4485_v10 }
 0x11d   : > { %974 = vrot.lane.b32.xlu2 %v4521_v25, %s3977_s7  ;;  %972 = vrot.lane.b32.xlu1 %v4524_v11, %s3977_s7 }
 0x11e   : > { %938 = vrot.lane.b32.xlu0 %v4527_v20, %s3976_s21 }
 0x11f   : > { %v4535_v5 = vpop.permute.xlu1 %499  ;;  %v4537_v37 = vpop.permute.xlu2 %551 }
 0x120   : > { %7609 = vst [vmem:[#allocation57_spill] sm:$0xff] %v4535_v5  ;;  %v4539_v17 = vpop.permute.xlu0 %497 }
 0x121   : > { %7610 = vst [vmem:[#allocation58_spill] sm:$0xff] %v4537_v37 }
 0x122   : > { %7611 = vst [vmem:[#allocation59_spill] sm:$0xff] %v4539_v17 }
 0x125   : > { %980 = vrot.lane.b32.xlu2 %v4542_v21, %s3977_s7  ;;  %978 = vrot.lane.b32.xlu1 %v4545_v18, %s3977_s7 }
 0x126   : > { %976 = vrot.lane.b32.xlu0 %v4548_v23, %s3977_s7 }
 0x127   : > { %v4556_v37 = vpop.permute.xlu1 %521  ;;  %v4558_v5 = vpop.permute.xlu2 %557 }
 0x128   : > { %7612 = vst [vmem:[#allocation60_spill] sm:$0xff] %v4556_v37  ;;  %v4560_v17 = vpop.permute.xlu0 %519 }
 0x129   : > { %7613 = vst [vmem:[#allocation61_spill] sm:$0xff] %v4558_v5 }
 0x12a   : > { %7614 = vst [vmem:[#allocation62_spill] sm:$0xff] %v4560_v17 }
 0x12d   : > { %986 = vrot.lane.b32.xlu2 %v4563_v26, %s3977_s7  ;;  %984 = vrot.lane.b32.xlu1 %v4566_v61, %s3977_s7 }
 0x12e   : > { %982 = vrot.lane.b32.xlu0 %v4569_v58, %s3977_s7 }
 0x12f   : > { %v4577_v5 = vpop.permute.xlu1 %527  ;;  %v4579_v17 = vpop.permute.xlu2 %563 }
 0x130   : > { %7615 = vst [vmem:[#allocation63_spill] sm:$0xff] %v4577_v5  ;;  %v4581_v37 = vpop.permute.xlu0 %525 }
 0x131   : > { %7616 = vst [vmem:[#allocation64_spill] sm:$0xff] %v4579_v17 }
 0x132   : > { %7617 = vst [vmem:[#allocation65_spill] sm:$0xff] %v4581_v37 }
 0x135   : > { %1024 = vrot.lane.b32.xlu2 %v4584_v55, %s3978_s8  ;;  %1022 = vrot.lane.b32.xlu1 %v4587_v52, %s3978_s8 }
 0x136   : > { %1020 = vrot.lane.b32.xlu0 %v4590_v50, %s3978_s8 }
 0x137   : > { %v4598_v17 = vpop.permute.xlu1 %533  ;;  %v4600_v37 = vpop.permute.xlu2 %585 }
 0x138   : > { %7618 = vst [vmem:[#allocation66_spill] sm:$0xff] %v4598_v17  ;;  %v4602_v5 = vpop.permute.xlu0 %531 }
 0x139   : > { %7619 = vst [vmem:[#allocation67_spill] sm:$0xff] %v4600_v37 }
 0x13a   : > { %7620 = vst [vmem:[#allocation68_spill] sm:$0xff] %v4602_v5 }
 0x13d   : > { %1030 = vrot.lane.b32.xlu2 %v4605_v3, %s3978_s8  ;;  %1028 = vrot.lane.b32.xlu1 %v4608_v22, %s3978_s8 }
 0x13e   : > { %1026 = vrot.lane.b32.xlu0 %v4611_v27, %s3978_s8 }
 0x13f   : > { %v4619_v37 = vpop.permute.xlu1 %555  ;;  %v4621_v5 = vpop.permute.xlu2 %591 }
 0x140   : > { %7621 = vst [vmem:[#allocation69_spill] sm:$0xff] %v4619_v37  ;;  %v4623_v17 = vpop.permute.xlu0 %553 }
 0x141   : > { %7622 = vst [vmem:[#allocation70_spill] sm:$0xff] %v4621_v5 }
 0x142   : > { %7623 = vst [vmem:[#allocation71_spill] sm:$0xff] %v4623_v17 }
 0x145   : > { %1068 = vrot.lane.b32.xlu2 %v1052_v24, %s3979_s9  ;;  %1034 = vrot.lane.b32.xlu1 %v4627_v62, %s3978_s8 }
 0x146   : > { %1032 = vrot.lane.b32.xlu0 %v4630_v59, %s3978_s8 }
 0x147   : > { %v4637_v37 = vpop.permute.xlu1 %561  ;;  %v4639_v5 = vpop.permute.xlu2 %597 }
 0x148   : > { %7624 = vst [vmem:[#allocation72_spill] sm:$0xff] %v4637_v37  ;;  %v4641_v17 = vpop.permute.xlu0 %559 }
 0x149   : > { %7625 = vst [vmem:[#allocation73_spill] sm:$0xff] %v4639_v5  ;;  %v1058_v5 = vmul.f32 0.21300554, %v4482_v45 }
 0x14a   : > { %7626 = vst [vmem:[#allocation74_spill] sm:$0xff] %v4641_v17  ;;  %v1057_v17 = vmul.f32 0.21300554, %v4485_v10 }
 0x14d   : > { %1074 = vrot.lane.b32.xlu2 %v1055_v40, %s3979_s9  ;;  %1072 = vrot.lane.b32.xlu1 %v1054_v35, %s3979_s9 }
 0x14e   : > { %1070 = vrot.lane.b32.xlu0 %v1053_v63, %s3979_s9 }
 0x14f   : > { %v4649_v57 = vpop.permute.xlu2 %627  ;;  %v4651_v39 = vpop.permute.xlu1 %583 }
 0x150   : > { %7627 = vst [vmem:[#allocation75_spill] sm:$0xff] %v4649_v57  ;;  %v4653_v37 = vpop.permute.xlu0 %565 }
 0x151   : > { %7628 = vst [vmem:[#allocation76_spill] sm:$0xff] %v4651_v39  ;;  %v1101_v39 = vmul.f32 0.26601174, %v4462_v46 }
 0x152   : > { %7629 = vst [vmem:[#allocation77_spill] sm:$0xff] %v4653_v37  ;;  %v1100_v37 = vmul.f32 0.26601174, %v4428_v34 }
 0x155   : > { %1080 = vrot.lane.b32.xlu2 %v1058_v5, %s3979_s9  ;;  %1078 = vrot.lane.b32.xlu1 %v1057_v17, %s3979_s9 }
 0x156   : > { %1076 = vrot.lane.b32.xlu0 %v1056_v54, %s3979_s9 }
 0x157   : > { %v4661_v33 = vpop.permute.xlu2 %633  ;;  %v4663_v56 = vpop.permute.xlu1 %589 }
 0x158   : > { %7630 = vst [vmem:[#allocation78_spill] sm:$0xff] %v4661_v33  ;;  %v4665_v57 = vpop.permute.xlu0 %587 }
 0x159   : > { %7631 = vst [vmem:[#allocation79_spill] sm:$0xff] %v4663_v56  ;;  %v1104_v56 = vmul.f32 0.26601174, %v4492_v47 }
 0x15a   : > { %7632 = vst [vmem:[#allocation80_spill] sm:$0xff] %v4665_v57  ;;  %v1103_v57 = vmul.f32 0.26601174, %v4452_v41 }
 0x15d   : > { %1118 = vrot.lane.b32.xlu2 %v1101_v39, %s3980_s10  ;;  %1116 = vrot.lane.b32.xlu1 %v1100_v37, %s3980_s10 }
 0x15e   : > { %1082 = vrot.lane.b32.xlu0 %v1059_v29, %s3979_s9 }
 0x15f   : > { %v4673_v53 = vpop.permute.xlu2 %924  ;;  %v4675_v14 = vpop.permute.xlu1 %595 }
 0x160   : > { %7633 = vst [vmem:[#allocation81_spill] sm:$0xff] %v4673_v53  ;;  %v4677_v33 = vpop.permute.xlu0 %593 }
 0x161   : > { %7634 = vst [vmem:[#allocation82_spill] sm:$0xff] %v4675_v14  ;;  %v1107_v14 = vmul.f32 0.26601174, %v4516_v43 }
 0x162   : > { %7635 = vst [vmem:[#allocation83_spill] sm:$0xff] %v4677_v33  ;;  %v1106_v33 = vmul.f32 0.26601174, %v4482_v45 }
 0x165   : > { %1124 = vrot.lane.b32.xlu2 %v1104_v56, %s3980_s10  ;;  %1122 = vrot.lane.b32.xlu1 %v1103_v57, %s3980_s10 }
 0x166   : > { %1120 = vrot.lane.b32.xlu0 %v1102_v44, %s3980_s10 }
 0x167   : > { %v4685_v37 = vpop.permute.xlu2 %930  ;;  %v4687_v39 = vpop.permute.xlu1 %625 }
 0x168   : > { %7636 = vst [vmem:[#allocation84_spill] sm:$0xff] %v4685_v37  ;;  %v4689_v53 = vpop.permute.xlu0 %623 }
 0x169   : > { %7637 = vst [vmem:[#allocation85_spill] sm:$0xff] %v4687_v39 }
 0x16a   : > { %7638 = vst [vmem:[#allocation86_spill] sm:$0xff] %v4689_v53 }
 0x16d   : > { %1130 = vrot.lane.b32.xlu2 %v1107_v14, %s3980_s10  ;;  %1128 = vrot.lane.b32.xlu1 %v1106_v33, %s3980_s10 }
 0x16e   : > { %1126 = vrot.lane.b32.xlu0 %v1105_v31, %s3980_s10 }
 0x16f   : > { %v4697_v56 = vpop.permute.xlu2 %936  ;;  %v4699_v44 = vpop.permute.xlu1 %631 }
 0x170   : > { %7639 = vst [vmem:[#allocation87_spill] sm:$0xff] %v4697_v56  ;;  %v4701_v57 = vpop.permute.xlu0 %629 }
 0x171   : > { %7640 = vst [vmem:[#allocation88_spill] sm:$0xff] %v4699_v44 }
 0x172   : > { %7641 = vst [vmem:[#allocation89_spill] sm:$0xff] %v4701_v57 }
 0x175   : > { %1152 = vrot.lane.b32.xlu2 %v1054_v35, %s3981_s11  ;;  %1150 = vrot.lane.b32.xlu1 %v1053_v63, %s3981_s11 }
 0x176   : > { %1148 = vrot.lane.b32.xlu0 %v1052_v24, %s3981_s11 }
 0x177   : > { %v4706_v37 = vpop.permute.xlu2 %974  ;;  %v4708_v39 = vpop.permute.xlu1 %637 }
 0x178   : > { %7642 = vst [vmem:[#allocation90_spill] sm:$0xff] %v4706_v37  ;;  %v4710_v14 = vpop.permute.xlu0 %635 }
 0x179   : > { %7643 = vst [vmem:[#allocation91_spill] sm:$0xff] %v4708_v39 }
 0x17a   : > { %7644 = vst [vmem:[#allocation92_spill] sm:$0xff] %v4710_v14 }
 0x17d   : > { %1158 = vrot.lane.b32.xlu2 %v1057_v17, %s3981_s11  ;;  %1156 = vrot.lane.b32.xlu1 %v1056_v54, %s3981_s11 }
 0x17e   : > { %1154 = vrot.lane.b32.xlu0 %v1055_v40, %s3981_s11 }
 0x17f   : > { %v4715_v31 = vpop.permute.xlu2 %980  ;;  %v4717_v33 = vpop.permute.xlu1 %928 }
 0x180   : > { %7645 = vst [vmem:[#allocation93_spill] sm:$0xff] %v4715_v31  ;;  %v4719_v35 = vpop.permute.xlu0 %926 }
 0x181   : > { %7646 = vst [vmem:[#allocation94_spill] sm:$0xff] %v4717_v33 }
 0x182   : > { %7647 = vst [vmem:[#allocation95_spill] sm:$0xff] %v4719_v35 }
 0x185   : > { %1180 = vrot.lane.b32.xlu2 %v4590_v50, %s3982_s12  ;;  %1162 = vrot.lane.b32.xlu1 %v1059_v29, %s3981_s11 }
 0x186   : > { %1160 = vrot.lane.b32.xlu0 %v1058_v5, %s3981_s11 }
 0x187   : > { %v4725_v63 = vpop.permute.xlu2 %986  ;;  %v4727_v24 = vpop.permute.xlu1 %934 }
 0x188   : > { %7648 = vst [vmem:[#allocation96_spill] sm:$0xff] %v4725_v63  ;;  %v4729_v54 = vpop.permute.xlu0 %932 }
 0x189   : > { %7649 = vst [vmem:[#allocation97_spill] sm:$0xff] %v4727_v24 }
 0x18a   : > { %7650 = vst [vmem:[#allocation98_spill] sm:$0xff] %v4729_v54 }
 0x18d   : > { %1186 = vrot.lane.b32.xlu2 %v4611_v27, %s3982_s12  ;;  %1184 = vrot.lane.b32.xlu1 %v4584_v55, %s3982_s12 }
 0x18e   : > { %1182 = vrot.lane.b32.xlu0 %v4587_v52, %s3982_s12 }
 0x18f   : > { %v4737_v50 = vpop.permute.xlu2 %1024  ;;  %v4739_v17 = vpop.permute.xlu1 %972 }
 0x190   : > { %7651 = vst [vmem:[#allocation99_spill] sm:$0xff] %v4737_v50  ;;  %v4741_v5 = vpop.permute.xlu0 %938 }
 0x191   : > { %7652 = vst [vmem:[#allocation100_spill] sm:$0xff] %v4739_v17 }
 0x192   : > { %7653 = vst [vmem:[#allocation101_spill] sm:$0xff] %v4741_v5 }
 0x195   : > { %1192 = vrot.lane.b32.xlu2 %v4630_v59, %s3982_s12  ;;  %1190 = vrot.lane.b32.xlu1 %v4605_v3, %s3982_s12 }
 0x196   : > { %1188 = vrot.lane.b32.xlu0 %v4608_v22, %s3982_s12 }
 0x197   : > { %v4749_v27 = vpop.permute.xlu2 %1030  ;;  %v4751_v55 = vpop.permute.xlu1 %978 }
 0x198   : > { %7654 = vst [vmem:[#allocation102_spill] sm:$0xff] %v4749_v27  ;;  %v4753_v52 = vpop.permute.xlu0 %976 }
 0x199   : > { %7655 = vst [vmem:[#allocation103_spill] sm:$0xff] %v4751_v55 }
 0x19a   : > { %7656 = vst [vmem:[#allocation104_spill] sm:$0xff] %v4753_v52 }
 0x19d   : > { %1214 = vrot.lane.b32.xlu2 %v4521_v25, %s3983_s18  ;;  %1212 = vrot.lane.b32.xlu1 %v4524_v11, %s3983_s18 }
 0x19e   : > { %1194 = vrot.lane.b32.xlu0 %v4627_v62, %s3982_s12 }
 0x19f   : > { %v4761_v59 = vpop.permute.xlu2 %1068  ;;  %v4763_v3 = vpop.permute.xlu1 %984 }
 0x1a0   : > { %7657 = vst [vmem:[#allocation105_spill] sm:$0xff] %v4761_v59  ;;  %v4765_v22 = vpop.permute.xlu0 %982 }
 0x1a1   : > { %7658 = vst [vmem:[#allocation106_spill] sm:$0xff] %v4763_v3 }
 0x1a2   : > { %7659 = vst [vmem:[#allocation107_spill] sm:$0xff] %v4765_v22 }
 0x1a5   : > { %1220 = vrot.lane.b32.xlu2 %v4542_v21, %s3983_s18  ;;  %1218 = vrot.lane.b32.xlu1 %v4545_v18, %s3983_s18 }
 0x1a6   : > { %1216 = vrot.lane.b32.xlu0 %v4548_v23, %s3983_s18 }
 0x1a7   : > { %v4773_v25 = vpop.permute.xlu2 %1074  ;;  %v4775_v11 = vpop.permute.xlu1 %1022 }
 0x1a8   : > { %7660 = vst [vmem:[#allocation108_spill] sm:$0xff] %v4773_v25  ;;  %v4777_v62 = vpop.permute.xlu0 %1020 }
 0x1a9   : > { %7661 = vst [vmem:[#allocation109_spill] sm:$0xff] %v4775_v11 }
 0x1aa   : > { %7662 = vst [vmem:[#allocation110_spill] sm:$0xff] %v4777_v62 }
 0x1ad   : > { %1226 = vrot.lane.b32.xlu2 %v4563_v26, %s3983_s18  ;;  %1224 = vrot.lane.b32.xlu1 %v4566_v61, %s3983_s18 }
 0x1ae   : > { %1222 = vrot.lane.b32.xlu0 %v4569_v58, %s3983_s18 }
 0x1af   : > { %v4785_v21 = vpop.permute.xlu2 %1080  ;;  %v4787_v18 = vpop.permute.xlu1 %1028 }
 0x1b0   : > { %7663 = vst [vmem:[#allocation111_spill] sm:$0xff] %v4785_v21  ;;  %v4789_v23 = vpop.permute.xlu0 %1026  ;;  %v4837_v21 = vmul.f32 0.0010283802, %v4462_v46 }
 0x1b1   : > { %7664 = vst [vmem:[#allocation112_spill] sm:$0xff] %v4787_v18 }
 0x1b2   : > { %7665 = vst [vmem:[#allocation113_spill] sm:$0xff] %v4789_v23 }
 0x1b3   : > { %7678 = vst [vmem:[#allocation126_spill] sm:$0xff] %v4837_v21 }
 0x1b5   : > { %1248 = vrot.lane.b32.xlu2 %v4470_v36, %s3984_s15  ;;  %1246 = vrot.lane.b32.xlu1 %v4473_v16, %s3984_s15 }
 0x1b6   : > { %1244 = vrot.lane.b32.xlu0 %v4437_v38, %s3984_s15  ;;  %v4816_v38 = vmul.f32 0.0010283802, %v4428_v34 }
 0x1b7   : > { %v4797_v26 = vpop.permute.xlu2 %1118  ;;  %v4799_v61 = vpop.permute.xlu1 %1034 }
 0x1b8   : > { %7666 = vst [vmem:[#allocation114_spill] sm:$0xff] %v4797_v26  ;;  %v4801_v58 = vpop.permute.xlu0 %1032  ;;  %v4855_v26 = vmul.f32 0.0010283802, %v4485_v10 }
 0x1b9   : > { %7667 = vst [vmem:[#allocation115_spill] sm:$0xff] %v4799_v61 }
 0x1ba   : > { %7668 = vst [vmem:[#allocation116_spill] sm:$0xff] %v4801_v58 }
 0x1bb   : > { %7672 = vst [vmem:[#allocation120_spill] sm:$0xff] %v4816_v38 }
 0x1bc   : > { %7683 = vst [vmem:[#allocation131_spill] sm:$0xff] %v4855_v26 }
 0x1bd   : > { %1254 = vrot.lane.b32.xlu2 %v4500_v9, %s3984_s15  ;;  %1252 = vrot.lane.b32.xlu1 %v4503_v4, %s3984_s15 }
 0x1be   : > { %1250 = vrot.lane.b32.xlu0 %v4467_v49, %s3984_s15  ;;  %v4831_v49 = vmul.f32 0.0010283802, %v4452_v41 }
 0x1bf   : > { %v4809_v29 = vpop.permute.xlu2 %1124  ;;  %v4811_v16 = vpop.permute.xlu1 %1072 }
 0x1c0   : > { %7669 = vst [vmem:[#allocation117_spill] sm:$0xff] %v4809_v29  ;;  %v4813_v36 = vpop.permute.xlu0 %1070  ;;  %v4834_v29 = vmul.f32 0.0010283802, %v4455_v42 }
 0x1c1   : > { %7670 = vst [vmem:[#allocation118_spill] sm:$0xff] %v4811_v16 }
 0x1c2   : > { %7671 = vst [vmem:[#allocation119_spill] sm:$0xff] %v4813_v36 }
 0x1c3   : > { %7676 = vst [vmem:[#allocation124_spill] sm:$0xff] %v4831_v49 }
 0x1c4   : > { %7677 = vst [vmem:[#allocation125_spill] sm:$0xff] %v4834_v29 }
 0x1c5   : > { %1284 = vrot.lane.b32.xlu2 %v4816_v38, %s3985_s19  ;;  %1258 = vrot.lane.b32.xlu1 %v4527_v20, %s3984_s15 }
 0x1c6   : > { %1256 = vrot.lane.b32.xlu0 %v4497_v30, %s3984_s15 }
 0x1c7   : > { %v4824_v4 = vpop.permute.xlu2 %1130  ;;  %v4826_v9 = vpop.permute.xlu1 %1078 }
 0x1c8   : > { %7673 = vst [vmem:[#allocation121_spill] sm:$0xff] %v4824_v4  ;;  %v4828_v40 = vpop.permute.xlu0 %1076 }
 0x1c9   : > { %7674 = vst [vmem:[#allocation122_spill] sm:$0xff] %v4826_v9  ;;  %v4858_v9 = vmul.f32 0.0010283802, %v4492_v47 }
 0x1ca   : > { %7675 = vst [vmem:[#allocation123_spill] sm:$0xff] %v4828_v40  ;;  %v4852_v40 = vmul.f32 0.0010283802, %v4482_v45 }
 0x1cb   : > { %7684 = vst [vmem:[#allocation132_spill] sm:$0xff] %v4858_v9 }
 0x1cc   : > { %7682 = vst [vmem:[#allocation130_spill] sm:$0xff] %v4852_v40 }
 0x1cd   : > { %1290 = vrot.lane.b32.xlu2 %v4831_v49, %s3985_s19  ;;  %1288 = vrot.lane.b32.xlu1 %v4834_v29, %s3985_s19 }
 0x1ce   : > { %1286 = vrot.lane.b32.xlu0 %v4837_v21, %s3985_s19 }
 0x1cf   : > { %v4845_v20 = vpop.permute.xlu2 %1152  ;;  %v4847_v30 = vpop.permute.xlu1 %1116 }
 0x1d0   : > { %7679 = vst [vmem:[#allocation127_spill] sm:$0xff] %v4845_v20  ;;  %v4849_v4 = vpop.permute.xlu0 %1082  ;;  %v4866_v20 = vmul.f32 %v4124_v8, %v4124_v8  ;;  %v4887_v8 = vmul.f32 0.0010283802, %v4516_v43 }
 0x1d1   : > { %7680 = vst [vmem:[#allocation128_spill] sm:$0xff] %v4847_v30 }
 0x1d2   : > { %7681 = vst [vmem:[#allocation129_spill] sm:$0xff] %v4849_v4  ;;  %v4870_v4 = vmul.f32 %v4100_v2, %v4100_v2  ;;  %v4881_v36 = vmul.f32 0.0075987587, %v4866_v20  ;;  %v4895_v2 = vmul.f32 %v4094_v0, %v4094_v0  ;;  %v4971_v3 = vmul.f32 0.036000773, %v4866_v20 }
 0x1d3   : > { %7688 = vst [vmem:[#allocation136_spill] sm:$0xff] %v4887_v8  ;;  %v5037_v37 = vmul.f32 0.109360695, %v4866_v20  ;;  %v1717_v54 = vmul.f32 0.21300554, %v4866_v20 }
 0x1d4   : > { %v4884_v18 = vmul.f32 0.0075987587, %v4870_v4  ;;  %v4914_v0 = vmul.f32 0.0075987587, %v4895_v2  ;;  %v4974_v55 = vmul.f32 0.036000773, %v4870_v4 }
 0x1d5   : > { %1296 = vrot.lane.b32.xlu2 %v4852_v40, %s3985_s19  ;;  %1294 = vrot.lane.b32.xlu1 %v4855_v26, %s3985_s19  ;;  %v4992_v22 = vmul.f32 0.036000773, %v4895_v2  ;;  %v5010_v52 = vmul.f32 0.109360695, %v4870_v4  ;;  %v5058_v26 = vmul.f32 0.109360695, %v4895_v2 }
 0x1d6   : > { %1292 = vrot.lane.b32.xlu0 %v4858_v9, %s3985_s19  ;;  %v1716_v9 = vmul.f32 0.21300554, %v4870_v4  ;;  %v1764_v44 = vmul.f32 0.26601174, %v4870_v4 }
 0x1d7   : > { %v4874_v58 = vpop.permute.xlu2 %1158  ;;  %v4876_v25 = vpop.permute.xlu1 %1122 }
 0x1d8   : > { %7685 = vst [vmem:[#allocation133_spill] sm:$0xff] %v4874_v58  ;;  %v4878_v61 = vpop.permute.xlu0 %1120  ;;  %v4899_v58 = vmul.f32 %v4121_v7, %v4121_v7 }
 0x1d9   : > { %7686 = vst [vmem:[#allocation134_spill] sm:$0xff] %v4876_v25  ;;  %v4905_v25 = vmul.f32 %v4097_v1, %v4097_v1  ;;  %v4928_v1 = vmul.f32 %v4142_v12, %v4142_v12 }
 0x1da   : > { %7687 = vst [vmem:[#allocation135_spill] sm:$0xff] %v4878_v61  ;;  %v4917_v23 = vmul.f32 0.0075987587, %v4899_v58  ;;  %v4995_v59 = vmul.f32 0.036000773, %v4899_v58 }
 0x1db   : > { %v4920_v7 = vmul.f32 0.0075987587, %v4905_v25  ;;  %v4947_v12 = vmul.f32 0.0075987587, %v4928_v1  ;;  %v5013_v5 = vmul.f32 0.036000773, %v4928_v1 }
 0x1dc   : > { %v5031_v62 = vmul.f32 0.109360695, %v4899_v58  ;;  %v5034_v31 = vmul.f32 0.109360695, %v4905_v25  ;;  %v5075_v35 = vmul.f32 0.109360695, %v4928_v1 }
 0x1dd   : > { %1590 = vrot.lane.b32.xlu2 %v4881_v36, %s3976_s21  ;;  %1588 = vrot.lane.b32.xlu1 %v4884_v18, %s3976_s21  ;;  %v1719_v33 = vmul.f32 0.21300554, %v4899_v58  ;;  %v1718_v29 = vmul.f32 0.21300554, %v4905_v25  ;;  %v1767_v57 = vmul.f32 0.26601174, %v4899_v58 }
 0x1de   : > { %1298 = vrot.lane.b32.xlu0 %v4887_v8, %s3985_s19 }
 0x1df   : > { %v4907_v61 = vpop.permute.xlu2 %1180  ;;  %v4909_v27 = vpop.permute.xlu1 %1128 }
 0x1e0   : > { %7689 = vst [vmem:[#allocation137_spill] sm:$0xff] %v4907_v61  ;;  %v4911_v16 = vpop.permute.xlu0 %1126 }
 0x1e1   : > { %7690 = vst [vmem:[#allocation138_spill] sm:$0xff] %v4909_v27  ;;  %v4932_v27 = vmul.f32 %v4145_v13, %v4145_v13 }
 0x1e2   : > { %7691 = vst [vmem:[#allocation139_spill] sm:$0xff] %v4911_v16  ;;  %v4938_v16 = vmul.f32 %v4118_v6, %v4118_v6 }
 0x1e3   : > { %v4950_v63 = vmul.f32 0.0075987587, %v4932_v27  ;;  %v5016_v8 = vmul.f32 0.036000773, %v4932_v27  ;;  %v5052_v17 = vmul.f32 0.109360695, %v4932_v27 }
 0x1e4   : > { %v4953_v13 = vmul.f32 0.0075987587, %v4938_v16  ;;  %v4989_v30 = vmul.f32 0.036000773, %v4938_v16  ;;  %v5055_v24 = vmul.f32 0.109360695, %v4938_v16 }
 0x1e5   : > { %1596 = vrot.lane.b32.xlu2 %v4914_v0, %s3976_s21  ;;  %1594 = vrot.lane.b32.xlu1 %v4917_v23, %s3976_s21  ;;  %v1721_v40 = vmul.f32 0.21300554, %v4938_v16 }
 0x1e6   : > { %1592 = vrot.lane.b32.xlu0 %v4920_v7, %s3976_s21 }
 0x1e7   : > { %v4940_v61 = vpop.permute.xlu2 %1186  ;;  %v4942_v11 = vpop.permute.xlu1 %1150 }
 0x1e8   : > { %7692 = vst [vmem:[#allocation140_spill] sm:$0xff] %v4940_v61  ;;  %v4944_v50 = vpop.permute.xlu0 %1148 }
 0x1e9   : > { %7693 = vst [vmem:[#allocation141_spill] sm:$0xff] %v4942_v11 }
 0x1ea   : > { %7694 = vst [vmem:[#allocation142_spill] sm:$0xff] %v4944_v50  ;;  %v4968_v50 = vmul.f32 0.036000773, %v4905_v25 }
 0x1ed   : > { %1602 = vrot.lane.b32.xlu2 %v4947_v12, %s3976_s21  ;;  %1600 = vrot.lane.b32.xlu1 %v4950_v63, %s3976_s21 }
 0x1ee   : > { %1598 = vrot.lane.b32.xlu0 %v4953_v13, %s3976_s21 }
 0x1ef   : > { %v4961_v6 = vpop.permute.xlu2 %1192  ;;  %v4963_v61 = vpop.permute.xlu1 %1156 }
 0x1f0   : > { %7695 = vst [vmem:[#allocation143_spill] sm:$0xff] %v4961_v6  ;;  %v4965_v11 = vpop.permute.xlu0 %1154 }
 0x1f1   : > { %7696 = vst [vmem:[#allocation144_spill] sm:$0xff] %v4963_v61 }
 0x1f2   : > { %7697 = vst [vmem:[#allocation145_spill] sm:$0xff] %v4965_v11 }
 0x1f5   : > { %1640 = vrot.lane.b32.xlu2 %v4968_v50, %s3977_s7  ;;  %1638 = vrot.lane.b32.xlu1 %v4971_v3, %s3977_s7 }
 0x1f6   : > { %1636 = vrot.lane.b32.xlu0 %v4974_v55, %s3977_s7 }
 0x1f7   : > { %v4982_v6 = vpop.permute.xlu2 %1214  ;;  %v4984_v61 = vpop.permute.xlu1 %1162 }
 0x1f8   : > { %7698 = vst [vmem:[#allocation146_spill] sm:$0xff] %v4982_v6  ;;  %v4986_v11 = vpop.permute.xlu0 %1160 }
 0x1f9   : > { %7699 = vst [vmem:[#allocation147_spill] sm:$0xff] %v4984_v61 }
 0x1fa   : > { %7700 = vst [vmem:[#allocation148_spill] sm:$0xff] %v4986_v11 }
 0x1fd   : > { %1646 = vrot.lane.b32.xlu2 %v4989_v30, %s3977_s7  ;;  %1644 = vrot.lane.b32.xlu1 %v4992_v22, %s3977_s7 }
 0x1fe   : > { %1642 = vrot.lane.b32.xlu0 %v4995_v59, %s3977_s7 }
 0x1ff   : > { %v5003_v6 = vpop.permute.xlu2 %1220  ;;  %v5005_v11 = vpop.permute.xlu1 %1184 }
 0x200   : > { %7701 = vst [vmem:[#allocation149_spill] sm:$0xff] %v5003_v6  ;;  %v5007_v61 = vpop.permute.xlu0 %1182 }
 0x201   : > { %7702 = vst [vmem:[#allocation150_spill] sm:$0xff] %v5005_v11 }
 0x202   : > { %7703 = vst [vmem:[#allocation151_spill] sm:$0xff] %v5007_v61 }
 0x205   : > { %1684 = vrot.lane.b32.xlu2 %v5010_v52, %s3978_s8  ;;  %1650 = vrot.lane.b32.xlu1 %v5013_v5, %s3977_s7 }
 0x206   : > { %1648 = vrot.lane.b32.xlu0 %v5016_v8, %s3977_s7 }
 0x207   : > { %v5024_v6 = vpop.permute.xlu2 %1226  ;;  %v5026_v61 = vpop.permute.xlu1 %1190 }
 0x208   : > { %7704 = vst [vmem:[#allocation152_spill] sm:$0xff] %v5024_v6  ;;  %v5028_v11 = vpop.permute.xlu0 %1188 }
 0x209   : > { %7705 = vst [vmem:[#allocation153_spill] sm:$0xff] %v5026_v61 }
 0x20a   : > { %7706 = vst [vmem:[#allocation154_spill] sm:$0xff] %v5028_v11 }
 0x20d   : > { %1690 = vrot.lane.b32.xlu2 %v5031_v62, %s3978_s8  ;;  %1688 = vrot.lane.b32.xlu1 %v5034_v31, %s3978_s8 }
 0x20e   : > { %1686 = vrot.lane.b32.xlu0 %v5037_v37, %s3978_s8 }
 0x20f   : > { %v5045_v6 = vpop.permute.xlu2 %1248  ;;  %v5047_v11 = vpop.permute.xlu1 %1212 }
 0x210   : > { %7707 = vst [vmem:[#allocation155_spill] sm:$0xff] %v5045_v6  ;;  %v5049_v61 = vpop.permute.xlu0 %1194 }
 0x211   : > { %7708 = vst [vmem:[#allocation156_spill] sm:$0xff] %v5047_v11 }
 0x212   : > { %7709 = vst [vmem:[#allocation157_spill] sm:$0xff] %v5049_v61 }
 0x215   : > { %1696 = vrot.lane.b32.xlu2 %v5052_v17, %s3978_s8  ;;  %1694 = vrot.lane.b32.xlu1 %v5055_v24, %s3978_s8 }
 0x216   : > { %1692 = vrot.lane.b32.xlu0 %v5058_v26, %s3978_s8 }
 0x217   : > { %v5066_v6 = vpop.permute.xlu2 %1254  ;;  %v5068_v61 = vpop.permute.xlu1 %1218 }
 0x218   : > { %7710 = vst [vmem:[#allocation158_spill] sm:$0xff] %v5066_v6  ;;  %v5070_v11 = vpop.permute.xlu0 %1216 }
 0x219   : > { %7711 = vst [vmem:[#allocation159_spill] sm:$0xff] %v5068_v61 }
 0x21a   : > { %7712 = vst [vmem:[#allocation160_spill] sm:$0xff] %v5070_v11  ;;  %v1720_v11 = vmul.f32 0.21300554, %v4895_v2 }
 0x21d   : > { %1734 = vrot.lane.b32.xlu2 %v1717_v54, %s3979_s9  ;;  %1732 = vrot.lane.b32.xlu1 %v1716_v9, %s3979_s9 }
 0x21e   : > { %1698 = vrot.lane.b32.xlu0 %v5075_v35, %s3978_s8 }
 0x21f   : > { %v5081_v21 = vpop.permute.xlu2 %1284  ;;  %v5083_v6 = vpop.permute.xlu1 %1224 }
 0x220   : > { %7713 = vst [vmem:[#allocation161_spill] sm:$0xff] %v5081_v21  ;;  %v5085_v61 = vpop.permute.xlu0 %1222 }
 0x221   : > { %7714 = vst [vmem:[#allocation162_spill] sm:$0xff] %v5083_v6  ;;  %v1723_v6 = vmul.f32 0.21300554, %v4928_v1 }
 0x222   : > { %7715 = vst [vmem:[#allocation163_spill] sm:$0xff] %v5085_v61  ;;  %v1722_v61 = vmul.f32 0.21300554, %v4932_v27 }
 0x225   : > { %1740 = vrot.lane.b32.xlu2 %v1720_v11, %s3979_s9  ;;  %1738 = vrot.lane.b32.xlu1 %v1719_v33, %s3979_s9 }
 0x226   : > { %1736 = vrot.lane.b32.xlu0 %v1718_v29, %s3979_s9 }
 0x227   : > { %v5093_v39 = vpop.permute.xlu2 %1290  ;;  %v5095_v56 = vpop.permute.xlu1 %1246 }
 0x228   : > { %7716 = vst [vmem:[#allocation164_spill] sm:$0xff] %v5093_v39  ;;  %v5097_v21 = vpop.permute.xlu0 %1244 }
 0x229   : > { %7717 = vst [vmem:[#allocation165_spill] sm:$0xff] %v5095_v56  ;;  %v1766_v56 = vmul.f32 0.26601174, %v4905_v25 }
 0x22a   : > { %7718 = vst [vmem:[#allocation166_spill] sm:$0xff] %v5097_v21  ;;  %v1765_v21 = vmul.f32 0.26601174, %v4866_v20 }
 0x22d   : > { %1746 = vrot.lane.b32.xlu2 %v1723_v6, %s3979_s9  ;;  %1744 = vrot.lane.b32.xlu1 %v1722_v61, %s3979_s9 }
 0x22e   : > { %1742 = vrot.lane.b32.xlu0 %v1721_v40, %s3979_s9 }
 0x22f   : > { %v5105_v14 = vpop.permute.xlu2 %1296  ;;  %v5107_v49 = vpop.permute.xlu1 %1252 }
 0x230   : > { %7719 = vst [vmem:[#allocation167_spill] sm:$0xff] %v5105_v14  ;;  %v5109_v39 = vpop.permute.xlu0 %1250 }
 0x231   : > { %7720 = vst [vmem:[#allocation168_spill] sm:$0xff] %v5107_v49  ;;  %v1769_v49 = vmul.f32 0.26601174, %v4938_v16 }
 0x232   : > { %7721 = vst [vmem:[#allocation169_spill] sm:$0xff] %v5109_v39  ;;  %v1768_v39 = vmul.f32 0.26601174, %v4895_v2 }
 0x235   : > { %1784 = vrot.lane.b32.xlu2 %v1766_v56, %s3980_s10  ;;  %1782 = vrot.lane.b32.xlu1 %v1765_v21, %s3980_s10 }
 0x236   : > { %1780 = vrot.lane.b32.xlu0 %v1764_v44, %s3980_s10 }
 0x237   : > { %v5117_v38 = vpop.permute.xlu2 %1590  ;;  %v5119_v53 = vpop.permute.xlu1 %1258 }
 0x238   : > { %7722 = vst [vmem:[#allocation170_spill] sm:$0xff] %v5117_v38  ;;  %v5121_v14 = vpop.permute.xlu0 %1256  ;;  %v1770_v38 = vmul.f32 0.26601174, %v4932_v27 }
 0x239   : > { %7723 = vst [vmem:[#allocation171_spill] sm:$0xff] %v5119_v53  ;;  %v1771_v53 = vmul.f32 0.26601174, %v4928_v1 }
 0x23a   : > { %7724 = vst [vmem:[#allocation172_spill] sm:$0xff] %v5121_v14 }
 0x23d   : > { %1790 = vrot.lane.b32.xlu2 %v1769_v49, %s3980_s10  ;;  %1788 = vrot.lane.b32.xlu1 %v1768_v39, %s3980_s10 }
 0x23e   : > { %1786 = vrot.lane.b32.xlu0 %v1767_v57, %s3980_s10 }
 0x23f   : > { %v5129_v56 = vpop.permute.xlu2 %1596  ;;  %v5131_v44 = vpop.permute.xlu1 %1288 }
 0x240   : > { %7725 = vst [vmem:[#allocation173_spill] sm:$0xff] %v5129_v56  ;;  %v5133_v21 = vpop.permute.xlu0 %1286 }
 0x241   : > { %7726 = vst [vmem:[#allocation174_spill] sm:$0xff] %v5131_v44 }
 0x242   : > { %7727 = vst [vmem:[#allocation175_spill] sm:$0xff] %v5133_v21 }
 0x245   : > { %1812 = vrot.lane.b32.xlu2 %v1716_v9, %s3981_s11  ;;  %1794 = vrot.lane.b32.xlu1 %v1771_v53, %s3980_s10 }
 0x246   : > { %1792 = vrot.lane.b32.xlu0 %v1770_v38, %s3980_s10 }
 0x247   : > { %v5140_v49 = vpop.permute.xlu2 %1602  ;;  %v5142_v39 = vpop.permute.xlu1 %1294 }
 0x248   : > { %7728 = vst [vmem:[#allocation176_spill] sm:$0xff] %v5140_v49  ;;  %v5144_v57 = vpop.permute.xlu0 %1292 }
 0x249   : > { %7729 = vst [vmem:[#allocation177_spill] sm:$0xff] %v5142_v39  ;;  %v7921_v39 = vld [vmem:[#allocation82_spill] sm:$0xff] }
 0x24a   : > { %7730 = vst [vmem:[#allocation178_spill] sm:$0xff] %v5144_v57  ;;  %v7887_v57 = vld [vmem:[#allocation54_spill] sm:$0xff] }
 0x24d   : > { %1818 = vrot.lane.b32.xlu2 %v1719_v33, %s3981_s11  ;;  %1816 = vrot.lane.b32.xlu1 %v1718_v29, %s3981_s11 }
 0x24e   : > { %1814 = vrot.lane.b32.xlu0 %v1717_v54, %s3981_s11 }
 0x24f   : > { %v5149_v56 = vpop.permute.xlu2 %1640  ;;  %v5151_v14 = vpop.permute.xlu1 %1588 }
 0x250   : > { %7731 = vst [vmem:[#allocation179_spill] sm:$0xff] %v5149_v56  ;;  %v5153_v9 = vpop.permute.xlu0 %1298 }
 0x251   : > { %7732 = vst [vmem:[#allocation180_spill] sm:$0xff] %v5151_v14 }
 0x252   : > { %7733 = vst [vmem:[#allocation181_spill] sm:$0xff] %v5153_v9 }
 0x255   : > { %1824 = vrot.lane.b32.xlu2 %v1722_v61, %s3981_s11  ;;  %1822 = vrot.lane.b32.xlu1 %v1721_v40, %s3981_s11 }
 0x256   : > { %1820 = vrot.lane.b32.xlu0 %v1720_v11, %s3981_s11 }
 0x257   : > { %v5158_v53 = vpop.permute.xlu2 %1646  ;;  %v5160_v38 = vpop.permute.xlu1 %1594 }
 0x258   : > { %7734 = vst [vmem:[#allocation182_spill] sm:$0xff] %v5158_v53  ;;  %v5162_v33 = vpop.permute.xlu0 %1592 }
 0x259   : > { %7735 = vst [vmem:[#allocation183_spill] sm:$0xff] %v5160_v38 }
 0x25a   : > { %7736 = vst [vmem:[#allocation184_spill] sm:$0xff] %v5162_v33 }
 0x25d   : > { %1846 = vrot.lane.b32.xlu2 %v5037_v37, %s3982_s12  ;;  %1844 = vrot.lane.b32.xlu1 %v5010_v52, %s3982_s12 }
 0x25e   : > { %1826 = vrot.lane.b32.xlu0 %v1723_v6, %s3981_s11  ;;  %v5263_v6 = vmul.f32 0.0010283802, %v4870_v4  ;;  %v5281_v4 = vmul.f32 0.0010283802, %v4899_v58  ;;  %v5299_v58 = vmul.f32 0.0010283802, %v4928_v1  ;;  %v5317_v1 = vmul.f32 %v4462_v46, %v4462_v46 }
 0x25f   : > { %v5169_v54 = vpop.permute.xlu2 %1684  ;;  %v5171_v61 = vpop.permute.xlu1 %1600 }
 0x260   : > { %7737 = vst [vmem:[#allocation185_spill] sm:$0xff] %v5169_v54  ;;  %v5173_v29 = vpop.permute.xlu0 %1598 }
 0x261   : > { %7738 = vst [vmem:[#allocation186_spill] sm:$0xff] %v5171_v61 }
 0x262   : > { %7739 = vst [vmem:[#allocation187_spill] sm:$0xff] %v5173_v29 }
 0x263   : > { %7762 = vst [vmem:[#allocation210_spill] sm:$0xff] %v5263_v6 }
 0x264   : > { %7767 = vst [vmem:[#allocation215_spill] sm:$0xff] %v5281_v4 }
 0x265   : > { %1852 = vrot.lane.b32.xlu2 %v5058_v26, %s3982_s12  ;;  %1850 = vrot.lane.b32.xlu1 %v5031_v62, %s3982_s12  ;;  %7772 = vst [vmem:[#allocation220_spill] sm:$0xff] %v5299_v58 }
 0x266   : > { %1848 = vrot.lane.b32.xlu0 %v5034_v31, %s3982_s12 }
 0x267   : > { %v5181_v37 = vpop.permute.xlu2 %1690  ;;  %v5183_v52 = vpop.permute.xlu1 %1638 }
 0x268   : > { %7740 = vst [vmem:[#allocation188_spill] sm:$0xff] %v5181_v37  ;;  %v5185_v11 = vpop.permute.xlu0 %1636 }
 0x269   : > { %7741 = vst [vmem:[#allocation189_spill] sm:$0xff] %v5183_v52 }
 0x26a   : > { %7742 = vst [vmem:[#allocation190_spill] sm:$0xff] %v5185_v11 }
 0x26d   : > { %1858 = vrot.lane.b32.xlu2 %v5075_v35, %s3982_s12  ;;  %1856 = vrot.lane.b32.xlu1 %v5052_v17, %s3982_s12 }
 0x26e   : > { %1854 = vrot.lane.b32.xlu0 %v5055_v24, %s3982_s12 }
 0x26f   : > { %v5193_v26 = vpop.permute.xlu2 %1696  ;;  %v5195_v62 = vpop.permute.xlu1 %1644 }
 0x270   : > { %7743 = vst [vmem:[#allocation191_spill] sm:$0xff] %v5193_v26  ;;  %v5197_v31 = vpop.permute.xlu0 %1642 }
 0x271   : > { %7744 = vst [vmem:[#allocation192_spill] sm:$0xff] %v5195_v62  ;;  %v5457_v62 = vmul.f32 0.109360695, %v5317_v1 }
 0x272   : > { %7745 = vst [vmem:[#allocation193_spill] sm:$0xff] %v5197_v31 }
 0x275   : > { %1880 = vrot.lane.b32.xlu2 %v4968_v50, %s3983_s18  ;;  %1878 = vrot.lane.b32.xlu1 %v4971_v3, %s3983_s18 }
 0x276   : > { %1876 = vrot.lane.b32.xlu0 %v4974_v55, %s3983_s18 }
 0x277   : > { %v5205_v35 = vpop.permute.xlu2 %1734  ;;  %v5207_v17 = vpop.permute.xlu1 %1650 }
 0x278   : > { %7746 = vst [vmem:[#allocation194_spill] sm:$0xff] %v5205_v35  ;;  %v5209_v24 = vpop.permute.xlu0 %1648 }
 0x279   : > { %7747 = vst [vmem:[#allocation195_spill] sm:$0xff] %v5207_v17  ;;  %v5335_v17 = vmul.f32 0.0075987587, %v5317_v1 }
 0x27a   : > { %7748 = vst [vmem:[#allocation196_spill] sm:$0xff] %v5209_v24 }
 0x27d   : > { %1886 = vrot.lane.b32.xlu2 %v4989_v30, %s3983_s18  ;;  %1884 = vrot.lane.b32.xlu1 %v4992_v22, %s3983_s18 }
 0x27e   : > { %1882 = vrot.lane.b32.xlu0 %v4995_v59, %s3983_s18 }
 0x27f   : > { %v5217_v50 = vpop.permute.xlu2 %1740  ;;  %v5219_v3 = vpop.permute.xlu1 %1688 }
 0x280   : > { %7749 = vst [vmem:[#allocation197_spill] sm:$0xff] %v5217_v50  ;;  %v5221_v55 = vpop.permute.xlu0 %1686 }
 0x281   : > { %7750 = vst [vmem:[#allocation198_spill] sm:$0xff] %v5219_v3 }
 0x282   : > { %7751 = vst [vmem:[#allocation199_spill] sm:$0xff] %v5221_v55 }
 0x285   : > { %1908 = vrot.lane.b32.xlu2 %v4884_v18, %s3984_s15  ;;  %1890 = vrot.lane.b32.xlu1 %v5013_v5, %s3983_s18 }
 0x286   : > { %1888 = vrot.lane.b32.xlu0 %v5016_v8, %s3983_s18 }
 0x287   : > { %v5229_v40 = vpop.permute.xlu2 %1746  ;;  %v5231_v22 = vpop.permute.xlu1 %1694 }
 0x288   : > { %7752 = vst [vmem:[#allocation200_spill] sm:$0xff] %v5229_v40  ;;  %v5233_v59 = vpop.permute.xlu0 %1692  ;;  %v5284_v40 = vmul.f32 0.0010283802, %v4905_v25  ;;  %v5302_v25 = vmul.f32 0.0010283802, %v4932_v27  ;;  %v5323_v27 = vmul.f32 %v4428_v34, %v4428_v34  ;;  %v5346_v34 = vmul.f32 %v4485_v10, %v4485_v10 }
 0x289   : > { %7753 = vst [vmem:[#allocation201_spill] sm:$0xff] %v5231_v22 }
 0x28a   : > { %7754 = vst [vmem:[#allocation202_spill] sm:$0xff] %v5233_v59  ;;  %v5338_v46 = vmul.f32 0.0075987587, %v5323_v27  ;;  %v5365_v10 = vmul.f32 0.0075987587, %v5346_v34 }
 0x28b   : > { %7768 = vst [vmem:[#allocation216_spill] sm:$0xff] %v5284_v40  ;;  %v5439_v55 = vmul.f32 0.036000773, %v5346_v34  ;;  %v5460_v29 = vmul.f32 0.109360695, %v5323_v27 }
 0x28c   : > { %7773 = vst [vmem:[#allocation221_spill] sm:$0xff] %v5302_v25  ;;  %v2380_v11 = vmul.f32 0.21300554, %v5323_v27 }
 0x28d   : > { %1914 = vrot.lane.b32.xlu2 %v4917_v23, %s3984_s15  ;;  %1912 = vrot.lane.b32.xlu1 %v4920_v7, %s3984_s15  ;;  %v5260_v7 = vmul.f32 0.0010283802, %v4866_v20  ;;  %v5278_v20 = vmul.f32 0.0010283802, %v4895_v2 }
 0x28e   : > { %1910 = vrot.lane.b32.xlu0 %v4881_v36, %s3984_s15 }
 0x28f   : > { %v5241_v18 = vpop.permute.xlu2 %1784  ;;  %v5243_v5 = vpop.permute.xlu1 %1732  ;;  %7761 = vst [vmem:[#allocation209_spill] sm:$0xff] %v5260_v7 }
 0x290   : > { %7755 = vst [vmem:[#allocation203_spill] sm:$0xff] %v5241_v18  ;;  %v5245_v30 = vpop.permute.xlu0 %1698  ;;  %v2381_v18 = vmul.f32 0.21300554, %v5317_v1 }
 0x291   : > { %7756 = vst [vmem:[#allocation204_spill] sm:$0xff] %v5243_v5 }
 0x292   : > { %7757 = vst [vmem:[#allocation205_spill] sm:$0xff] %v5245_v30  ;;  %v5313_v30 = vmul.f32 %v4455_v42, %v4455_v42 }
 0x293   : > { %7766 = vst [vmem:[#allocation214_spill] sm:$0xff] %v5278_v20 }
 0x294   : > { %v5332_v42 = vmul.f32 0.0075987587, %v5313_v30  ;;  %v2382_v37 = vmul.f32 0.21300554, %v5313_v30 }
 0x295   : > { %1920 = vrot.lane.b32.xlu2 %v4950_v63, %s3984_s15  ;;  %1918 = vrot.lane.b32.xlu1 %v4953_v13, %s3984_s15 }
 0x296   : > { %1916 = vrot.lane.b32.xlu0 %v4914_v0, %s3984_s15 }
 0x297   : > { %v5253_v23 = vpop.permute.xlu2 %1790  ;;  %v5255_v8 = vpop.permute.xlu1 %1738 }
 0x298   : > { %7758 = vst [vmem:[#allocation206_spill] sm:$0xff] %v5253_v23  ;;  %v5257_v36 = vpop.permute.xlu0 %1736 }
 0x299   : > { %7759 = vst [vmem:[#allocation207_spill] sm:$0xff] %v5255_v8 }
 0x29a   : > { %7760 = vst [vmem:[#allocation208_spill] sm:$0xff] %v5257_v36 }
 0x29d   : > { %1950 = vrot.lane.b32.xlu2 %v5260_v7, %s3985_s19  ;;  %1948 = vrot.lane.b32.xlu1 %v5263_v6, %s3985_s19  ;;  %v2429_v6 = vmul.f32 0.26601174, %v5317_v1 }
 0x29e   : > { %1922 = vrot.lane.b32.xlu0 %v4947_v12, %s3984_s15 }
 0x29f   : > { %v5271_v63 = vpop.permute.xlu2 %1812  ;;  %v5273_v0 = vpop.permute.xlu1 %1744 }
 0x2a0   : > { %7763 = vst [vmem:[#allocation211_spill] sm:$0xff] %v5271_v63  ;;  %v5275_v13 = vpop.permute.xlu0 %1742  ;;  %v5394_v63 = vmul.f32 0.036000773, %v5323_v27 }
 0x2a1   : > { %7764 = vst [vmem:[#allocation212_spill] sm:$0xff] %v5273_v0  ;;  %v5305_v0 = vmul.f32 0.0010283802, %v4938_v16 }
 0x2a2   : > { %7765 = vst [vmem:[#allocation213_spill] sm:$0xff] %v5275_v13 }
 0x2a3   : > { %7774 = vst [vmem:[#allocation222_spill] sm:$0xff] %v5305_v0 }
 0x2a5   : > { %1956 = vrot.lane.b32.xlu2 %v5278_v20, %s3985_s19  ;;  %1954 = vrot.lane.b32.xlu1 %v5281_v4, %s3985_s19  ;;  %v7919_v20 = vld [vmem:[#allocation81_spill] sm:$0xff] }
 0x2a6   : > { %1952 = vrot.lane.b32.xlu0 %v5284_v40, %s3985_s19  ;;  %v7888_v40 = vld [vmem:[#allocation49_spill] sm:$0xff] }
 0x2a7   : > { %v5292_v12 = vpop.permute.xlu2 %1818  ;;  %v5294_v23 = vpop.permute.xlu1 %1782 }
 0x2a8   : > { %7769 = vst [vmem:[#allocation217_spill] sm:$0xff] %v5292_v12  ;;  %v5296_v2 = vpop.permute.xlu0 %1780  ;;  %v5421_v12 = vmul.f32 0.036000773, %v5317_v1 }
 0x2a9   : > { %7770 = vst [vmem:[#allocation218_spill] sm:$0xff] %v5294_v23 }
 0x2aa   : > { %7771 = vst [vmem:[#allocation219_spill] sm:$0xff] %v5296_v2 }
 0x2ad   : > { %1962 = vrot.lane.b32.xlu2 %v5299_v58, %s3985_s19  ;;  %1960 = vrot.lane.b32.xlu1 %v5302_v25, %s3985_s19  ;;  %v5418_v25 = vmul.f32 0.036000773, %v5313_v30 }
 0x2ae   : > { %1958 = vrot.lane.b32.xlu0 %v5305_v0, %s3985_s19 }
 0x2af   : > { %v5325_v16 = vpop.permute.xlu2 %1824  ;;  %v5327_v13 = vpop.permute.xlu1 %1788 }
 0x2b0   : > { %7775 = vst [vmem:[#allocation223_spill] sm:$0xff] %v5325_v16  ;;  %v5329_v26 = vpop.permute.xlu0 %1786  ;;  %v5350_v16 = vmul.f32 %v4492_v47, %v4492_v47 }
 0x2b1   : > { %7776 = vst [vmem:[#allocation224_spill] sm:$0xff] %v5327_v13  ;;  %v5356_v13 = vmul.f32 %v4452_v41, %v4452_v41  ;;  %v5379_v41 = vmul.f32 %v4516_v43, %v4516_v43 }
 0x2b2   : > { %7777 = vst [vmem:[#allocation225_spill] sm:$0xff] %v5329_v26  ;;  %v5368_v35 = vmul.f32 0.0075987587, %v5350_v16  ;;  %v5442_v2 = vmul.f32 0.036000773, %v5350_v16 }
 0x2b3   : > { %v5371_v47 = vmul.f32 0.0075987587, %v5356_v13  ;;  %v5397_v53 = vmul.f32 0.0075987587, %v5379_v41  ;;  %v5415_v61 = vmul.f32 0.036000773, %v5356_v13 }
 0x2b4   : > { %v5463_v0 = vmul.f32 0.036000773, %v5379_v41  ;;  %v5478_v26 = vmul.f32 0.109360695, %v5350_v16  ;;  %v5481_v5 = vmul.f32 0.109360695, %v5356_v13 }
 0x2b5   : > { %2256 = vrot.lane.b32.xlu2 %v5332_v42, %s3976_s21  ;;  %2254 = vrot.lane.b32.xlu1 %v5335_v17, %s3976_s21  ;;  %v5499_v8 = vmul.f32 0.109360695, %v5379_v41  ;;  %v2383_v38 = vmul.f32 0.21300554, %v5356_v13  ;;  %v2432_v58 = vmul.f32 0.26601174, %v5350_v16 }
 0x2b6   : > { %2252 = vrot.lane.b32.xlu0 %v5338_v46, %s3976_s21 }
 0x2b7   : > { %v5358_v23 = vpop.permute.xlu2 %1846  ;;  %v5360_v22 = vpop.permute.xlu1 %1794 }
 0x2b8   : > { %7778 = vst [vmem:[#allocation226_spill] sm:$0xff] %v5358_v23  ;;  %v5362_v50 = vpop.permute.xlu0 %1792 }
 0x2b9   : > { %7779 = vst [vmem:[#allocation227_spill] sm:$0xff] %v5360_v22  ;;  %v5385_v22 = vmul.f32 %v4482_v45, %v4482_v45 }
 0x2ba   : > { %7780 = vst [vmem:[#allocation228_spill] sm:$0xff] %v5362_v50 }
 0x2bb   : > { %v5400_v43 = vmul.f32 0.0075987587, %v5385_v22  ;;  %v5436_v59 = vmul.f32 0.036000773, %v5385_v22  ;;  %v5502_v54 = vmul.f32 0.109360695, %v5385_v22 }
 0x2bc   : > { %v2386_v9 = vmul.f32 0.21300554, %v5385_v22 }
 0x2bd   : > { %2262 = vrot.lane.b32.xlu2 %v5365_v10, %s3976_s21  ;;  %2260 = vrot.lane.b32.xlu1 %v5368_v35, %s3976_s21 }
 0x2be   : > { %2258 = vrot.lane.b32.xlu0 %v5371_v47, %s3976_s21 }
 0x2bf   : > { %v5387_v50 = vpop.permute.xlu2 %1852  ;;  %v5389_v23 = vpop.permute.xlu1 %1816 }
 0x2c0   : > { %7781 = vst [vmem:[#allocation229_spill] sm:$0xff] %v5387_v50  ;;  %v5391_v24 = vpop.permute.xlu0 %1814 }
 0x2c1   : > { %7782 = vst [vmem:[#allocation230_spill] sm:$0xff] %v5389_v23  ;;  %v5505_v23 = vmul.f32 0.109360695, %v5346_v34 }
 0x2c2   : > { %7783 = vst [vmem:[#allocation231_spill] sm:$0xff] %v5391_v24 }
 0x2c5   : > { %2300 = vrot.lane.b32.xlu2 %v5394_v63, %s3977_s7  ;;  %2266 = vrot.lane.b32.xlu1 %v5397_v53, %s3976_s21 }
 0x2c6   : > { %2264 = vrot.lane.b32.xlu0 %v5400_v43, %s3976_s21 }
 0x2c7   : > { %v5408_v45 = vpop.permute.xlu2 %1858  ;;  %v5410_v50 = vpop.permute.xlu1 %1822 }
 0x2c8   : > { %7784 = vst [vmem:[#allocation232_spill] sm:$0xff] %v5408_v45  ;;  %v5412_v24 = vpop.permute.xlu0 %1820 }
 0x2c9   : > { %7785 = vst [vmem:[#allocation233_spill] sm:$0xff] %v5410_v50 }
 0x2ca   : > { %7786 = vst [vmem:[#allocation234_spill] sm:$0xff] %v5412_v24 }
 0x2cd   : > { %2306 = vrot.lane.b32.xlu2 %v5415_v61, %s3977_s7  ;;  %2304 = vrot.lane.b32.xlu1 %v5418_v25, %s3977_s7 }
 0x2ce   : > { %2302 = vrot.lane.b32.xlu0 %v5421_v12, %s3977_s7 }
 0x2cf   : > { %v5429_v45 = vpop.permute.xlu2 %1880  ;;  %v5431_v50 = vpop.permute.xlu1 %1844 }
 0x2d0   : > { %7787 = vst [vmem:[#allocation235_spill] sm:$0xff] %v5429_v45  ;;  %v5433_v24 = vpop.permute.xlu0 %1826 }
 0x2d1   : > { %7788 = vst [vmem:[#allocation236_spill] sm:$0xff] %v5431_v50 }
 0x2d2   : > { %7789 = vst [vmem:[#allocation237_spill] sm:$0xff] %v5433_v24 }
 0x2d5   : > { %2312 = vrot.lane.b32.xlu2 %v5436_v59, %s3977_s7  ;;  %2310 = vrot.lane.b32.xlu1 %v5439_v55, %s3977_s7 }
 0x2d6   : > { %2308 = vrot.lane.b32.xlu0 %v5442_v2, %s3977_s7 }
 0x2d7   : > { %v5450_v50 = vpop.permute.xlu2 %1886  ;;  %v5452_v24 = vpop.permute.xlu1 %1850 }
 0x2d8   : > { %7790 = vst [vmem:[#allocation238_spill] sm:$0xff] %v5450_v50  ;;  %v5454_v45 = vpop.permute.xlu0 %1848 }
 0x2d9   : > { %7791 = vst [vmem:[#allocation239_spill] sm:$0xff] %v5452_v24 }
 0x2da   : > { %7792 = vst [vmem:[#allocation240_spill] sm:$0xff] %v5454_v45  ;;  %v5484_v45 = vmul.f32 0.109360695, %v5313_v30 }
 0x2dd   : > { %2350 = vrot.lane.b32.xlu2 %v5457_v62, %s3978_s8  ;;  %2348 = vrot.lane.b32.xlu1 %v5460_v29, %s3978_s8 }
 0x2de   : > { %2314 = vrot.lane.b32.xlu0 %v5463_v0, %s3977_s7 }
 0x2df   : > { %v5471_v50 = vpop.permute.xlu2 %1908  ;;  %v5473_v24 = vpop.permute.xlu1 %1856 }
 0x2e0   : > { %7793 = vst [vmem:[#allocation241_spill] sm:$0xff] %v5471_v50  ;;  %v5475_v52 = vpop.permute.xlu0 %1854 }
 0x2e1   : > { %7794 = vst [vmem:[#allocation242_spill] sm:$0xff] %v5473_v24 }
 0x2e2   : > { %7795 = vst [vmem:[#allocation243_spill] sm:$0xff] %v5475_v52 }
 0x2e5   : > { %2356 = vrot.lane.b32.xlu2 %v5478_v26, %s3978_s8  ;;  %2354 = vrot.lane.b32.xlu1 %v5481_v5, %s3978_s8 }
 0x2e6   : > { %2352 = vrot.lane.b32.xlu0 %v5484_v45, %s3978_s8 }
 0x2e7   : > { %v5492_v24 = vpop.permute.xlu2 %1914  ;;  %v5494_v52 = vpop.permute.xlu1 %1878 }
 0x2e8   : > { %7796 = vst [vmem:[#allocation244_spill] sm:$0xff] %v5492_v24  ;;  %v5496_v50 = vpop.permute.xlu0 %1876 }
 0x2e9   : > { %7797 = vst [vmem:[#allocation245_spill] sm:$0xff] %v5494_v52 }
 0x2ea   : > { %7798 = vst [vmem:[#allocation246_spill] sm:$0xff] %v5496_v50 }
 0x2ed   : > { %2362 = vrot.lane.b32.xlu2 %v5499_v8, %s3978_s8  ;;  %2360 = vrot.lane.b32.xlu1 %v5502_v54, %s3978_s8 }
 0x2ee   : > { %2358 = vrot.lane.b32.xlu0 %v5505_v23, %s3978_s8 }
 0x2ef   : > { %v5513_v52 = vpop.permute.xlu2 %1920  ;;  %v5515_v24 = vpop.permute.xlu1 %1884 }
 0x2f0   : > { %7799 = vst [vmem:[#allocation247_spill] sm:$0xff] %v5513_v52  ;;  %v5517_v50 = vpop.permute.xlu0 %1882 }
 0x2f1   : > { %7800 = vst [vmem:[#allocation248_spill] sm:$0xff] %v5515_v24  ;;  %v2385_v24 = vmul.f32 0.21300554, %v5346_v34 }
 0x2f2   : > { %7801 = vst [vmem:[#allocation249_spill] sm:$0xff] %v5517_v50  ;;  %v2384_v50 = vmul.f32 0.21300554, %v5350_v16 }
 0x2f5   : > { %2400 = vrot.lane.b32.xlu2 %v2382_v37, %s3979_s9  ;;  %2398 = vrot.lane.b32.xlu1 %v2381_v18, %s3979_s9 }
 0x2f6   : > { %2396 = vrot.lane.b32.xlu0 %v2380_v11, %s3979_s9 }
 0x2f7   : > { %v5525_v31 = vpop.permute.xlu2 %1950  ;;  %v5527_v36 = vpop.permute.xlu1 %1890 }
 0x2f8   : > { %7802 = vst [vmem:[#allocation250_spill] sm:$0xff] %v5525_v31  ;;  %v5529_v52 = vpop.permute.xlu0 %1888 }
 0x2f9   : > { %7803 = vst [vmem:[#allocation251_spill] sm:$0xff] %v5527_v36  ;;  %v2387_v36 = vmul.f32 0.21300554, %v5379_v41 }
 0x2fa   : > { %7804 = vst [vmem:[#allocation252_spill] sm:$0xff] %v5529_v52  ;;  %v2428_v52 = vmul.f32 0.26601174, %v5323_v27 }
 0x2fd   : > { %2406 = vrot.lane.b32.xlu2 %v2385_v24, %s3979_s9  ;;  %2404 = vrot.lane.b32.xlu1 %v2384_v50, %s3979_s9 }
 0x2fe   : > { %2402 = vrot.lane.b32.xlu0 %v2383_v38, %s3979_s9 }
 0x2ff   : > { %v5537_v4 = vpop.permute.xlu2 %1956  ;;  %v5539_v3 = vpop.permute.xlu1 %1912 }
 0x300   : > { %7805 = vst [vmem:[#allocation253_spill] sm:$0xff] %v5537_v4  ;;  %v5541_v31 = vpop.permute.xlu0 %1910 }
 0x301   : > { %7806 = vst [vmem:[#allocation254_spill] sm:$0xff] %v5539_v3  ;;  %v2430_v3 = vmul.f32 0.26601174, %v5313_v30 }
 0x302   : > { %7807 = vst [vmem:[#allocation255_spill] sm:$0xff] %v5541_v31  ;;  %v2431_v31 = vmul.f32 0.26601174, %v5356_v13 }
 0x305   : > { %2444 = vrot.lane.b32.xlu2 %v2428_v52, %s3980_s10  ;;  %2410 = vrot.lane.b32.xlu1 %v2387_v36, %s3979_s9 }
 0x306   : > { %2408 = vrot.lane.b32.xlu0 %v2386_v9, %s3979_s9 }
 0x307   : > { %v5549_v56 = vpop.permute.xlu2 %1962  ;;  %v5551_v14 = vpop.permute.xlu1 %1918 }
 0x308   : > { %7808 = vst [vmem:[#allocation256_spill] sm:$0xff] %v5549_v56  ;;  %v5553_v4 = vpop.permute.xlu0 %1916 }
 0x309   : > { %7809 = vst [vmem:[#allocation257_spill] sm:$0xff] %v5551_v14  ;;  %v2434_v14 = vmul.f32 0.26601174, %v5385_v22 }
 0x30a   : > { %7810 = vst [vmem:[#allocation258_spill] sm:$0xff] %v5553_v4  ;;  %v2433_v4 = vmul.f32 0.26601174, %v5346_v34 }
 0x30d   : > { %2450 = vrot.lane.b32.xlu2 %v2431_v31, %s3980_s10  ;;  %2448 = vrot.lane.b32.xlu1 %v2430_v3, %s3980_s10 }
 0x30e   : > { %2446 = vrot.lane.b32.xlu0 %v2429_v6, %s3980_s10 }
 0x30f   : > { %v2257_v52 = vpop.permute.xlu2 %2256  ;;  %v5561_v49 = vpop.permute.xlu1 %1948 }
 0x310   : > { %7811 = vst [vmem:[#allocation259_spill] sm:$0xff] %v5561_v49  ;;  %v5563_v56 = vpop.permute.xlu0 %1922 }
 0x311   : > { %7812 = vst [vmem:[#allocation260_spill] sm:$0xff] %v5563_v56  ;;  %v2435_v56 = vmul.f32 0.26601174, %v5379_v41 }
 0x315   : > { %2456 = vrot.lane.b32.xlu2 %v2434_v14, %s3980_s10  ;;  %2454 = vrot.lane.b32.xlu1 %v2433_v4, %s3980_s10 }
 0x316   : > { %2452 = vrot.lane.b32.xlu0 %v2432_v58, %s3980_s10 }
 0x317   : > { %v5571_v31 = vpop.permute.xlu2 %2262  ;;  %v5573_v3 = vpop.permute.xlu1 %1954 }
 0x318   : > { %7813 = vst [vmem:[#allocation261_spill] sm:$0xff] %v5573_v3  ;;  %v5575_v6 = vpop.permute.xlu0 %1952 }
 0x319   : > { %7814 = vst [vmem:[#allocation262_spill] sm:$0xff] %v5575_v6 }
 0x31d   : > { %2478 = vrot.lane.b32.xlu2 %v2381_v18, %s3981_s11  ;;  %2476 = vrot.lane.b32.xlu1 %v2380_v11, %s3981_s11 }
 0x31e   : > { %2458 = vrot.lane.b32.xlu0 %v2435_v56, %s3980_s10 }
 0x31f   : > { %v5581_v49 = vpop.permute.xlu2 %2300  ;;  %v5583_v14 = vpop.permute.xlu1 %1960 }
 0x320   : > { %7815 = vst [vmem:[#allocation263_spill] sm:$0xff] %v5583_v14  ;;  %v5585_v4 = vpop.permute.xlu0 %1958 }
 0x321   : > { %7816 = vst [vmem:[#allocation264_spill] sm:$0xff] %v5585_v4 }
 0x325   : > { %2484 = vrot.lane.b32.xlu2 %v2384_v50, %s3981_s11  ;;  %2482 = vrot.lane.b32.xlu1 %v2383_v38, %s3981_s11 }
 0x326   : > { %2480 = vrot.lane.b32.xlu0 %v2382_v37, %s3981_s11 }
 0x327   : > { %v5590_v58 = vpop.permute.xlu2 %2306  ;;  %v2255_v3 = vpop.permute.xlu1 %2254 }
 0x328   : > { %v2253_v18 = vpop.permute.xlu0 %2252 }
 0x32d   : > { %2490 = vrot.lane.b32.xlu2 %v2387_v36, %s3981_s11  ;;  %2488 = vrot.lane.b32.xlu1 %v2386_v9, %s3981_s11 }
 0x32e   : > { %2486 = vrot.lane.b32.xlu0 %v2385_v24, %s3981_s11 }
 0x32f   : > { %v2313_v56 = vpop.permute.xlu2 %2312  ;;  %v5595_v11 = vpop.permute.xlu1 %2260 }
 0x330   : > { %v5597_v14 = vpop.permute.xlu0 %2258 }
 0x335   : > { %2512 = vrot.lane.b32.xlu2 %v5484_v45, %s3982_s12  ;;  %2510 = vrot.lane.b32.xlu1 %v5457_v62, %s3982_s12  ;;  %v2230_v45 = vmul.f32 0.0010283802, %v5313_v30 }
 0x336   : > { %2508 = vrot.lane.b32.xlu0 %v5460_v29, %s3982_s12 }
 0x337   : > { %v2351_v38 = vpop.permute.xlu2 %2350  ;;  %v2267_v37 = vpop.permute.xlu1 %2266 }
 0x338   : > { %v2265_v50 = vpop.permute.xlu0 %2264 }
 0x33d   : > { %2518 = vrot.lane.b32.xlu2 %v5505_v23, %s3982_s12  ;;  %2516 = vrot.lane.b32.xlu1 %v5478_v26, %s3982_s12  ;;  %v5620_v26 = vmul.f32 0.0010283802, %v5379_v41  ;;  %v2278_v41 = vadd.f32 %v2257_v52, %v2230_v45 }
 0x33e   : > { %2514 = vrot.lane.b32.xlu0 %v5481_v5, %s3982_s12 }
 0x33f   : > { %v5611_v9 = vpop.permute.xlu2 %2356  ;;  %v2305_v24 = vpop.permute.xlu1 %2304  ;;  %v2283_v5 = vadd.f32 %v2267_v37, %v5620_v26 }
 0x340   : > { %v2303_v36 = vpop.permute.xlu0 %2302 }
 0x345   : > { %2540 = vrot.lane.b32.xlu2 %v5394_v63, %s3983_s18  ;;  %2522 = vrot.lane.b32.xlu1 %v5499_v8, %s3982_s12 }
 0x346   : > { %2520 = vrot.lane.b32.xlu0 %v5502_v54, %s3982_s12 }
 0x347   : > { %v2363_v29 = vpop.permute.xlu2 %2362  ;;  %v2311_v62 = vpop.permute.xlu1 %2310 }
 0x348   : > { %v2309_v23 = vpop.permute.xlu0 %2308 }
 0x34d   : > { %2546 = vrot.lane.b32.xlu2 %v5415_v61, %s3983_s18  ;;  %2544 = vrot.lane.b32.xlu1 %v5418_v25, %s3983_s18  ;;  %v5637_v61 = vmul.f32 0.0010283802, %v5385_v22  ;;  %v2228_v22 = vmul.f32 0.0010283802, %v5323_v27 }
 0x34e   : > { %2542 = vrot.lane.b32.xlu0 %v5421_v12, %s3983_s18  ;;  %v2326_v12 = vadd.f32 %v2305_v24, %v2278_v41 }
 0x34f   : > { %v2401_v8 = vpop.permute.xlu2 %2400  ;;  %v2349_v63 = vpop.permute.xlu1 %2348  ;;  %v2282_v52 = vadd.f32 %v2265_v50, %v5637_v61  ;;  %v2276_v41 = vadd.f32 %v2253_v18, %v2228_v22 }
 0x350   : > { %v2315_v54 = vpop.permute.xlu0 %2314 }
 0x351   : > { %v2331_v4 = vadd.f32 %v2315_v54, %v2283_v5 }
 0x353   : > { %v5630_v6 = vadd.f32 %v2363_v29, %v2331_v4  ;;  %v2233_v4 = vmul.f32 0.0010283802, %v5346_v34 }
 0x355   : > { %2552 = vrot.lane.b32.xlu2 %v5436_v59, %s3983_s18  ;;  %2550 = vrot.lane.b32.xlu1 %v5439_v55, %s3983_s18  ;;  %v2229_v59 = vmul.f32 0.0010283802, %v5317_v1  ;;  %v2281_v55 = vadd.f32 %v5571_v31, %v2233_v4 }
 0x356   : > { %2548 = vrot.lane.b32.xlu0 %v5442_v2, %s3983_s18  ;;  %v2330_v2 = vadd.f32 %v2313_v56, %v2282_v52 }
 0x357   : > { %v2407_v25 = vpop.permute.xlu2 %2406  ;;  %v2355_v37 = vpop.permute.xlu1 %2354  ;;  %v2329_v34 = vadd.f32 %v2311_v62, %v2281_v55  ;;  %v3872_v55 = vld [vmem:[%s4091_s6] sm:$0xff] }
 0x358   : > { %v2353_v30 = vpop.permute.xlu0 %2352 }
 0x359   : > { %v2374_v29 = vadd.f32 %v2353_v30, %v2326_v12  ;;  %v2231_v30 = vmul.f32 0.0010283802, %v5356_v13 }
 0x35b   : > { %v5643_v5 = vadd.f32 %v2401_v8, %v2374_v29  ;;  %v2277_v8 = vadd.f32 %v2255_v3, %v2229_v59  ;;  %v2279_v13 = vadd.f32 %v5597_v14, %v2231_v30 }
 0x35d   : > { %2574 = vrot.lane.b32.xlu2 %v5335_v17, %s3984_s15  ;;  %2572 = vrot.lane.b32.xlu1 %v5338_v46, %s3984_s15  ;;  %v2325_v12 = vadd.f32 %v2303_v36, %v2277_v8  ;;  %v2232_v17 = vmul.f32 0.0010283802, %v5350_v16  ;;  %v2324_v46 = vadd.f32 %v5581_v49, %v2276_v41  ;;  %v3874_v8 = vld [vmem:[%s4091_s6 + $0x18] sm:$0xff]  ;;  %v3876_v41 = vld [vmem:[%s4091_s6 + $0x10] sm:$0xff] }
 0x35e   : > { %2554 = vrot.lane.b32.xlu0 %v5463_v0, %s3983_s18 }
 0x35f   : > { %v2445_v50 = vpop.permute.xlu2 %2444  ;;  %v2361_v24 = vpop.permute.xlu1 %2360  ;;  %v2373_v0 = vadd.f32 %v2351_v38, %v2325_v12  ;;  %v2372_v3 = vadd.f32 %v2349_v63, %v2324_v46  ;;  %v2280_v36 = vadd.f32 %v5595_v11, %v2232_v17  ;;  %v3878_v12 = vld [vmem:[%s4091_s6 + $0x8] sm:$0xff] }
 0x360   : > { %v2378_v54 = vadd.f32 %v2361_v24, %v2330_v2  ;;  %v2359_v1 = vpop.permute.xlu0 %2358 }
 0x361   : > { %v2377_v31 = vadd.f32 %v2359_v1, %v2329_v34 }
 0x363   : > { %v5654_v27 = vadd.f32 %v2407_v25, %v2377_v31  ;;  %v2328_v25 = vadd.f32 %v2309_v23, %v2280_v36  ;;  %v3877_v31 = vld [vmem:[%s4077_s4 + $0x10] sm:$0xff] }
 0x365   : > { %2580 = vrot.lane.b32.xlu2 %v5368_v35, %s3984_s15  ;;  %2578 = vrot.lane.b32.xlu1 %v5371_v47, %s3984_s15  ;;  %v2327_v35 = vadd.f32 %v5590_v58, %v2279_v13 }
 0x366   : > { %2576 = vrot.lane.b32.xlu0 %v5332_v42, %s3984_s15  ;;  %v2376_v42 = vadd.f32 %v5611_v9, %v2328_v25  ;;  %v3883_v25 = vld [vmem:[%s4077_s4 + $0x28] sm:$0xff] }
 0x367   : > { %v2451_v18 = vpop.permute.xlu2 %2450  ;;  %v2399_v56 = vpop.permute.xlu1 %2398  ;;  %v2375_v47 = vadd.f32 %v2355_v37, %v2327_v35 }
 0x368   : > { %v2421_v16 = vadd.f32 %v2399_v56, %v2373_v0  ;;  %v2397_v62 = vpop.permute.xlu0 %2396 }
 0x369   : > { %v2420_v49 = vadd.f32 %v2397_v62, %v2372_v3  ;;  %v3881_v62 = vld [vmem:[%s4077_s4 + $0x30] sm:$0xff] }
 0x36b   : > { %v5667_v29 = vadd.f32 %v2445_v50, %v2420_v49  ;;  %v3882_v49 = vld [vmem:[%s4091_s6 + $0x28] sm:$0xff] }
 0x36c   : > { %v5740_v35 = vmul.f32 %v3883_v25, %v3882_v49  ;;  %v7836_v25 = vld [vmem:[#allocation42_spill] sm:$0xff] }
 0x36d   : > { %2586 = vrot.lane.b32.xlu2 %v5397_v53, %s3984_s15  ;;  %2584 = vrot.lane.b32.xlu1 %v5400_v43, %s3984_s15 }
 0x36e   : > { %2582 = vrot.lane.b32.xlu0 %v5365_v10, %s3984_s15 }
 0x36f   : > { %v2457_v11 = vpop.permute.xlu2 %2456  ;;  %v2405_v14 = vpop.permute.xlu1 %2404 }
 0x370   : > { %v2424_v38 = vadd.f32 %v2405_v14, %v2376_v42  ;;  %v2403_v23 = vpop.permute.xlu0 %2402  ;;  %v3884_v42 = vld [vmem:[%s4091_s6 + $0x20] sm:$0xff] }
 0x371   : > { %v2423_v63 = vadd.f32 %v2403_v23, %v2375_v47  ;;  %v3885_v47 = vld [vmem:[%s4077_s4 + $0x20] sm:$0xff] }
 0x373   : > { %v5677_v58 = vadd.f32 %v2451_v18, %v2423_v63 }
 0x375   : > { %2616 = vrot.lane.b32.xlu2 %v2230_v45, %s3985_s19  ;;  %2614 = vrot.lane.b32.xlu1 %v2229_v59, %s3985_s19  ;;  %v3873_v45 = vld [vmem:[%s4077_s4] sm:$0xff] }
 0x376   : > { %2612 = vrot.lane.b32.xlu0 %v2228_v22, %s3985_s19  ;;  %v5689_v59 = vmul.f32 %v3873_v45, %v3872_v55  ;;  %v289_v45 = vadd.f32 %v4280_v51, %v4392_v28 }
 0x377   : > { %v2479_v53 = vpop.permute.xlu2 %2478  ;;  %v2411_v10 = vpop.permute.xlu1 %2410 }
 0x378   : > { %v2427_v43 = vadd.f32 %v2411_v10, %v5630_v6  ;;  %v2409_v9 = vpop.permute.xlu0 %2408  ;;  %7817 = vst [vmem:[#allocation265_spill] sm:$0xff] %v5689_v59 }
 0x379   : > { %v2426_v37 = vadd.f32 %v2409_v9, %v2378_v54  ;;  %v3875_v54 = vld [vmem:[%s4077_s4 + $0x18] sm:$0xff]  ;;  %v5755_v9 = vmul.f32 0.0075987587, %v5740_v35 }
 0x37a   : > { %v5704_v1 = vmul.f32 %v3875_v54, %v3874_v8 }
 0x37b   : > { %v5683_v52 = vadd.f32 %v2457_v11, %v2426_v37  ;;  %v5746_v11 = vmul.f32 %v3885_v47, %v3884_v42  ;;  %7825 = vst [vmem:[#allocation273_spill] sm:$0xff] %v5755_v9  ;;  %v7837_v42 = vld [vmem:[#allocation12_spill] sm:$0xff] }
 0x37c   : > { %v5720_v56 = vmul.f32 0.0075987587, %v5704_v1 }
 0x37d   : > { %2622 = vrot.lane.b32.xlu2 %v2233_v4, %s3985_s19  ;;  %2620 = vrot.lane.b32.xlu1 %v2232_v17, %s3985_s19  ;;  %v5694_v4 = vmul.f32 0.0075987587, %v5689_v59  ;;  %v3879_v17 = vld [vmem:[%s4077_s4 + $0x8] sm:$0xff]  ;;  %v5758_v37 = vmul.f32 0.0075987587, %v5746_v11 }
 0x37e   : > { %2618 = vrot.lane.b32.xlu0 %v2231_v30, %s3985_s19  ;;  %v5714_v30 = vmul.f32 %v3879_v17, %v3878_v12  ;;  %7820 = vst [vmem:[#allocation268_spill] sm:$0xff] %v5720_v56  ;;  %v292_v17 = vadd.f32 %v4269_v48, %v4416_v32  ;;  %v290_v48 = vadd.f32 %v7837_v42, %v7836_v25  ;;  %v7838_v32 = vld [vmem:[#allocation46_spill] sm:$0xff] }
 0x37f   : > { %v2485_v22 = vpop.permute.xlu2 %2484  ;;  %v2449_v6 = vpop.permute.xlu1 %2448  ;;  %7818 = vst [vmem:[#allocation266_spill] sm:$0xff] %v5694_v4 }
 0x380   : > { %v2470_v2 = vadd.f32 %v2449_v6, %v5643_v5  ;;  %v2447_v34 = vpop.permute.xlu0 %2446  ;;  %v5708_v5 = vmul.f32 %v3877_v31, %v3876_v41  ;;  %v5726_v36 = vmul.f32 0.0075987587, %v5714_v30  ;;  %7826 = vst [vmem:[#allocation274_spill] sm:$0xff] %v5758_v37  ;;  %v5780_v41 = vmul.f32 0.036000773, %v5714_v30 }
 0x381   : > { %v2469_v50 = vadd.f32 %v2447_v34, %v2421_v16 }
 0x382   : > { %7819 = vst [vmem:[#allocation267_spill] sm:$0xff] %v5708_v5 }
 0x383   : > { %v5696_v24 = vadd.f32 %v2479_v53, %v2469_v50  ;;  %7822 = vst [vmem:[#allocation270_spill] sm:$0xff] %v5726_v36 }
 0x384   : > { %7827 = vst [vmem:[#allocation275_spill] sm:$0xff] %v5780_v41 }
 0x385   : > { %2916 = vrot.lane.b32.xlu2 %v5694_v4, %s3976_s21  ;;  %2626 = vrot.lane.b32.xlu1 %v5620_v26, %s3985_s19 }
 0x386   : > { %2624 = vrot.lane.b32.xlu0 %v5637_v61, %s3985_s19  ;;  %v5723_v61 = vmul.f32 0.0075987587, %v5708_v5 }
 0x387   : > { %v2491_v26 = vpop.permute.xlu2 %2490  ;;  %v2455_v46 = vpop.permute.xlu1 %2454 }
 0x388   : > { %v5717_v0 = vadd.f32 %v2455_v46, %v5654_v27  ;;  %v2453_v3 = vpop.permute.xlu0 %2452  ;;  %7821 = vst [vmem:[#allocation269_spill] sm:$0xff] %v5723_v61  ;;  %v3880_v27 = vld [vmem:[%s4091_s6 + $0x30] sm:$0xff] }
 0x389   : > { %v2472_v18 = vadd.f32 %v2453_v3, %v2424_v38  ;;  %v5736_v13 = vmul.f32 %v3881_v62, %v3880_v27  ;;  %v7833_v3 = vld [vmem:[#allocation11_spill] sm:$0xff]  ;;  %v7834_v27 = vld [vmem:[#allocation36_spill] sm:$0xff]  ;;  %v7835_v62 = vld [vmem:[#allocation14_spill] sm:$0xff] }
 0x38a   : > { %v288_v49 = vadd.f32 %v7835_v62, %v7834_v27  ;;  %v7848_v62 = vld [vmem:[#allocation56_spill] sm:$0xff] }
 0x38b   : > { %v5728_v16 = vadd.f32 %v2485_v22, %v2472_v18  ;;  %7823 = vst [vmem:[#allocation271_spill] sm:$0xff] %v5736_v13  ;;  %v5752_v10 = vmul.f32 0.0075987587, %v5736_v13  ;;  %v3887_v22 = vld [vmem:[%s4077_s4 + $0x38] sm:$0xff] }
 0x38d   : > { %2922 = vrot.lane.b32.xlu2 %v5720_v56, %s3976_s21  ;;  %2920 = vrot.lane.b32.xlu1 %v5723_v61, %s3976_s21  ;;  %7824 = vst [vmem:[#allocation272_spill] sm:$0xff] %v5752_v10 }
 0x38e   : > { %2918 = vrot.lane.b32.xlu0 %v5726_v36, %s3976_s21 }
 0x38f   : > { %v2513_v14 = vpop.permute.xlu2 %2512  ;;  %v2477_v38 = vpop.permute.xlu1 %2476 }
 0x390   : > { %v5749_v23 = vadd.f32 %v2477_v38, %v5667_v29  ;;  %v2459_v63 = vpop.permute.xlu0 %2458  ;;  %v337_v29 = vadd.f32 %v4313_v60, %v289_v45  ;;  %v5783_v60 = vmul.f32 0.036000773, %v5689_v59  ;;  %v7842_v45 = vld [vmem:[#allocation47_spill] sm:$0xff] }
 0x391   : > { %v2475_v53 = vadd.f32 %v2459_v63, %v2427_v43  ;;  %v3886_v43 = vld [vmem:[%s4091_s6 + $0x38] sm:$0xff] }
 0x392   : > { %v5773_v6 = vmul.f32 %v3887_v22, %v3886_v43  ;;  %v385_v8 = vadd.f32 %v4353_v19, %v337_v29  ;;  %7828 = vst [vmem:[#allocation276_spill] sm:$0xff] %v5783_v60  ;;  %v7841_v63 = vld [vmem:[#allocation43_spill] sm:$0xff]  ;;  %v7843_v29 = vld [vmem:[#allocation17_spill] sm:$0xff] }
 0x393   : > { %v5760_v55 = vadd.f32 %v2491_v26, %v2475_v53  ;;  %v7831_v26 = vld [vmem:[#allocation8_spill] sm:$0xff]  ;;  %v293_v43 = vadd.f32 %v7843_v29, %v7842_v45  ;;  %v7844_v22 = vld [vmem:[#allocation19_spill] sm:$0xff]  ;;  %v7856_v29 = vld [vmem:[#allocation18_spill] sm:$0xff] }
 0x394   : > { %v5786_v31 = vmul.f32 0.0075987587, %v5773_v6  ;;  %v433_v19 = vadd.f32 %v4339_v15, %v385_v8  ;;  %v7839_v15 = vld [vmem:[#allocation15_spill] sm:$0xff]  ;;  %v7845_v8 = vld [vmem:[#allocation22_spill] sm:$0xff] }
 0x395   : > { %2928 = vrot.lane.b32.xlu2 %v5752_v10, %s3976_s21  ;;  %2926 = vrot.lane.b32.xlu1 %v5755_v9, %s3976_s21  ;;  %v294_v47 = vadd.f32 %v7839_v15, %v7838_v32  ;;  %v5823_v32 = vmul.f32 0.036000773, %v5746_v11  ;;  %v7863_v10 = vld [vmem:[#allocation30_spill] sm:$0xff] }
 0x396   : > { %2924 = vrot.lane.b32.xlu0 %v5758_v37, %s3976_s21  ;;  %7829 = vst [vmem:[#allocation277_spill] sm:$0xff] %v5786_v31  ;;  %v481_v53 = vadd.f32 %v7841_v63, %v433_v19  ;;  %v7854_v63 = vld [vmem:[#allocation13_spill] sm:$0xff]  ;;  %v7928_v37 = vld [vmem:[#allocation84_spill] sm:$0xff] }
 0x397   : > { %v2519_v34 = vpop.permute.xlu2 %2518  ;;  %v2483_v50 = vpop.permute.xlu1 %2482 }
 0x398   : > { %v5777_v51 = vadd.f32 %v2483_v50, %v5677_v58  ;;  %v2481_v28 = vpop.permute.xlu0 %2480  ;;  %v7830_v58 = vld [vmem:[#allocation41_spill] sm:$0xff]  ;;  %v336_v50 = vadd.f32 %v7844_v22, %v288_v49  ;;  %v5826_v49 = vmul.f32 0.036000773, %v5704_v1 }
 0x399   : > { %v2502_v54 = vadd.f32 %v2481_v28, %v2470_v2  ;;  %v291_v46 = vadd.f32 %v7831_v26, %v7830_v58  ;;  %v7832_v2 = vld [vmem:[#allocation37_spill] sm:$0xff]  ;;  %v7846_v26 = vld [vmem:[#allocation24_spill] sm:$0xff]  ;;  %7849 = vst [vmem:[#allocation41_spill] sm:$0xff] %v5823_v32 }
 0x39a   : > { %v287_v18 = vadd.f32 %v7833_v3, %v7832_v2  ;;  %v342_v2 = vadd.f32 %v7846_v26, %v294_v47  ;;  %v7847_v3 = vld [vmem:[#allocation29_spill] sm:$0xff]  ;;  %7850 = vst [vmem:[#allocation8_spill] sm:$0xff] %v5826_v49 }
 0x39b   : > { %v5788_v12 = vadd.f32 %v2513_v14, %v2502_v54  ;;  %v7840_v14 = vld [vmem:[#allocation20_spill] sm:$0xff]  ;;  %v339_v28 = vadd.f32 %v7845_v8, %v291_v46  ;;  %v7851_v46 = vld [vmem:[#allocation9_spill] sm:$0xff]  ;;  %v7857_v8 = vld [vmem:[#allocation23_spill] sm:$0xff] }
 0x39c   : > { %v340_v38 = vadd.f32 %v7840_v14, %v292_v17  ;;  %v513_v17 = vadd.f32 %v7848_v62, %v481_v53  ;;  %v335_v15 = vadd.f32 %v7851_v46, %v287_v18  ;;  %v7852_v14 = vld [vmem:[#allocation10_spill] sm:$0xff]  ;;  %v341_v53 = vadd.f32 %v7854_v63, %v293_v43  ;;  %v7858_v26 = vld [vmem:[#allocation21_spill] sm:$0xff]  ;;  %v7860_v18 = vld [vmem:[#allocation52_spill] sm:$0xff] }
 0x39d   : > { %2966 = vrot.lane.b32.xlu2 %v5780_v41, %s3977_s7  ;;  %2964 = vrot.lane.b32.xlu1 %v5783_v60, %s3977_s7  ;;  %v338_v47 = vadd.f32 %v7852_v14, %v290_v48  ;;  %v387_v22 = vadd.f32 %v7856_v29, %v339_v28  ;;  %v7859_v62 = vld [vmem:[#allocation26_spill] sm:$0xff]  ;;  %v7861_v48 = vld [vmem:[#allocation25_spill] sm:$0xff] }
 0x39e   : > { %2930 = vrot.lane.b32.xlu0 %v5786_v31, %s3976_s21  ;;  %v388_v27 = vadd.f32 %v7847_v3, %v340_v38  ;;  %v5831_v38 = vmul.f32 0.036000773, %v5708_v5  ;;  %v390_v3 = vadd.f32 %v7858_v26, %v342_v2  ;;  %v545_v46 = vadd.f32 %v7860_v18, %v513_v17  ;;  %v7862_v31 = vld [vmem:[#allocation27_spill] sm:$0xff]  ;;  %v7865_v28 = vld [vmem:[#allocation33_spill] sm:$0xff] }
 0x39f   : > { %v2541_v54 = vpop.permute.xlu2 %2540  ;;  %v2489_v58 = vpop.permute.xlu1 %2488  ;;  %v386_v14 = vadd.f32 %v7861_v48, %v338_v47  ;;  %v389_v9 = vadd.f32 %v7862_v31, %v341_v53  ;;  %v435_v2 = vadd.f32 %v7865_v28, %v387_v22  ;;  %v7868_v31 = vld [vmem:[#allocation35_spill] sm:$0xff]  ;;  %v7870_v53 = vld [vmem:[#allocation40_spill] sm:$0xff]  ;;  %v7875_v28 = vld [vmem:[#allocation53_spill] sm:$0xff] }
 0x3a0   : > { %v5819_v19 = vadd.f32 %v2489_v58, %v5683_v52  ;;  %v2487_v25 = vpop.permute.xlu0 %2486  ;;  %7853 = vst [vmem:[#allocation37_spill] sm:$0xff] %v5831_v38  ;;  %v7855_v52 = vld [vmem:[#allocation16_spill] sm:$0xff]  ;;  %v383_v58 = vadd.f32 %v7857_v8, %v335_v15  ;;  %v7867_v15 = vld [vmem:[#allocation69_spill] sm:$0xff]  ;;  %v7873_v22 = vld [vmem:[#allocation59_spill] sm:$0xff] }
 0x3a1   : > { %v2505_v42 = vadd.f32 %v2487_v25, %v5717_v0  ;;  %v384_v45 = vadd.f32 %v7855_v52, %v336_v50  ;;  %v436_v25 = vadd.f32 %v7859_v62, %v388_v27  ;;  %v577_v17 = vadd.f32 %v7867_v15, %v545_v46  ;;  %v7880_v15 = vld [vmem:[#allocation31_spill] sm:$0xff] }
 0x3a2   : > { %v434_v47 = vadd.f32 %v7868_v31, %v386_v14  ;;  %v437_v52 = vadd.f32 %v7870_v53, %v389_v9  ;;  %v5868_v9 = vmul.f32 0.036000773, %v5773_v6 }
 0x3a3   : > { %v5836_v0 = vadd.f32 %v2519_v34, %v2505_v42  ;;  %v432_v43 = vadd.f32 %v7863_v10, %v384_v45  ;;  %v7864_v34 = vld [vmem:[#allocation32_spill] sm:$0xff]  ;;  %v7869_v10 = vld [vmem:[#allocation38_spill] sm:$0xff]  ;;  %v7871_v45 = vld [vmem:[#allocation45_spill] sm:$0xff] }
 0x3a4   : > { %v431_v50 = vadd.f32 %v7864_v34, %v383_v58  ;;  %v7866_v42 = vld [vmem:[#allocation48_spill] sm:$0xff]  ;;  %v438_v63 = vadd.f32 %v7869_v10, %v390_v3  ;;  %v7872_v58 = vld [vmem:[#allocation50_spill] sm:$0xff]  ;;  %7876 = vst [vmem:[#allocation11_spill] sm:$0xff] %v5868_v9 }
 0x3a5   : > { %2972 = vrot.lane.b32.xlu2 %v5823_v32, %s3977_s7  ;;  %2970 = vrot.lane.b32.xlu1 %v5826_v49, %s3977_s7  ;;  %v484_v27 = vadd.f32 %v7866_v42, %v436_v25  ;;  %v480_v29 = vadd.f32 %v7871_v45, %v432_v43  ;;  %v483_v62 = vadd.f32 %v7872_v58, %v435_v2  ;;  %v7874_v25 = vld [vmem:[#allocation80_spill] sm:$0xff]  ;;  %v5871_v43 = vmul.f32 0.036000773, %v5736_v13 }
 0x3a6   : > { %2968 = vrot.lane.b32.xlu0 %v5831_v38, %s3977_s7  ;;  %v609_v48 = vadd.f32 %v7874_v25, %v577_v17  ;;  %v486_v14 = vadd.f32 %v7875_v28, %v438_v63  ;;  %v5874_v2 = vmul.f32 0.036000773, %v5740_v35  ;;  %v7879_v42 = vld [vmem:[#allocation28_spill] sm:$0xff]  ;;  %v482_v17 = vadd.f32 %v7880_v15, %v434_v47  ;;  %v7882_v63 = vld [vmem:[#allocation39_spill] sm:$0xff] }
 0x3a7   : > { %v2547_v8 = vpop.permute.xlu2 %2546  ;;  %v2511_v26 = vpop.permute.xlu1 %2510  ;;  %v516_v18 = vadd.f32 %v7873_v22, %v484_v27  ;;  %7877 = vst [vmem:[#allocation36_spill] sm:$0xff] %v5871_v43  ;;  %v479_v27 = vadd.f32 %v7879_v42, %v431_v50  ;;  %v512_v53 = vadd.f32 %v7882_v63, %v480_v29  ;;  %v7885_v22 = vld [vmem:[#allocation75_spill] sm:$0xff]  ;;  %v7896_v63 = vld [vmem:[#allocation68_spill] sm:$0xff]  ;;  %v6022_v49 = vmul.f32 0.109360695, %v5736_v13 }
 0x3a8   : > { %v5863_v46 = vadd.f32 %v2511_v26, %v5696_v24  ;;  %v2509_v34 = vpop.permute.xlu0 %2508  ;;  %7878 = vst [vmem:[#allocation14_spill] sm:$0xff] %v5874_v2  ;;  %v7881_v24 = vld [vmem:[#allocation34_spill] sm:$0xff]  ;;  %v7884_v26 = vld [vmem:[#allocation55_spill] sm:$0xff]  ;;  %v649_v25 = vadd.f32 %v7885_v22, %v609_v48  ;;  %v514_v33 = vadd.f32 %v7887_v57, %v482_v17  ;;  %v518_v50 = vadd.f32 %v7888_v40, %v486_v14  ;;  %v7894_v40 = vld [vmem:[#allocation65_spill] sm:$0xff] }
 0x3a9   : > { %v2532_v3 = vadd.f32 %v2509_v34, %v5749_v23  ;;  %v485_v31 = vadd.f32 %v7881_v24, %v437_v52  ;;  %v7883_v23 = vld [vmem:[#allocation44_spill] sm:$0xff]  ;;  %v548_v58 = vadd.f32 %v7884_v26, %v516_v18  ;;  %v7886_v34 = vld [vmem:[#allocation51_spill] sm:$0xff]  ;;  %v7892_v48 = vld [vmem:[#allocation62_spill] sm:$0xff]  ;;  %7926 = vst [vmem:[#allocation22_spill] sm:$0xff] %v6022_v49 }
 0x3aa   : > { %v515_v45 = vadd.f32 %v7883_v23, %v483_v62  ;;  %v511_v28 = vadd.f32 %v7886_v34, %v479_v27  ;;  %v7890_v52 = vld [vmem:[#allocation60_spill] sm:$0xff]  ;;  %v7893_v57 = vld [vmem:[#allocation63_spill] sm:$0xff]  ;;  %v546_v14 = vadd.f32 %v7894_v40, %v514_v33  ;;  %v7895_v27 = vld [vmem:[#allocation66_spill] sm:$0xff]  ;;  %v5912_v33 = vmul.f32 0.109360695, %v5714_v30 }
 0x3ab   : > { %v5879_v10 = vadd.f32 %v2541_v54, %v2532_v3  ;;  %v7889_v54 = vld [vmem:[#allocation57_spill] sm:$0xff]  ;;  %v544_v29 = vadd.f32 %v7890_v52, %v512_v53  ;;  %v7891_v62 = vld [vmem:[#allocation72_spill] sm:$0xff]  ;;  %v550_v15 = vadd.f32 %v7895_v27, %v518_v50  ;;  %v7897_v26 = vld [vmem:[#allocation83_spill] sm:$0xff] }
 0x3ac   : > { %v517_v47 = vadd.f32 %v7889_v54, %v485_v31  ;;  %v580_v18 = vadd.f32 %v7891_v62, %v548_v58  ;;  %v543_v3 = vadd.f32 %v7892_v48, %v511_v28  ;;  %v547_v42 = vadd.f32 %v7893_v57, %v515_v45  ;;  %v7898_v34 = vld [vmem:[#allocation71_spill] sm:$0xff]  ;;  %7900 = vst [vmem:[#allocation12_spill] sm:$0xff] %v5912_v33  ;;  %v7901_v50 = vld [vmem:[#allocation74_spill] sm:$0xff] }
 0x3ad   : > { %2978 = vrot.lane.b32.xlu2 %v5868_v9, %s3977_s7  ;;  %2976 = vrot.lane.b32.xlu1 %v5871_v43, %s3977_s7  ;;  %v660_v31 = vmul.f32 0.0075987587, %v649_v25  ;;  %v576_v54 = vadd.f32 %v7898_v34, %v544_v29  ;;  %v5909_v45 = vmul.f32 0.109360695, %v5708_v5  ;;  %v5919_v48 = vmul.f32 0.109360695, %v649_v25 }
 0x3ae   : > { %2974 = vrot.lane.b32.xlu0 %v5874_v2, %s3977_s7  ;;  %v549_v23 = vadd.f32 %v7896_v63, %v517_v47  ;;  %v612_v53 = vadd.f32 %v7897_v26, %v580_v18  ;;  %v579_v52 = vadd.f32 %v7901_v50, %v547_v42  ;;  %v7902_v47 = vld [vmem:[#allocation77_spill] sm:$0xff]  ;;  %v5917_v18 = vmul.f32 0.109360695, %v5689_v59  ;;  %v7905_v63 = vld [vmem:[#allocation78_spill] sm:$0xff]  ;;  %v7908_v50 = vld [vmem:[#allocation67_spill] sm:$0xff] }
 0x3af   : > { %v2553_v17 = vpop.permute.xlu2 %2552  ;;  %v2517_v24 = vpop.permute.xlu1 %2516  ;;  %7899 = vst [vmem:[#allocation42_spill] sm:$0xff] %v5909_v45  ;;  %v582_v62 = vadd.f32 %v7902_v47, %v550_v15  ;;  %v5921_v57 = vmul.f32 0.21300554, %v649_v25  ;;  %v668_v27 = vrot.slane %v660_v31, 1  ;;  %v7906_v42 = vld [vmem:[#allocation61_spill] sm:$0xff]  ;;  %v7907_v15 = vld [vmem:[#allocation64_spill] sm:$0xff]  ;;  %v608_v47 = vadd.f32 %v7908_v50, %v576_v54 }
 0x3b0   : > { %v5904_v58 = vadd.f32 %v2517_v24, %v5728_v16  ;;  %v2515_v22 = vpop.permute.xlu0 %2514  ;;  %7903 = vst [vmem:[#allocation46_spill] sm:$0xff] %v5917_v18  ;;  %v680_v16 = vmul.f32 0.036000773, %v649_v25  ;;  %v5926_v24 = vmul.f32 0.26601174, %v649_v25  ;;  %v652_v26 = vadd.f32 %v7905_v63, %v612_v53  ;;  %v7910_v31 = vld [vmem:[#allocation70_spill] sm:$0xff] }
 0x3b1   : > { %v2535_v28 = vadd.f32 %v2515_v22, %v5777_v51  ;;  %v7904_v51 = vld [vmem:[#allocation58_spill] sm:$0xff]  ;;  %v578_v22 = vadd.f32 %v7906_v42, %v546_v14  ;;  %v581_v34 = vadd.f32 %v7907_v15, %v549_v23  ;;  %v7911_v2 = vld [vmem:[#allocation73_spill] sm:$0xff]  ;;  %v7912_v14 = vld [vmem:[#allocation79_spill] sm:$0xff] }
 0x3b2   : > { %v575_v40 = vadd.f32 %v7904_v51, %v543_v3  ;;  %v656_v3 = vmul.f32 0.0010283802, %v649_v25  ;;  %v611_v51 = vadd.f32 %v7910_v31, %v579_v52  ;;  %v5939_v9 = vadd.f32 %v7911_v2, %v582_v62  ;;  %v7913_v62 = vld [vmem:[#allocation89_spill] sm:$0xff]  ;;  %v7918_v54 = vld [vmem:[#allocation120_spill] sm:$0xff] }
 0x3b3   : > { %v5923_v29 = vadd.f32 %v2547_v8, %v2535_v28  ;;  %v7909_v8 = vld [vmem:[#allocation76_spill] sm:$0xff]  ;;  %v610_v23 = vadd.f32 %v7912_v14, %v578_v22  ;;  %v688_v53 = vrot.slane %v680_v16, 2  ;;  %v5957_v22 = vmul.f32 0.21300554, %v5708_v5  ;;  %v7914_v14 = vld [vmem:[#allocation86_spill] sm:$0xff] }
 0x3b4   : > { %v607_v28 = vadd.f32 %v7909_v8, %v575_v40  ;;  %v676_v50 = vadd.f32 %v668_v27, %v656_v3  ;;  %v5947_v40 = vmul.f32 0.109360695, %v652_v26  ;;  %v5960_v31 = vmul.f32 0.21300554, %v5689_v59  ;;  %v7927_v43 = vld [vmem:[#allocation124_spill] sm:$0xff] }
 0x3b5   : > { %3016 = vrot.lane.b32.xlu2 %v5909_v45, %s3978_s8  ;;  %3014 = vrot.lane.b32.xlu1 %v5912_v33, %s3978_s8  ;;  %v5953_v8 = vadd.f32 %v7913_v62, %v610_v23  ;;  %v5962_v27 = vmul.f32 0.21300554, %v652_v26  ;;  %v5964_v3 = vmul.f32 0.26601174, %v652_v26  ;;  %v5979_v36 = vadd.f32 %v7919_v20, %v7918_v54 }
 0x3b6   : > { %3012 = vrot.lane.b32.xlu0 %v5917_v18, %s3978_s8  ;;  %v647_v25 = vadd.f32 %v7914_v14, %v607_v28  ;;  %v5982_v56 = vadd.f32 %v7921_v39, %v581_v34  ;;  %v7922_v28 = vld [vmem:[#allocation88_spill] sm:$0xff]  ;;  %v696_v23 = vadd.f32 %v688_v53, %v676_v50  ;;  %v5987_v7 = vmul.f32 0.036000773, %v652_v26 }
 0x3b7   : > { %v2575_v42 = vpop.permute.xlu2 %2574  ;;  %v2523_v15 = vpop.permute.xlu1 %2522  ;;  %7920 = vst [vmem:[#allocation43_spill] sm:$0xff] %v5979_v36  ;;  %v5985_v14 = vadd.f32 %v7922_v28, %v611_v51  ;;  %v5996_v20 = vmul.f32 0.0010283802, %v652_v26  ;;  %v6019_v50 = vmul.f32 0.21300554, %v5746_v11  ;;  %v6026_v21 = vadd.f32 %v7928_v37, %v7927_v43 }
 0x3b8   : > { %v5950_v2 = vadd.f32 %v2523_v15, %v5760_v55  ;;  %v2521_v52 = vpop.permute.xlu0 %2520  ;;  %v5968_v55 = vmul.f32 0.109360695, %v5746_v11  ;;  %v5971_v15 = vmul.f32 0.0075987587, %v652_v26  ;;  %7923 = vst [vmem:[#allocation47_spill] sm:$0xff] %v5987_v7  ;;  %v7935_v33 = vrot.slane %v5919_v48, 3 }
 0x3b9   : > { %v2538_v16 = vadd.f32 %v2521_v52, %v5819_v19  ;;  %v7917_v19 = vld [vmem:[#allocation85_spill] sm:$0xff]  ;;  %7924 = vst [vmem:[#allocation17_spill] sm:$0xff] %v5996_v20  ;;  %v659_v51 = vmul.f32 0.0075987587, %v647_v25  ;;  %v661_v34 = vmul.f32 0.0075987587, %v5985_v14 }
 0x3ba   : > { %7915 = vst [vmem:[#allocation15_spill] sm:$0xff] %v5968_v55  ;;  %v648_v52 = vadd.f32 %v7917_v19, %v608_v47  ;;  %v5990_v47 = vmul.f32 0.109360695, %v5953_v8  ;;  %v655_v41 = vmul.f32 0.0010283802, %v647_v25 }
 0x3bb   : > { %7916 = vst [vmem:[#allocation20_spill] sm:$0xff] %v5971_v15  ;;  %v5974_v62 = vadd.f32 %v2553_v17, %v2538_v16  ;;  %v679_v7 = vmul.f32 0.036000773, %v647_v25  ;;  %v669_v37 = vrot.slane %v661_v34, 1  ;;  %v6046_v4 = vmul.f32 0.21300554, %v647_v25 }
 0x3bc   : > { %v6006_v16 = vmul.f32 0.109360695, %v648_v52  ;;  %v6008_v28 = vmul.f32 0.21300554, %v648_v52  ;;  %v6010_v63 = vmul.f32 0.26601174, %v648_v52 }
 0x3bd   : > { %3064 = vrot.lane.b32.xlu2 %v5957_v22, %s3979_s9  ;;  %3060 = vrot.lane.b32.xlu1 %v5960_v31, %s3979_s9  ;;  %v720_v53 = vrot.slane %v5990_v47, 3  ;;  %7925 = vst [vmem:[#allocation19_spill] sm:$0xff] %v6019_v50  ;;  %v6028_v15 = vmul.f32 0.036000773, %v648_v52  ;;  %v6033_v32 = vmul.f32 0.0075987587, %v648_v52 }
 0x3be   : > { %3020 = vrot.lane.b32.xlu0 %v5968_v55, %s3978_s8  ;;  %7929 = vst [vmem:[#allocation24_spill] sm:$0xff] %v6026_v21  ;;  %v6055_v34 = vmul.f32 0.26601174, %v647_v25  ;;  %v681_v43 = vmul.f32 0.036000773, %v5985_v14  ;;  %v754_v20 = vrot.slane %v6008_v28, 4 }
 0x3bf   : > { %v2581_v26 = vpop.permute.xlu2 %2580  ;;  %v2545_v19 = vpop.permute.xlu1 %2544  ;;  %7930 = vst [vmem:[#allocation29_spill] sm:$0xff] %v6028_v15  ;;  %v717_v15 = vrot.slane %v6006_v16, 3  ;;  %v776_v61 = vmul.f32 0.26601174, %v5953_v8  ;;  %v6073_v18 = vmul.f32 0.109360695, %v5740_v35 }
 0x3c0   : > { %v6014_v17 = vadd.f32 %v2545_v19, %v5788_v12  ;;  %v2543_v39 = vpop.permute.xlu0 %2542  ;;  %v667_v12 = vrot.slane %v659_v51, 1  ;;  %v6031_v19 = vmul.f32 0.109360695, %v5704_v1  ;;  %7932 = vst [vmem:[#allocation9_spill] sm:$0xff] %v6033_v32  ;;  %v6044_v51 = vmul.f32 0.109360695, %v647_v25 }
 0x3c1   : > { %v2565_v54 = vadd.f32 %v2543_v39, %v5863_v46  ;;  %v6035_v46 = vmul.f32 0.0010283802, %v648_v52  ;;  %v6038_v39 = vmul.f32 0.21300554, %v5953_v8  ;;  %v721_v52 = vsel %vm715_vm0, %v7935_v33, %v720_v53  ;;  %7936 = vst [vmem:[#allocation16_spill] sm:$0xff] %v6073_v18 }
 0x3c2   : > { %7931 = vst [vmem:[#allocation56_spill] sm:$0xff] %v6031_v19  ;;  %v6063_v33 = vmul.f32 0.109360695, %v5985_v14  ;;  %v687_v25 = vrot.slane %v679_v7, 2  ;;  %v3094_v45 = vmul.f32 0.26601174, %v5708_v5 }
 0x3c3   : > { %7933 = vst [vmem:[#allocation10_spill] sm:$0xff] %v6035_v46  ;;  %v6040_v44 = vadd.f32 %v2575_v42, %v2565_v54  ;;  %v675_v42 = vadd.f32 %v667_v12, %v655_v41  ;;  %v657_v54 = vmul.f32 0.0010283802, %v5985_v14  ;;  %v757_v53 = vrot.slane %v6038_v39, 4 }
 0x3c4   : > { %v740_v7 = vmul.f32 0.21300554, %v5985_v14  ;;  %v777_v36 = vmul.f32 0.26601174, %v5985_v14  ;;  %v7939_v14 = vrot.slane %v5926_v24, 5 }
 0x3c5   : > { %7934 = vst [vmem:[#allocation13_spill] sm:$0xff] %v6040_v44  ;;  %3068 = vrot.lane.b32.xlu2 %v6019_v50, %s3979_s9  ;;  %3024 = vrot.lane.b32.xlu1 %v6022_v49, %s3978_s8  ;;  %v677_v12 = vadd.f32 %v669_v37, %v657_v54  ;;  %v733_v49 = vadd.f32 %v721_v52, %v696_v23  ;;  %v689_v44 = vrot.slane %v681_v43, 2  ;;  %v3092_v23 = vmul.f32 0.26601174, %v5689_v59 }
 0x3c6   : > { %3018 = vrot.lane.b32.xlu0 %v6031_v19, %s3978_s8  ;;  %v716_v19 = vrot.slane %v6044_v51, 3  ;;  %v695_v50 = vadd.f32 %v687_v25, %v675_v42  ;;  %v7937_v37 = vrot.slane %v5921_v57, 4  ;;  %v791_v54 = vrot.slane %v6010_v63, 5 }
 0x3c7   : > { %v2587_v38 = vpop.permute.xlu2 %2586  ;;  %v2551_v41 = vpop.permute.xlu1 %2550  ;;  %v697_v5 = vadd.f32 %v689_v44, %v677_v12  ;;  %v812_v43 = vrot.slane %v6008_v28, 6  ;;  %v833_v25 = vrot.slane %v6006_v16, 7  ;;  %v811_v63 = vrot.slane %v6046_v4, 6 }
 0x3c8   : > { %v6068_v21 = vadd.f32 %v2551_v41, %v5836_v0  ;;  %v2549_v55 = vpop.permute.xlu0 %2548  ;;  %v722_v0 = vrot.slane %v6063_v33, 3  ;;  %v758_v52 = vsel %vm752_vm1, %v7937_v37, %v757_v53  ;;  %v753_v41 = vrot.slane %v6046_v4, 4  ;;  %v7940_v37 = vld [vmem:[#allocation92_spill] sm:$0xff] }
 0x3c9   : > { %v2568_v60 = vadd.f32 %v2549_v55, %v5904_v58  ;;  %v794_v58 = vrot.slane %v776_v61, 5  ;;  %v770_v42 = vadd.f32 %v758_v52, %v733_v49  ;;  %v718_v59 = vsel %vm715_vm0, %v716_v19, %v717_v15 }
 0x3ca   : > { %v732_v61 = vadd.f32 %v718_v59, %v695_v50  ;;  %v832_v44 = vrot.slane %v6044_v51, 7  ;;  %v7938_v49 = vrot.slane %v5947_v40, 3  ;;  %v759_v16 = vrot.slane %v740_v7, 4 }
 0x3cb   : > { %v6082_v55 = vadd.f32 %v2581_v26, %v2568_v60  ;;  %v790_v60 = vrot.slane %v6055_v34, 5  ;;  %v795_v26 = vsel %vm789_vm2, %v7939_v14, %v794_v58  ;;  %v755_v28 = vsel %vm752_vm1, %v753_v41, %v754_v20 }
 0x3cc   : > { %v724_v15 = vsel %vm715_vm0, %v722_v0, %v7938_v49  ;;  %v807_v19 = vadd.f32 %v795_v26, %v770_v42  ;;  %v796_v53 = vrot.slane %v777_v36, 5  ;;  %v6113_v24 = vmul.f32 0.21300554, %v5704_v1  ;;  %v7943_v42 = vld [vmem:[#allocation130_spill] sm:$0xff]  ;;  %v7946_v26 = vld [vmem:[#allocation91_spill] sm:$0xff] }
 0x3cd   : > { %3022 = vrot.lane.b32.xlu2 %v6073_v18, %s3978_s8  ;;  %3112 = vrot.lane.b32.xlu1 %v3094_v45, %s3980_s10  ;;  %v815_v45 = vrot.slane %v6038_v39, 6  ;;  %v734_v4 = vadd.f32 %v724_v15, %v697_v5  ;;  %v769_v39 = vadd.f32 %v755_v28, %v732_v61  ;;  %v817_v0 = vrot.slane %v740_v7, 6  ;;  %v7944_v61 = vld [vmem:[#allocation87_spill] sm:$0xff] }
 0x3ce   : > { %3108 = vrot.lane.b32.xlu0 %v3092_v23, %s3980_s10  ;;  %v6110_v23 = vmul.f32 0.21300554, %v5736_v13  ;;  %v653_v20 = vadd.f32 %v7940_v37, %v5982_v56  ;;  %v6118_v5 = vmul.f32 0.21300554, %v5714_v30  ;;  %v836_v58 = vrot.slane %v5990_v47, 7 }
 0x3cf   : > { %v2617_v59 = vpop.permute.xlu2 %2616  ;;  %v2573_v50 = vpop.permute.xlu1 %2572  ;;  %v6132_v56 = vadd.f32 %v7944_v61, %v7943_v42  ;;  %v6141_v47 = vadd.f32 %v7946_v26, %v5939_v9 }
 0x3d0   : > { %v6106_v51 = vadd.f32 %v2573_v50, %v5879_v10  ;;  %v2555_v34 = vpop.permute.xlu0 %2554  ;;  %v7941_v10 = vrot.slane %v5962_v27, 4  ;;  %v838_v50 = vrot.slane %v6063_v33, 7  ;;  %v662_v28 = vmul.f32 0.0075987587, %v653_v20 }
 0x3d1   : > { %v2571_v12 = vadd.f32 %v2555_v34, %v5950_v2  ;;  %v7942_v2 = vrot.slane %v5921_v57, 6  ;;  %7945 = vst [vmem:[#allocation18_spill] sm:$0xff] %v6132_v56  ;;  %v6137_v57 = vsel %vm831_vm4, %v832_v44, %v833_v25  ;;  %v7949_v25 = vrot.slane %v5962_v27, 6 }
 0x3d2   : > { %v761_v36 = vsel %vm752_vm1, %v759_v16, %v7941_v10  ;;  %v792_v16 = vsel %vm789_vm2, %v790_v60, %v791_v54  ;;  %7947 = vst [vmem:[#allocation23_spill] sm:$0xff] %v6141_v47  ;;  %v7948_v54 = vrot.slane %v5964_v3, 5  ;;  %v7950_v44 = vrot.slane %v5919_v48, 7 }
 0x3d3   : > { %v816_v52 = vsel %vm810_vm3, %v7942_v2, %v815_v45  ;;  %v6127_v41 = vadd.f32 %v2587_v38, %v2571_v12  ;;  %v771_v49 = vadd.f32 %v761_v36, %v734_v4  ;;  %v806_v38 = vadd.f32 %v792_v16, %v769_v39 }
 0x3d4   : > { %v828_v15 = vadd.f32 %v816_v52, %v807_v19  ;;  %v813_v45 = vsel %vm810_vm3, %v811_v63, %v812_v43  ;;  %v798_v9 = vsel %vm789_vm2, %v796_v53, %v7948_v54  ;;  %v819_v60 = vsel %vm810_vm3, %v817_v0, %v7949_v25 }
 0x3d5   : > { %3072 = vrot.lane.b32.xlu2 %v6110_v23, %s3979_s9  ;;  %3066 = vrot.lane.b32.xlu1 %v6113_v24, %s3979_s9  ;;  %v837_v4 = vsel %vm831_vm4, %v7950_v44, %v836_v58  ;;  %v861_v43 = vmul.f32 0.0075987587, %v5953_v8  ;;  %v808_v34 = vadd.f32 %v798_v9, %v771_v49  ;;  %v853_v39 = vmul.f32 0.036000773, %v5953_v8 }
 0x3d6   : > { %3062 = vrot.lane.b32.xlu0 %v6118_v5, %s3979_s9  ;;  %v849_v12 = vadd.f32 %v837_v4, %v828_v15  ;;  %v6166_v27 = vmul.f32 0.0010283802, %v5953_v8  ;;  %v6169_v0 = vmul.f32 0.109360695, %v6141_v47  ;;  %v6172_v48 = vmul.f32 0.21300554, %v6141_v47 }
 0x3d7   : > { %v2623_v63 = vpop.permute.xlu2 %2622  ;;  %v2579_v19 = vpop.permute.xlu1 %2578  ;;  %v6175_v10 = vadd.f32 %v813_v45, %v806_v38  ;;  %v780_v36 = vmul.f32 0.26601174, %v6141_v47  ;;  %v670_v2 = vrot.slane %v662_v28, 1  ;;  %v869_v52 = vrot.slane %v861_v43, 1  ;;  %v7953_v38 = vld [vmem:[#allocation125_spill] sm:$0xff]  ;;  %v7954_v45 = vld [vmem:[#allocation94_spill] sm:$0xff] }
 0x3d8   : > { %v6163_v3 = vadd.f32 %v2579_v19, %v5923_v29  ;;  %v2577_v53 = vpop.permute.xlu0 %2576  ;;  %7951 = vst [vmem:[#allocation21_spill] sm:$0xff] %v6169_v0  ;;  %v3096_v29 = vmul.f32 0.26601174, %v5746_v11  ;;  %v6179_v58 = vmul.f32 0.109360695, %v653_v20  ;;  %v857_v61 = vadd.f32 %v853_v39, %v849_v12  ;;  %v7955_v19 = vld [vmem:[#allocation126_spill] sm:$0xff] }
 0x3d9   : > { %v2598_v37 = vadd.f32 %v2577_v53, %v6014_v17  ;;  %v742_v8 = vmul.f32 0.21300554, %v653_v20  ;;  %v658_v49 = vmul.f32 0.0010283802, %v653_v20  ;;  %v682_v15 = vmul.f32 0.036000773, %v653_v20 }
 0x3da   : > { %7952 = vst [vmem:[#allocation26_spill] sm:$0xff] %v6179_v58  ;;  %v779_v16 = vmul.f32 0.26601174, %v653_v20  ;;  %v726_v17 = vrot.slane %v6169_v0, 3  ;;  %v6185_v54 = vadd.f32 %v7954_v45, %v7953_v38  ;;  %v6191_v28 = vadd.f32 %v819_v60, %v808_v34  ;;  %v7957_v45 = vld [vmem:[#allocation132_spill] sm:$0xff] }
 0x3db   : > { %v2638_v42 = vadd.f32 %v2617_v59, %v2598_v37  ;;  %v763_v59 = vrot.slane %v6172_v48, 4  ;;  %v800_v9 = vrot.slane %v780_v36, 5  ;;  %v821_v20 = vrot.slane %v6172_v48, 6  ;;  %v7966_v48 = vld [vmem:[#allocation90_spill] sm:$0xff] }
 0x3dc   : > { %v678_v25 = vadd.f32 %v670_v2, %v658_v49  ;;  %v725_v4 = vrot.slane %v6179_v58, 3  ;;  %v762_v43 = vrot.slane %v742_v8, 4  ;;  %v6200_v60 = vadd.f32 %v869_v52, %v857_v61 }
 0x3dd   : > { %3144 = vrot.lane.b32.xlu2 %v5957_v22, %s3981_s11  ;;  %3140 = vrot.lane.b32.xlu1 %v5960_v31, %s3981_s11  ;;  %v7956_v22 = vld [vmem:[#allocation95_spill] sm:$0xff]  ;;  %v690_v34 = vrot.slane %v682_v15, 2  ;;  %v799_v53 = vrot.slane %v779_v16, 5  ;;  %v820_v37 = vrot.slane %v742_v8, 6  ;;  %v6208_v49 = vmul.f32 0.21300554, %v5740_v35 }
 0x3de   : > { %3116 = vrot.lane.b32.xlu0 %v3096_v29, %s3980_s10  ;;  %v949_v12 = vadd.f32 %v7956_v22, %v7955_v19  ;;  %v3093_v29 = vmul.f32 0.26601174, %v5714_v30  ;;  %v7958_v19 = vld [vmem:[#allocation98_spill] sm:$0xff]  ;;  %v6214_v61 = vmul.f32 0.109360695, %v5773_v6  ;;  %v727_v8 = vsel %vm715_vm0, %v725_v4, %v726_v17  ;;  %v7962_v16 = vld [vmem:[#allocation97_spill] sm:$0xff] }
 0x3df   : > { %v2917_v39 = vpop.permute.xlu2 %2916  ;;  %v2585_v31 = vpop.permute.xlu1 %2584  ;;  %v698_v38 = vadd.f32 %v690_v34, %v678_v25  ;;  %v952_v22 = vadd.f32 %v7958_v19, %v7957_v45  ;;  %v6218_v15 = vsel %vm752_vm1, %v762_v43, %v763_v59  ;;  %v2649_v14 = vmul.f32 0.0075987587, %v2638_v42  ;;  %v7965_v19 = vld [vmem:[#allocation100_spill] sm:$0xff]  ;;  %v7969_v43 = vld [vmem:[#allocation93_spill] sm:$0xff] }
 0x3e0   : > { %v2583_v36 = vpop.permute.xlu0 %2582  ;;  %v6204_v2 = vadd.f32 %v2585_v31, %v5974_v62  ;;  %7959 = vst [vmem:[#allocation52_spill] sm:$0xff] %v6214_v61  ;;  %v7961_v62 = vld [vmem:[#allocation131_spill] sm:$0xff]  ;;  %v6225_v25 = vsel %vm789_vm2, %v799_v53, %v800_v9  ;;  %v2669_v34 = vmul.f32 0.036000773, %v2638_v42  ;;  %v6227_v45 = vmul.f32 0.109360695, %v2638_v42 }
 0x3e1   : > { %v2601_v52 = vadd.f32 %v2583_v36, %v6068_v21  ;;  %7960 = vst [vmem:[#allocation25_spill] sm:$0xff] %v6218_v15  ;;  %v6222_v31 = vadd.f32 %v7962_v16, %v7961_v62  ;;  %v7964_v36 = vld [vmem:[#allocation43_spill] sm:$0xff]  ;;  %v6232_v17 = vadd.f32 %v7966_v48, %v949_v12  ;;  %v6234_v59 = vmul.f32 0.21300554, %v2638_v42 }
 0x3e2   : > { %7963 = vst [vmem:[#allocation27_spill] sm:$0xff] %v6225_v25  ;;  %v996_v7 = vadd.f32 %v7965_v19, %v7964_v36  ;;  %v6236_v4 = vmul.f32 0.26601174, %v2638_v42  ;;  %v6241_v9 = vadd.f32 %v727_v8, %v698_v38  ;;  %v6244_v53 = vadd.f32 %v7969_v43, %v952_v22  ;;  %v7974_v8 = vld [vmem:[#allocation265_spill] sm:$0xff] }
 0x3e3   : > { %v2641_v21 = vadd.f32 %v2623_v63, %v2601_v52  ;;  %7967 = vst [vmem:[#allocation30_spill] sm:$0xff] %v6232_v17  ;;  %v6249_v63 = vsel %vm810_vm3, %v820_v37, %v821_v20  ;;  %v7972_v12 = vrot.slane %v5947_v40, 7  ;;  %v2657_v38 = vrot.slane %v2649_v14, 1 }
 0x3e4   : > { %7968 = vst [vmem:[#allocation32_spill] sm:$0xff] %v6241_v9  ;;  %v6262_v22 = vmul.f32 0.0010283802, %v7974_v8  ;;  %v3098_v20 = vmul.f32 0.26601174, %v5736_v13  ;;  %v2677_v36 = vrot.slane %v2669_v34, 2 }
 0x3e5   : > { %3110 = vrot.lane.b32.xlu2 %v3093_v29, %s3980_s10  ;;  %3070 = vrot.lane.b32.xlu1 %v6208_v49, %s3979_s9  ;;  %7970 = vst [vmem:[#allocation33_spill] sm:$0xff] %v6244_v53  ;;  %v6256_v48 = vsel %vm831_vm4, %v838_v50, %v7972_v12  ;;  %v7973_v29 = vld [vmem:[#allocation110_spill] sm:$0xff]  ;;  %v2645_v37 = vmul.f32 0.0010283802, %v2638_v42  ;;  %v3095_v50 = vmul.f32 0.26601174, %v5704_v1 }
 0x3e6   : > { %3026 = vrot.lane.b32.xlu0 %v6214_v61, %s3978_s8  ;;  %7971 = vst [vmem:[#allocation48_spill] sm:$0xff] %v6249_v63  ;;  %v6259_v52 = vadd.f32 %v7973_v29, %v996_v7  ;;  %v6271_v14 = vmul.f32 0.109360695, %v2641_v21  ;;  %v6273_v43 = vmul.f32 0.21300554, %v2641_v21  ;;  %v7977_v8 = vld [vmem:[#allocation13_spill] sm:$0xff]  ;;  %v6289_v19 = vadd.f32 %v2917_v39, %v6262_v22 }
 0x3e7   : > { %7975 = vst [vmem:[#allocation69_spill] sm:$0xff] %v6262_v22  ;;  %v6264_v62 = vpop.permute.xlu2 %2922  ;;  %v2615_v16 = vpop.permute.xlu1 %2614  ;;  %v6276_v29 = vmul.f32 0.26601174, %v2641_v21  ;;  %v2665_v44 = vadd.f32 %v2657_v38, %v2645_v37  ;;  %v6283_v40 = vmul.f32 0.036000773, %v2641_v21 }
 0x3e8   : > { %7976 = vst [vmem:[#allocation35_spill] sm:$0xff] %v6264_v62  ;;  %v2613_v33 = vpop.permute.xlu0 %2612  ;;  %v6279_v42 = vadd.f32 %v2615_v16, %v7977_v8  ;;  %v6286_v7 = vmul.f32 0.21300554, %v5773_v6  ;;  %v6296_v38 = vmul.f32 0.0075987587, %v2641_v21 }
 0x3e9   : > { %v2636_v34 = vadd.f32 %v2613_v33, %v6106_v51  ;;  %v6298_v37 = vmul.f32 0.0010283802, %v2641_v21  ;;  %v7979_v33 = vld [vmem:[#allocation19_spill] sm:$0xff]  ;;  %v2685_v32 = vadd.f32 %v2677_v36, %v2665_v44 }
 0x3ea   : > { %7978 = vst [vmem:[#allocation38_spill] sm:$0xff] %v6286_v7  ;;  %v2689_v12 = vmul.f32 0.109360695, %v6279_v42  ;;  %v2725_v47 = vmul.f32 0.21300554, %v6279_v42 }
 0x3eb   : > { %v2761_v16 = vmul.f32 0.26601174, %v6279_v42  ;;  %v2644_v63 = vmul.f32 0.0010283802, %v2636_v34  ;;  %v2648_v25 = vmul.f32 0.0075987587, %v2636_v34 }
 0x3ec   : > { %v2705_v22 = vrot.slane %v2689_v12, 3  ;;  %v2741_v61 = vrot.slane %v2725_v47, 4  ;;  %v2797_v46 = vrot.slane %v2725_v47, 6  ;;  %v2817_v51 = vrot.slane %v2689_v12, 7 }
 0x3ed   : > { %3148 = vrot.lane.b32.xlu2 %v7979_v33, %s3981_s11  ;;  %3120 = vrot.lane.b32.xlu1 %v3098_v20, %s3980_s10  ;;  %v2777_v8 = vrot.slane %v2761_v16, 5  ;;  %v2668_v33 = vmul.f32 0.036000773, %v2636_v34  ;;  %v2688_v58 = vmul.f32 0.109360695, %v2636_v34 }
 0x3ee   : > { %3114 = vrot.lane.b32.xlu0 %v3095_v50, %s3980_s10  ;;  %v2724_v0 = vmul.f32 0.21300554, %v2636_v34  ;;  %v2760_v39 = vmul.f32 0.26601174, %v2636_v34  ;;  %v2656_v50 = vrot.slane %v2648_v25, 1 }
 0x3ef   : > { %v6306_v18 = vpop.permute.xlu2 %2928  ;;  %v2621_v21 = vpop.permute.xlu1 %2620  ;;  %v2676_v16 = vrot.slane %v2668_v33, 2  ;;  %v2704_v47 = vrot.slane %v2688_v58, 3  ;;  %v2816_v12 = vrot.slane %v2688_v58, 7  ;;  %v7981_v58 = vld [vmem:[#allocation42_spill] sm:$0xff] }
 0x3f0   : > { %7980 = vst [vmem:[#allocation40_spill] sm:$0xff] %v6306_v18  ;;  %v2619_v20 = vpop.permute.xlu0 %2618  ;;  %v2640_v26 = vadd.f32 %v2621_v21, %v6082_v55  ;;  %v2740_v9 = vrot.slane %v2724_v0, 4  ;;  %v2776_v13 = vrot.slane %v2760_v39, 5  ;;  %v2796_v18 = vrot.slane %v2724_v0, 6 }
 0x3f1   : > { %v6310_v15 = vadd.f32 %v2619_v20, %v6163_v3  ;;  %v2664_v44 = vadd.f32 %v2656_v50, %v2644_v63  ;;  %v2706_v36 = vsel %vm715_vm0, %v2704_v47, %v2705_v22  ;;  %v2818_v17 = vsel %vm831_vm4, %v2816_v12, %v2817_v51  ;;  %v7982_v51 = vld [vmem:[#allocation46_spill] sm:$0xff] }
 0x3f2   : > { %v2646_v53 = vmul.f32 0.0010283802, %v2640_v26  ;;  %v2650_v62 = vmul.f32 0.0075987587, %v2640_v26  ;;  %v2742_v34 = vsel %vm752_vm1, %v2740_v9, %v2741_v61  ;;  %v2778_v55 = vsel %vm789_vm2, %v2776_v13, %v2777_v8 }
 0x3f3   : > { %v2798_v3 = vsel %vm810_vm3, %v2796_v18, %v2797_v46  ;;  %v2670_v25 = vmul.f32 0.036000773, %v2640_v26  ;;  %v2684_v0 = vadd.f32 %v2676_v16, %v2664_v44  ;;  %v2692_v39 = vmul.f32 0.109360695, %v2640_v26 }
 0x3f4   : > { %v2658_v63 = vrot.slane %v2650_v62, 1  ;;  %v2728_v22 = vmul.f32 0.21300554, %v2640_v26  ;;  %v2823_v61 = vrot.slane %v6271_v14, 7  ;;  %v2764_v13 = vmul.f32 0.26601174, %v2640_v26 }
 0x3f5   : > { %3074 = vrot.lane.b32.xlu2 %v6286_v7, %s3979_s9  ;;  %3176 = vrot.lane.b32.xlu1 %v7981_v58, %s3982_s12  ;;  %v2678_v9 = vrot.slane %v2670_v25, 2  ;;  %v2691_v18 = vmul.f32 0.109360695, %v6310_v15  ;;  %v2720_v21 = vadd.f32 %v2706_v36, %v2684_v0  ;;  %v2710_v20 = vrot.slane %v2692_v39, 3 }
 0x3f6   : > { %3172 = vrot.lane.b32.xlu0 %v7982_v51, %s3982_s12  ;;  %v2666_v33 = vadd.f32 %v2658_v63, %v2646_v53  ;;  %v2746_v50 = vrot.slane %v2728_v22, 4  ;;  %v2782_v62 = vrot.slane %v2764_v13, 5  ;;  %v2802_v47 = vrot.slane %v2728_v22, 6 }
 0x3f7   : > { %v6325_v46 = vpop.permute.xlu2 %2966  ;;  %v2627_v8 = vpop.permute.xlu1 %2626  ;;  %v2822_v12 = vrot.slane %v2692_v39, 7  ;;  %v2708_v44 = vrot.slane %v2691_v18, 3  ;;  %v2756_v58 = vadd.f32 %v2742_v34, %v2720_v21  ;;  %v7983_v7 = vrot.slane %v6271_v14, 3 }
 0x3f8   : > { %v2625_v16 = vpop.permute.xlu0 %2624  ;;  %v2686_v51 = vadd.f32 %v2678_v9, %v2666_v33  ;;  %v7984_v25 = vrot.slane %v6273_v43, 4  ;;  %v7985_v36 = vrot.slane %v6276_v29, 5  ;;  %v7986_v0 = vrot.slane %v6273_v43, 6 }
 0x3f9   : > { %v2712_v26 = vsel %vm715_vm0, %v2710_v20, %v7983_v7  ;;  %v2824_v39 = vsel %vm831_vm4, %v2822_v12, %v2823_v61  ;;  %v7987_v34 = vrot.slane %v6227_v45, 3  ;;  %v2792_v22 = vadd.f32 %v2778_v55, %v2756_v58 }
 0x3fa   : > { %v2748_v56 = vsel %vm752_vm1, %v2746_v50, %v7984_v25  ;;  %v2784_v53 = vsel %vm789_vm2, %v2782_v62, %v7985_v36  ;;  %v2804_v63 = vsel %vm810_vm3, %v2802_v47, %v7986_v0  ;;  %v2722_v7 = vadd.f32 %v2712_v26, %v2686_v51 }
 0x3fb   : > { %v2709_v14 = vsel %vm715_vm0, %v7987_v34, %v2708_v44  ;;  %v2727_v13 = vmul.f32 0.21300554, %v6310_v15  ;;  %v2836_v21 = vmul.f32 0.036000773, %v6279_v42  ;;  %v2763_v29 = vmul.f32 0.26601174, %v6310_v15 }
 0x3fc   : > { %v2721_v9 = vadd.f32 %v2709_v14, %v2685_v32  ;;  %v2820_v33 = vrot.slane %v2691_v18, 7  ;;  %v6347_v43 = vadd.f32 %v2627_v8, %v6127_v41  ;;  %v2812_v61 = vadd.f32 %v2798_v3, %v2792_v22 }
 0x3fd   : > { %3146 = vrot.lane.b32.xlu2 %v6113_v24, %s3981_s11  ;;  %3142 = vrot.lane.b32.xlu1 %v6118_v5, %s3981_s11  ;;  %v2758_v55 = vadd.f32 %v2748_v56, %v2722_v7  ;;  %v2744_v20 = vrot.slane %v2727_v13, 4  ;;  %v2800_v32 = vrot.slane %v2727_v13, 6  ;;  %v2844_v50 = vmul.f32 0.0075987587, %v6279_v42 }
 0x3fe   : > { %v2780_v62 = vrot.slane %v2763_v29, 5  ;;  %v7988_v47 = vrot.slane %v6227_v45, 7  ;;  %v2845_v41 = vmul.f32 0.0075987587, %v6310_v15  ;;  %v2832_v24 = vadd.f32 %v2818_v17, %v2812_v61 }
 0x3ff   : > { %v6358_v8 = vpop.permute.xlu2 %2972  ;;  %v2921_v12 = vpop.permute.xlu1 %2920  ;;  %v2794_v44 = vadd.f32 %v2784_v53, %v2758_v55  ;;  %v7989_v5 = vrot.slane %v6234_v59, 4  ;;  %v7990_v3 = vrot.slane %v6234_v59, 6  ;;  %v2854_v45 = vrot.slane %v6296_v38, 1 }
 0x400   : > { %v2821_v18 = vsel %vm831_vm4, %v7988_v47, %v2820_v33  ;;  %v2919_v51 = vpop.permute.xlu0 %2918  ;;  %v7991_v25 = vrot.slane %v6236_v4, 5  ;;  %v2865_v0 = vmul.f32 0.0010283802, %v6310_v15  ;;  %v2840_v17 = vadd.f32 %v2836_v21, %v2832_v24 }
 0x401   : > { %v2745_v56 = vsel %vm752_vm1, %v7989_v5, %v2744_v20  ;;  %v2801_v58 = vsel %vm810_vm3, %v7990_v3, %v2800_v32  ;;  %v2814_v53 = vadd.f32 %v2804_v63, %v2794_v44  ;;  %v2695_v34 = vmul.f32 0.109360695, %v6347_v43  ;;  %v7992_v20 = vld [vmem:[#allocation276_spill] sm:$0xff]  ;;  %v7993_v32 = vld [vmem:[#allocation15_spill] sm:$0xff] }
 0x402   : > { %v2757_v26 = vadd.f32 %v2745_v56, %v2721_v9  ;;  %v2781_v36 = vsel %vm789_vm2, %v7991_v25, %v2780_v62  ;;  %v2731_v14 = vmul.f32 0.21300554, %v6347_v43  ;;  %v2874_v59 = vrot.slane %v6298_v37, 2 }
 0x403   : > { %v6375_v22 = vmul.f32 0.0010283802, %v6279_v42  ;;  %v2767_v9 = vmul.f32 0.26601174, %v6347_v43  ;;  %v2852_v13 = vrot.slane %v2844_v50, 1  ;;  %v2834_v4 = vadd.f32 %v2824_v39, %v2814_v53 }
 0x404   : > { %v2793_v7 = vadd.f32 %v2781_v36, %v2757_v26  ;;  %v2837_v29 = vmul.f32 0.036000773, %v6310_v15  ;;  %v2853_v33 = vrot.slane %v2845_v41, 1  ;;  %v2873_v21 = vrot.slane %v2865_v0, 2  ;;  %v7994_v41 = vld [vmem:[#allocation267_spill] sm:$0xff] }
 0x405   : > { %v2714_v63 = vrot.slane %v2695_v34, 3  ;;  %v2750_v55 = vrot.slane %v2731_v14, 4  ;;  %3204 = vrot.lane.b32.xlu2 %v7992_v20, %s3983_s18  ;;  %3180 = vrot.lane.b32.xlu1 %v7993_v32, %s3982_s12  ;;  %v2842_v42 = vadd.f32 %v6283_v40, %v2834_v4  ;;  %v2806_v62 = vrot.slane %v2731_v14, 6 }
 0x406   : > { %v2813_v61 = vadd.f32 %v2801_v58, %v2793_v7  ;;  %v2642_v47 = vadd.f32 %v2625_v16, %v6204_v2  ;;  %v3097_v39 = vmul.f32 0.26601174, %v5740_v35  ;;  %v2786_v15 = vrot.slane %v2767_v9, 5 }
 0x407   : > { %v6387_v24 = vmul.f32 0.0010283802, %v7994_v41  ;;  %v6390_v44 = vmul.f32 0.0010283802, %v5714_v30  ;;  %v2979_v5 = vpop.permute.xlu2 %2978  ;;  %v6392_v56 = vpop.permute.xlu1 %2926  ;;  %v2826_v3 = vrot.slane %v2695_v34, 7  ;;  %v2860_v2 = vadd.f32 %v2852_v13, %v2840_v17 }
 0x408   : > { %v2833_v50 = vadd.f32 %v2821_v18, %v2813_v61  ;;  %v2647_v58 = vmul.f32 0.0010283802, %v2642_v47  ;;  %v2651_v26 = vmul.f32 0.0075987587, %v2642_v47  ;;  %3118 = vrot.lane.b32.xlu0 %v3097_v39, %s3980_s10  ;;  %v2925_v40 = vpop.permute.xlu0 %2924  ;;  %v2671_v25 = vmul.f32 0.036000773, %v2642_v47 }
 0x409   : > { %v2694_v18 = vmul.f32 0.109360695, %v2642_v47  ;;  %v2730_v36 = vmul.f32 0.21300554, %v2642_v47  ;;  %v2766_v53 = vmul.f32 0.26601174, %v2642_v47  ;;  %v6396_v14 = vadd.f32 %v2921_v12, %v6387_v24 }
 0x40a   : > { %v2841_v16 = vadd.f32 %v2837_v29, %v2833_v50  ;;  %v2659_v0 = vrot.slane %v2651_v26, 1  ;;  %v2941_v30 = vadd.f32 %v2919_v51, %v6390_v44  ;;  %v2679_v9 = vrot.slane %v2671_v25, 2  ;;  %v7996_v26 = vld [vmem:[#allocation136_spill] sm:$0xff] }
 0x40b   : > { %v2713_v34 = vrot.slane %v2694_v18, 3  ;;  %v2749_v4 = vrot.slane %v2730_v36, 4  ;;  %v2785_v20 = vrot.slane %v2766_v53, 5  ;;  %v2805_v32 = vrot.slane %v2730_v36, 6  ;;  %v7998_v25 = vld [vmem:[#allocation104_spill] sm:$0xff] }
 0x40c   : > { %v2861_v7 = vadd.f32 %v2853_v33, %v2841_v16  ;;  %v2667_v61 = vadd.f32 %v2659_v0, %v2647_v58  ;;  %v2825_v39 = vrot.slane %v2694_v18, 7  ;;  %v2872_v17 = vrot.slane %v6375_v22, 2  ;;  %v7997_v16 = vld [vmem:[#allocation101_spill] sm:$0xff] }
 0x40d   : > { %v2715_v29 = vsel %vm715_vm0, %v2713_v34, %v2714_v63  ;;  %v2751_v47 = vsel %vm752_vm1, %v2749_v4, %v2750_v55  ;;  %3150 = vrot.lane.b32.xlu2 %v6208_v49, %s3981_s11  ;;  %v2787_v51 = vsel %vm789_vm2, %v2785_v20, %v2786_v15  ;;  %v2807_v33 = vsel %vm810_vm3, %v2805_v32, %v2806_v62  ;;  %v8008_v34 = vld [vmem:[#allocation106_spill] sm:$0xff] }
 0x40e   : > { %v6400_v13 = vadd.f32 %v2873_v21, %v2861_v7  ;;  %v2687_v12 = vadd.f32 %v2679_v9, %v2667_v61  ;;  %v2827_v50 = vsel %vm831_vm4, %v2825_v39, %v2826_v3  ;;  %v6410_v41 = vmul.f32 0.0010283802, %v5746_v11  ;;  %v8006_v7 = vld [vmem:[#allocation103_spill] sm:$0xff]  ;;  %v8007_v9 = vld [vmem:[#allocation18_spill] sm:$0xff] }
 0x40f   : > { %v3099_v22 = vmul.f32 0.26601174, %v5773_v6  ;;  %v3017_v21 = vpop.permute.xlu2 %3016  ;;  %v2965_v58 = vpop.permute.xlu1 %2964  ;;  %v6414_v63 = vmul.f32 0.0010283802, %v5773_v6  ;;  %v6417_v55 = vadd.f32 %v6325_v46, %v2941_v30  ;;  %v2862_v11 = vadd.f32 %v2854_v45, %v2842_v42  ;;  %v8010_v61 = vld [vmem:[#allocation99_spill] sm:$0xff]  ;;  %v8011_v32 = vld [vmem:[#allocation22_spill] sm:$0xff] }
 0x410   : > { %v2723_v49 = vadd.f32 %v2715_v29, %v2687_v12  ;;  %3152 = vrot.lane.b32.xlu0 %v6110_v23, %s3981_s11  ;;  %v6422_v62 = vadd.f32 %v2965_v58, %v6289_v19  ;;  %v2931_v15 = vpop.permute.xlu0 %2930  ;;  %v6426_v3 = vadd.f32 %v2872_v17, %v2860_v2  ;;  %v955_v6 = vadd.f32 %v7997_v16, %v7996_v26  ;;  %v7999_v19 = vld [vmem:[#allocation105_spill] sm:$0xff]  ;;  %v8001_v2 = vld [vmem:[#allocation107_spill] sm:$0xff]  ;;  %v8014_v29 = vld [vmem:[#allocation30_spill] sm:$0xff] }
 0x411   : > { %v998_v46 = vadd.f32 %v7998_v25, %v6185_v54  ;;  %v2944_v18 = vadd.f32 %v2925_v40, %v6410_v41  ;;  %3122 = vrot.lane.b32.xlu1 %v3099_v22, %s3980_s10  ;;  %v2947_v23 = vadd.f32 %v2931_v15, %v6414_v63  ;;  %v1092_v36 = vadd.f32 %v7999_v19, %v6259_v52  ;;  %v8002_v52 = vld [vmem:[#allocation128_spill] sm:$0xff]  ;;  %v8013_v39 = vld [vmem:[#allocation35_spill] sm:$0xff]  ;;  %v8017_v58 = vld [vmem:[#allocation118_spill] sm:$0xff] }
 0x412   : > { %7995 = vst [vmem:[#allocation45_spill] sm:$0xff] %v6426_v3  ;;  %v6438_v38 = vmul.f32 0.0010283802, %v5704_v1  ;;  %v2759_v45 = vadd.f32 %v2751_v47, %v2723_v49  ;;  %v6442_v42 = vadd.f32 %v2874_v59, %v2862_v11  ;;  %v1001_v54 = vadd.f32 %v8001_v2, %v6222_v31  ;;  %v8015_v47 = vld [vmem:[#allocation109_spill] sm:$0xff]  ;;  %v8018_v15 = vld [vmem:[#allocation102_spill] sm:$0xff]  ;;  %v8022_v2 = vld [vmem:[#allocation119_spill] sm:$0xff] }
 0x413   : > { %v6447_v40 = vadd.f32 %v6358_v8, %v2944_v18  ;;  %v6449_v0 = vadd.f32 %v2979_v5, %v2947_v23  ;;  %v6453_v53 = vadd.f32 %v6137_v57, %v6175_v10  ;;  %v1140_v1 = vadd.f32 %v8002_v52, %v1092_v36  ;;  %v8005_v8 = vld [vmem:[#allocation24_spill] sm:$0xff]  ;;  %v8019_v18 = vld [vmem:[#allocation37_spill] sm:$0xff] }
 0x414   : > { %8000 = vst [vmem:[#allocation50_spill] sm:$0xff] %v6442_v42  ;;  %v2795_v30 = vadd.f32 %v2787_v51, %v2759_v45  ;;  %v6458_v37 = vadd.f32 %v6256_v48, %v6191_v28  ;;  %v8003_v59 = vrot.slane %v6166_v27, 2  ;;  %v999_v5 = vadd.f32 %v8006_v7, %v8005_v8  ;;  %v8009_v57 = vld [vmem:[#allocation96_spill] sm:$0xff]  ;;  %v8012_v28 = vld [vmem:[#allocation142_spill] sm:$0xff]  ;;  %v8016_v51 = vld [vmem:[#allocation113_spill] sm:$0xff] }
 0x415   : > { %v1002_v4 = vadd.f32 %v8008_v34, %v8007_v9  ;;  %v1003_v10 = vadd.f32 %v8009_v57, %v955_v6  ;;  %v1046_v20 = vadd.f32 %v8010_v61, %v998_v46  ;;  %3184 = vrot.lane.b32.xlu2 %v8011_v32, %s3982_s12  ;;  %v1172_v48 = vadd.f32 %v8012_v28, %v1140_v1  ;;  %v8020_v19 = vld [vmem:[#allocation33_spill] sm:$0xff]  ;;  %v8021_v36 = vld [vmem:[#allocation112_spill] sm:$0xff]  ;;  %v8023_v1 = vld [vmem:[#allocation135_spill] sm:$0xff] }
 0x416   : > { %v6463_v31 = vadd.f32 %v8003_v59, %v6200_v60  ;;  %v2943_v27 = vadd.f32 %v8013_v39, %v6438_v38  ;;  %v2847_v60 = vmul.f32 0.0075987587, %v6347_v43  ;;  %v2815_v17 = vadd.f32 %v2807_v33, %v2795_v30  ;;  %v8024_v30 = vld [vmem:[#allocation56_spill] sm:$0xff]  ;;  %v8026_v8 = vld [vmem:[#allocation271_spill] sm:$0xff] }
 0x417   : > { %v1045_v12 = vadd.f32 %v8015_v47, %v8014_v29  ;;  %v1047_v22 = vadd.f32 %v8016_v51, %v999_v5  ;;  %v1094_v49 = vadd.f32 %v8017_v58, %v1046_v20  ;;  %v1049_v11 = vadd.f32 %v8018_v15, %v1001_v54  ;;  %v3065_v26 = vpop.permute.xlu2 %3064  ;;  %v2971_v16 = vpop.permute.xlu1 %2970  ;;  %v8027_v34 = vld [vmem:[#allocation115_spill] sm:$0xff]  ;;  %v8028_v61 = vld [vmem:[#allocation108_spill] sm:$0xff]  ;;  %v8032_v51 = vld [vmem:[#allocation114_spill] sm:$0xff] }
 0x418   : > { %8004 = vst [vmem:[#allocation59_spill] sm:$0xff] %v6463_v31  ;;  %v2839_v6 = vmul.f32 0.036000773, %v6347_v43  ;;  %v2867_v25 = vmul.f32 0.0010283802, %v6347_v43  ;;  %v2835_v46 = vadd.f32 %v2827_v50, %v2815_v17  ;;  %3208 = vrot.lane.b32.xlu0 %v8019_v18, %s3983_s18  ;;  %v6486_v33 = vadd.f32 %v2971_v16, %v2943_v27  ;;  %v2969_v23 = vpop.permute.xlu0 %2968  ;;  %v8025_v43 = vld [vmem:[#allocation137_spill] sm:$0xff] }
 0x419   : > { %v1048_v45 = vadd.f32 %v8021_v36, %v8020_v19  ;;  %v1093_v52 = vadd.f32 %v8022_v2, %v1045_v12  ;;  %v1142_v54 = vadd.f32 %v8023_v1, %v1094_v49  ;;  %3178 = vrot.lane.b32.xlu1 %v8024_v30, %s3982_s12  ;;  %v2990_v59 = vadd.f32 %v2969_v23, %v6396_v14  ;;  %v8029_v39 = vld [vmem:[#allocation116_spill] sm:$0xff]  ;;  %v8040_v18 = vld [vmem:[#allocation129_spill] sm:$0xff]  ;;  %v8041_v19 = vld [vmem:[#allocation150_spill] sm:$0xff] }
 0x41a   : > { %v1204_v50 = vadd.f32 %v8025_v43, %v1172_v48  ;;  %v6497_v7 = vmul.f32 0.0010283802, %v8026_v8  ;;  %v2855_v5 = vrot.slane %v2847_v60, 1  ;;  %v2843_v9 = vadd.f32 %v2839_v6, %v2835_v46  ;;  %v8030_v17 = vld [vmem:[#allocation156_spill] sm:$0xff]  ;;  %v8031_v48 = vld [vmem:[#allocation122_spill] sm:$0xff]  ;;  %v8033_v60 = vld [vmem:[#allocation127_spill] sm:$0xff] }
 0x41b   : > { %v1051_v57 = vadd.f32 %v8027_v34, %v1003_v10  ;;  %v1095_v20 = vadd.f32 %v8028_v61, %v1047_v22  ;;  %v6502_v32 = vmul.f32 0.0010283802, %v5740_v35  ;;  %v3038_v28 = vadd.f32 %v3017_v21, %v2990_v59  ;;  %v8034_v10 = vld [vmem:[#allocation269_spill] sm:$0xff]  ;;  %v8035_v35 = vld [vmem:[#allocation134_spill] sm:$0xff]  ;;  %v8039_v46 = vld [vmem:[#allocation123_spill] sm:$0xff] }
 0x41c   : > { %v1050_v27 = vadd.f32 %v8029_v39, %v1002_v4  ;;  %v1236_v29 = vadd.f32 %v8030_v17, %v1204_v50  ;;  %v2875_v14 = vrot.slane %v2867_v25, 2  ;;  %v2863_v47 = vadd.f32 %v2855_v5, %v2843_v9  ;;  %v8036_v21 = vld [vmem:[#allocation166_spill] sm:$0xff]  ;;  %v8037_v4 = vld [vmem:[#allocation40_spill] sm:$0xff]  ;;  %v8044_v59 = vld [vmem:[#allocation139_spill] sm:$0xff] }
 0x41d   : > { %v1097_v12 = vadd.f32 %v8031_v48, %v1049_v11  ;;  %v1141_v58 = vadd.f32 %v8032_v51, %v1093_v52  ;;  %v1174_v49 = vadd.f32 %v8033_v60, %v1142_v54  ;;  %3240 = vrot.lane.b32.xlu2 %v8034_v10, %s3984_s15  ;;  %v6511_v22 = vadd.f32 %v3065_v26, %v3038_v28  ;;  %v8042_v1 = vld [vmem:[#allocation32_spill] sm:$0xff]  ;;  %v8043_v54 = vld [vmem:[#allocation25_spill] sm:$0xff]  ;;  %v8055_v60 = vld [vmem:[#allocation26_spill] sm:$0xff] }
 0x41e   : > { %v1143_v15 = vadd.f32 %v8035_v35, %v1095_v20  ;;  %v1268_v16 = vadd.f32 %v8036_v21, %v1236_v29  ;;  %v2946_v6 = vadd.f32 %v8037_v4, %v6497_v7  ;;  %v6517_v25 = vadd.f32 %v2875_v14, %v2863_v47  ;;  %v8045_v50 = vld [vmem:[#allocation145_spill] sm:$0xff]  ;;  %v8046_v5 = vld [vmem:[#allocation12_spill] sm:$0xff]  ;;  %v8049_v20 = vld [vmem:[#allocation266_spill] sm:$0xff] }
 0x41f   : > { %v1096_v11 = vadd.f32 %v8039_v46, %v1048_v45  ;;  %v1099_v23 = vadd.f32 %v8040_v18, %v1051_v57  ;;  %v1206_v36 = vadd.f32 %v8041_v19, %v1174_v49  ;;  %v2945_v2 = vadd.f32 %v6392_v56, %v6502_v32  ;;  %v6524_v26 = vpop.permute.xlu2 %3068  ;;  %v2977_v52 = vpop.permute.xlu1 %2976  ;;  %v8047_v34 = vld [vmem:[#allocation141_spill] sm:$0xff]  ;;  %v8048_v61 = vld [vmem:[#allocation160_spill] sm:$0xff]  ;;  %v8051_v29 = vld [vmem:[#allocation111_spill] sm:$0xff] }
 0x420   : > { %8038 = vst [vmem:[#allocation80_spill] sm:$0xff] %v6517_v25  ;;  %v772_v30 = vadd.f32 %v8043_v54, %v8042_v1  ;;  %v1145_v43 = vadd.f32 %v8044_v59, %v1097_v12  ;;  %v1175_v8 = vadd.f32 %v8045_v50, %v1143_v15  ;;  %3174 = vrot.lane.b32.xlu0 %v8046_v5, %s3982_s12  ;;  %v2975_v9 = vpop.permute.xlu0 %2974  ;;  %v8050_v39 = vld [vmem:[#allocation29_spill] sm:$0xff]  ;;  %v8056_v49 = vrot.slane %v8055_v60, 7  ;;  %v8061_v46 = vld [vmem:[#allocation151_spill] sm:$0xff]  ;;  %v8063_v19 = vld [vmem:[#allocation138_spill] sm:$0xff] }
 0x421   : > { %v6532_v45 = vadd.f32 %v2977_v52, %v2946_v6  ;;  %v1173_v57 = vadd.f32 %v8047_v34, %v1141_v58  ;;  %v1238_v56 = vadd.f32 %v8048_v61, %v1206_v36  ;;  %3236 = vrot.lane.b32.xlu1 %v8049_v20, %s3984_s15  ;;  %v2993_v28 = vadd.f32 %v2975_v9, %v2945_v2  ;;  %v8052_v47 = vld [vmem:[#allocation161_spill] sm:$0xff]  ;;  %v8058_v58 = vld [vmem:[#allocation47_spill] sm:$0xff]  ;;  %v8065_v1 = vld [vmem:[#allocation140_spill] sm:$0xff] }
 0x422   : > { %v856_v17 = vadd.f32 %v8050_v39, %v6453_v53  ;;  %v1098_v14 = vadd.f32 %v8051_v29, %v1050_v27  ;;  %v1308_v48 = vadd.f32 %v8052_v47, %v1268_v16  ;;  %v8053_v12 = vld [vmem:[#allocation21_spill] sm:$0xff]  ;;  %v858_v35 = vadd.f32 %v8058_v58, %v6458_v37  ;;  %v8062_v16 = vld [vmem:[#allocation27_spill] sm:$0xff]  ;;  %v8066_v59 = vld [vmem:[#allocation144_spill] sm:$0xff] }
 0x423   : > { %v8054_v51 = vrot.slane %v8053_v12, 7  ;;  %v8059_v15 = vld [vmem:[#allocation117_spill] sm:$0xff]  ;;  %v1205_v53 = vadd.f32 %v8061_v46, %v1173_v57  ;;  %v6556_v27 = vmul.f32 %v6463_v31, %v6463_v31  ;;  %v809_v18 = vadd.f32 %v8062_v16, %v772_v30  ;;  %v8067_v50 = vld [vmem:[#allocation147_spill] sm:$0xff]  ;;  %v8072_v20 = vld [vmem:[#allocation148_spill] sm:$0xff] }
 0x424   : > { %v1144_v21 = vadd.f32 %v8059_v15, %v1096_v11  ;;  %v8060_v4 = vld [vmem:[#allocation121_spill] sm:$0xff]  ;;  %v1146_v36 = vadd.f32 %v8063_v19, %v1098_v14  ;;  %v1207_v54 = vadd.f32 %v8065_v1, %v1175_v8  ;;  %v8068_v5 = vld [vmem:[#allocation155_spill] sm:$0xff]  ;;  %v1320_v47 = vmul.f32 0.0075987587, %v1308_v48  ;;  %v8075_v8 = vld [vmem:[#allocation154_spill] sm:$0xff] }
 0x425   : > { %v6547_v10 = vsel %vm831_vm4, %v8056_v49, %v8054_v51  ;;  %v1147_v6 = vadd.f32 %v8060_v4, %v1099_v23  ;;  %v8064_v2 = vld [vmem:[#allocation133_spill] sm:$0xff]  ;;  %v1270_v23 = vadd.f32 %v8068_v5, %v1238_v56  ;;  %v8069_v9 = vld [vmem:[#allocation275_spill] sm:$0xff]  ;;  %v8077_v49 = vld [vmem:[#allocation146_spill] sm:$0xff]  ;;  %v6593_v5 = vmul.f32 0.21300554, %v1308_v48 }
 0x426   : > { %8057 = vst [vmem:[#allocation53_spill] sm:$0xff] %v6547_v10  ;;  %v1177_v52 = vadd.f32 %v8064_v2, %v1145_v43  ;;  %v1176_v37 = vadd.f32 %v8066_v59, %v1144_v21  ;;  %3206 = vrot.lane.b32.xlu2 %v8069_v9, %s3983_s18  ;;  %v8070_v34 = vld [vmem:[#allocation9_spill] sm:$0xff]  ;;  %v1178_v30 = vadd.f32 %v8072_v20, %v1146_v36  ;;  %v8074_v14 = vld [vmem:[#allocation159_spill] sm:$0xff]  ;;  %v8078_v56 = vld [vmem:[#allocation174_spill] sm:$0xff]  ;;  %v6588_v59 = vmul.f32 0.109360695, %v1308_v48 }
 0x427   : > { %v1179_v11 = vadd.f32 %v8067_v50, %v1147_v6  ;;  %v8071_v57 = vrot.slane %v8070_v34, 1  ;;  %v8073_v39 = vld [vmem:[#allocation153_spill] sm:$0xff]  ;;  %v1239_v43 = vadd.f32 %v8074_v14, %v1207_v54  ;;  %v1237_v58 = vadd.f32 %v8077_v49, %v1205_v53  ;;  %v3023_v21 = vpop.permute.xlu2 %3022  ;;  %v3015_v4 = vpop.permute.xlu1 %3014  ;;  %v8079_v6 = vld [vmem:[#allocation163_spill] sm:$0xff]  ;;  %v8089_v14 = vld [vmem:[#allocation48_spill] sm:$0xff] }
 0x428   : > { %v1209_v29 = vadd.f32 %v8073_v39, %v1177_v52  ;;  %v1208_v12 = vadd.f32 %v8075_v8, %v1176_v37  ;;  %v8076_v51 = vld [vmem:[#allocation157_spill] sm:$0xff]  ;;  %v6576_v15 = vadd.f32 %v8078_v56, %v1270_v23  ;;  %v6582_v36 = vadd.f32 %v3023_v21, %v2993_v28  ;;  %v3013_v52 = vpop.permute.xlu0 %3012  ;;  %v8083_v37 = vld [vmem:[#allocation16_spill] sm:$0xff]  ;;  %v8087_v34 = vld [vmem:[#allocation143_spill] sm:$0xff] }
 0x429   : > { %v876_v61 = vadd.f32 %v8071_v57, %v856_v17  ;;  %v1211_v60 = vadd.f32 %v8076_v51, %v1179_v11  ;;  %v8080_v46 = vld [vmem:[#allocation169_spill] sm:$0xff]  ;;  %v6585_v2 = vadd.f32 %v3015_v4, %v6417_v55  ;;  %v1340_v54 = vmul.f32 0.036000773, %v1308_v48  ;;  %3182 = vrot.lane.b32.xlu1 %v8083_v37, %s3982_s12  ;;  %v8084_v28 = vld [vmem:[#allocation20_spill] sm:$0xff]  ;;  %v8088_v39 = vld [vmem:[#allocation175_spill] sm:$0xff] }
 0x42a   : > { %v1241_v17 = vadd.f32 %v8079_v6, %v1209_v29  ;;  %v1271_v16 = vadd.f32 %v8080_v46, %v1239_v43  ;;  %v8081_v19 = vld [vmem:[#allocation41_spill] sm:$0xff]  ;;  %v3036_v50 = vadd.f32 %v3013_v52, %v6422_v62  ;;  %v1328_v11 = vrot.slane %v1320_v47, 1  ;;  %v8092_v51 = vld [vmem:[#allocation164_spill] sm:$0xff] }
 0x42b   : > { %3212 = vrot.lane.b32.xlu0 %v8081_v19, %s3983_s18  ;;  %v8082_v1 = vld [vmem:[#allocation165_spill] sm:$0xff]  ;;  %v6595_v23 = vmul.f32 0.26601174, %v1308_v48  ;;  %v8085_v9 = vrot.slane %v8084_v28, 1  ;;  %v1210_v57 = vadd.f32 %v8087_v34, %v1178_v30  ;;  %v1321_v20 = vmul.f32 0.0075987587, %v6576_v15 }
 0x42c   : > { %v1269_v53 = vadd.f32 %v8082_v1, %v1237_v58  ;;  %v6607_v43 = vadd.f32 %v8089_v14, %v809_v18  ;;  %v1316_v62 = vmul.f32 0.0010283802, %v1308_v48  ;;  %v8091_v47 = vld [vmem:[#allocation149_spill] sm:$0xff]  ;;  %v1311_v49 = vadd.f32 %v8092_v51, %v1271_v16  ;;  %v8093_v58 = vld [vmem:[#allocation10_spill] sm:$0xff]  ;;  %v8097_v6 = vld [vmem:[#allocation152_spill] sm:$0xff] }
 0x42d   : > { %v6599_v55 = vadd.f32 %v8085_v9, %v858_v35  ;;  %v1240_v8 = vadd.f32 %v8091_v47, %v1208_v12  ;;  %v8094_v56 = vrot.slane %v8093_v58, 2  ;;  %v8096_v35 = vld [vmem:[#allocation162_spill] sm:$0xff]  ;;  %v1348_v30 = vrot.slane %v1340_v54, 2  ;;  %v8102_v51 = vld [vmem:[#allocation36_spill] sm:$0xff] }
 0x42e   : > { %v6604_v29 = vadd.f32 %v8088_v39, %v1269_v53  ;;  %8090 = vst [vmem:[#allocation31_spill] sm:$0xff] %v6607_v43  ;;  %v1242_v4 = vadd.f32 %v8096_v35, %v1210_v57  ;;  %v6617_v46 = vadd.f32 %v8097_v6, %v1211_v60  ;;  %v8098_v19 = vld [vmem:[#allocation158_spill] sm:$0xff]  ;;  %v1336_v48 = vadd.f32 %v1328_v11, %v1316_v62  ;;  %v8100_v53 = vld [vmem:[#allocation172_spill] sm:$0xff] }
 0x42f   : > { %8086 = vst [vmem:[#allocation28_spill] sm:$0xff] %v6599_v55  ;;  %v6613_v21 = vadd.f32 %v8094_v56, %v876_v61  ;;  %v6620_v52 = vadd.f32 %v8098_v19, %v1241_v17  ;;  %v8099_v18 = vld [vmem:[#allocation274_spill] sm:$0xff]  ;;  %v1376_v12 = vrot.slane %v6588_v59, 3  ;;  %v1329_v37 = vrot.slane %v1321_v20, 1  ;;  %v3073_v17 = vpop.permute.xlu2 %3072  ;;  %v3061_v28 = vpop.permute.xlu1 %3060  ;;  %v8103_v35 = vld [vmem:[#allocation168_spill] sm:$0xff]  ;;  %v8104_v19 = vld [vmem:[#allocation167_spill] sm:$0xff] }
 0x430   : > { %3244 = vrot.lane.b32.xlu2 %v8099_v18, %s3984_s15  ;;  %v1274_v54 = vadd.f32 %v8100_v53, %v1242_v4  ;;  %v6630_v60 = vmul.f32 0.109360695, %v6604_v29  ;;  %v6633_v34 = vmul.f32 0.109360695, %v1311_v49  ;;  %v6635_v11 = vmul.f32 0.21300554, %v1311_v49  ;;  %v3021_v14 = vpop.permute.xlu0 %3020 }
 0x431   : > { %8095 = vst [vmem:[#allocation34_spill] sm:$0xff] %v6613_v21  ;;  %v8101_v57 = vld [vmem:[#allocation38_spill] sm:$0xff]  ;;  %v6639_v39 = vadd.f32 %v3061_v28, %v3036_v50  ;;  %v6641_v62 = vmul.f32 0.26601174, %v1311_v49  ;;  %v1317_v20 = vmul.f32 0.0010283802, %v6576_v15  ;;  %3216 = vrot.lane.b32.xlu1 %v8102_v51, %s3983_s18  ;;  %v3040_v58 = vadd.f32 %v3021_v14, %v6447_v40 }
 0x432   : > { %v1341_v47 = vmul.f32 0.036000773, %v6576_v15  ;;  %v1356_v56 = vadd.f32 %v1348_v30, %v1336_v48  ;;  %v6649_v4 = vadd.f32 %v8103_v35, %v1240_v8  ;;  %v6651_v6 = vmul.f32 0.0075987587, %v1311_v49 }
 0x433   : > { %3154 = vrot.lane.b32.xlu0 %v8101_v57, %s3981_s11  ;;  %v6654_v50 = vmul.f32 0.109360695, %v6576_v15  ;;  %v1314_v18 = vadd.f32 %v8104_v19, %v1274_v54  ;;  %v1337_v53 = vadd.f32 %v1329_v37, %v1317_v20  ;;  %v1377_v28 = vrot.slane %v6630_v60, 3  ;;  %v8105_v37 = vld [vmem:[#allocation52_spill] sm:$0xff] }
 0x434   : > { %v6659_v57 = vadd.f32 %v6524_v26, %v3040_v58  ;;  %v1380_v51 = vrot.slane %v6633_v34, 3  ;;  %v1416_v40 = vrot.slane %v6635_v11, 4  ;;  %v6663_v30 = vmul.f32 0.036000773, %v1311_v49  ;;  %v8106_v20 = vld [vmem:[#allocation8_spill] sm:$0xff] }
 0x435   : > { %v6665_v8 = vmul.f32 0.0010283802, %v1311_v49  ;;  %v1349_v35 = vrot.slane %v1341_v47, 2  ;;  %v6670_v54 = vmul.f32 0.21300554, %v6604_v29  ;;  %v1379_v58 = vrot.slane %v6654_v50, 3 }
 0x436   : > { %v6678_v49 = vmul.f32 0.21300554, %v6576_v15  ;;  %v1323_v19 = vmul.f32 0.0075987587, %v1314_v18  ;;  %v1343_v9 = vmul.f32 0.036000773, %v1314_v18  ;;  %v1378_v47 = vsel %vm715_vm0, %v1376_v12, %v1377_v28 }
 0x437   : > { %v1357_v1 = vadd.f32 %v1349_v35, %v1337_v53  ;;  %v3145_v14 = vpop.permute.xlu2 %3144  ;;  %v3025_v48 = vpop.permute.xlu1 %3024  ;;  %v6681_v61 = vmul.f32 0.109360695, %v1314_v18  ;;  %v6683_v16 = vmul.f32 0.21300554, %v1314_v18  ;;  %v1434_v31 = vmul.f32 0.26601174, %v6576_v15 }
 0x438   : > { %3186 = vrot.lane.b32.xlu2 %v8105_v37, %s3982_s12  ;;  %v6685_v37 = vmul.f32 0.26601174, %v1314_v18  ;;  %v3042_v26 = vadd.f32 %v3025_v48, %v6532_v45  ;;  %v3019_v25 = vpop.permute.xlu0 %3018  ;;  %v1413_v53 = vrot.slane %v6670_v54, 4  ;;  %v1433_v12 = vmul.f32 0.26601174, %v6604_v29  ;;  %v8107_v15 = vld [vmem:[#allocation209_spill] sm:$0xff] }
 0x439   : > { %3280 = vrot.lane.b32.xlu1 %v6387_v24, %s3985_s19  ;;  %v6696_v28 = vadd.f32 %v3019_v25, %v6486_v33  ;;  %v1381_v35 = vsel %vm715_vm0, %v1379_v58, %v1380_v51  ;;  %v1415_v42 = vrot.slane %v6678_v49, 4  ;;  %v8108_v48 = vld [vmem:[#allocation170_spill] sm:$0xff]  ;;  %v1331_v3 = vrot.slane %v1323_v19, 1  ;;  %v8109_v24 = vld [vmem:[#allocation171_spill] sm:$0xff] }
 0x43a   : > { %v6700_v10 = vadd.f32 %v3073_v17, %v3042_v26  ;;  %v6705_v43 = vadd.f32 %v8108_v48, %v8107_v15  ;;  %v1393_v21 = vadd.f32 %v1381_v35, %v1357_v1  ;;  %v1275_v55 = vadd.f32 %v8109_v24, %v6617_v46  ;;  %v8111_v15 = vld [vmem:[#allocation268_spill] sm:$0xff] }
 0x43b   : > { %3210 = vrot.lane.b32.xlu0 %v8106_v20, %s3983_s18  ;;  %v1392_v20 = vadd.f32 %v1378_v47, %v1356_v56  ;;  %v1319_v33 = vmul.f32 0.0010283802, %v1314_v18  ;;  %v1351_v25 = vrot.slane %v1343_v9, 2  ;;  %v8110_v56 = vrot.slane %v6593_v5, 4  ;;  %v8140_v1 = vld [vmem:[#allocation208_spill] sm:$0xff] }
 0x43c   : > { %v1449_v47 = vrot.slane %v1433_v12, 5  ;;  %v1417_v46 = vsel %vm752_vm1, %v1415_v42, %v1416_v40  ;;  %v1451_v18 = vrot.slane %v1434_v31, 5  ;;  %v1471_v24 = vrot.slane %v6678_v49, 6  ;;  %v8114_v49 = vld [vmem:[#allocation177_spill] sm:$0xff] }
 0x43d   : > { %v1414_v26 = vsel %vm752_vm1, %v8110_v56, %v1413_v53  ;;  %v1339_v19 = vadd.f32 %v1331_v3, %v1319_v33  ;;  %v1429_v48 = vadd.f32 %v1417_v46, %v1393_v21  ;;  %v1491_v53 = vrot.slane %v6654_v50, 7 }
 0x43e   : > { %v1428_v9 = vadd.f32 %v1414_v26, %v1392_v20  ;;  %v1469_v12 = vrot.slane %v6670_v54, 6  ;;  %v1489_v56 = vrot.slane %v6630_v60, 7  ;;  %v8113_v3 = vrot.slane %v6595_v23, 5  ;;  %v8115_v54 = vld [vmem:[#allocation270_spill] sm:$0xff] }
 0x43f   : > { %v3111_v17 = vpop.permute.xlu2 %3110  ;;  %v3113_v45 = vpop.permute.xlu1 %3112  ;;  %v6731_v40 = vmul.f32 0.0075987587, %v6604_v29  ;;  %v1313_v50 = vadd.f32 %v8114_v49, %v6620_v52  ;;  %v8116_v20 = vrot.slane %v6641_v62, 5  ;;  %v6744_v23 = vmul.f32 0.0010283802, %v6604_v29  ;;  %v8119_v52 = vld [vmem:[#allocation173_spill] sm:$0xff] }
 0x440   : > { %3242 = vrot.lane.b32.xlu2 %v8111_v15, %s3984_s15  ;;  %v8112_v15 = vld [vmem:[#allocation69_spill] sm:$0xff]  ;;  %v3134_v42 = vadd.f32 %v3113_v45, %v6511_v22  ;;  %v3109_v31 = vpop.permute.xlu0 %3108  ;;  %v1450_v21 = vsel %vm789_vm2, %v8113_v3, %v1449_v47  ;;  %v6748_v26 = vadd.f32 %v1351_v25, %v1339_v19  ;;  %v8118_v47 = vld [vmem:[#allocation214_spill] sm:$0xff]  ;;  %v8120_v3 = vld [vmem:[#allocation216_spill] sm:$0xff]  ;;  %v8122_v62 = vrot.slane %v6635_v11, 6 }
 0x441   : > { %3238 = vrot.lane.b32.xlu1 %v8115_v54, %s3984_s15  ;;  %v6738_v60 = vadd.f32 %v3109_v31, %v6639_v39  ;;  %v1453_v22 = vsel %vm789_vm2, %v1451_v18, %v8116_v20  ;;  %v1464_v45 = vadd.f32 %v1450_v21, %v1428_v9  ;;  %8117 = vst [vmem:[#allocation39_spill] sm:$0xff] %v6744_v23  ;;  %v8121_v39 = vld [vmem:[#allocation184_spill] sm:$0xff]  ;;  %v8123_v9 = vrot.slane %v6633_v34, 7 }
 0x442   : > { %v6746_v33 = vadd.f32 %v3145_v14, %v3134_v42  ;;  %v6752_v46 = vadd.f32 %v8119_v52, %v8118_v47  ;;  %v1614_v31 = vadd.f32 %v8121_v39, %v8120_v3  ;;  %v1473_v18 = vsel %vm810_vm3, %v1471_v24, %v8122_v62  ;;  %v8126_v24 = vld [vmem:[#allocation178_spill] sm:$0xff]  ;;  %v8129_v20 = vld [vmem:[#allocation176_spill] sm:$0xff] }
 0x443   : > { %3276 = vrot.lane.b32.xlu0 %v8112_v15, %s3985_s19  ;;  %v1465_v15 = vadd.f32 %v1453_v22, %v1429_v48  ;;  %v6762_v21 = vsel %vm831_vm4, %v1491_v53, %v8123_v9  ;;  %v8124_v14 = vrot.slane %v6593_v5, 6  ;;  %v1508_v19 = vmul.f32 0.036000773, %v6604_v29  ;;  %v8127_v53 = vld [vmem:[#allocation11_spill] sm:$0xff]  ;;  %v8130_v47 = vld [vmem:[#allocation210_spill] sm:$0xff]  ;;  %v8131_v52 = vld [vmem:[#allocation180_spill] sm:$0xff] }
 0x444   : > { %v8125_v48 = vrot.slane %v6588_v59, 7  ;;  %v6772_v11 = vmul.f32 0.109360695, %v1313_v50  ;;  %v1312_v34 = vadd.f32 %v8126_v24, %v6649_v4  ;;  %v6783_v59 = vmul.f32 0.21300554, %v1313_v50  ;;  %v8132_v4 = vld [vmem:[#allocation179_spill] sm:$0xff] }
 0x445   : > { %v1470_v25 = vsel %vm810_vm3, %v8124_v14, %v1469_v12  ;;  %v8128_v12 = vld [vmem:[#allocation220_spill] sm:$0xff]  ;;  %v6787_v22 = vmul.f32 0.26601174, %v1313_v50  ;;  %v1612_v3 = vadd.f32 %v8131_v52, %v8130_v47  ;;  %v1662_v39 = vadd.f32 %v8132_v4, %v1614_v31  ;;  %v8135_v24 = vld [vmem:[#allocation14_spill] sm:$0xff] }
 0x446   : > { %v1490_v42 = vsel %vm831_vm4, %v8125_v48, %v1489_v56  ;;  %v1484_v54 = vadd.f32 %v1470_v25, %v1464_v45  ;;  %v6781_v29 = vadd.f32 %v8129_v20, %v8128_v12  ;;  %v6785_v56 = vadd.f32 %v1473_v18, %v1465_v15  ;;  %v8134_v25 = vld [vmem:[#allocation181_spill] sm:$0xff]  ;;  %v8136_v31 = vld [vmem:[#allocation198_spill] sm:$0xff] }
 0x447   : > { %v3149_v62 = vpop.permute.xlu2 %3148  ;;  %v3067_v9 = vpop.permute.xlu1 %3066  ;;  %v6792_v45 = vmul.f32 0.036000773, %v1313_v50  ;;  %v6794_v14 = vmul.f32 0.0075987587, %v1313_v50  ;;  %v6797_v48 = vadd.f32 %v8134_v25, %v1275_v55  ;;  %v1322_v12 = vmul.f32 0.0075987587, %v1312_v34 }
 0x448   : > { %3218 = vrot.lane.b32.xlu2 %v8127_v53, %s3983_s18  ;;  %v6802_v15 = vadd.f32 %v3067_v9, %v6696_v28  ;;  %v3063_v18 = vpop.permute.xlu0 %3062  ;;  %v1383_v53 = vrot.slane %v6772_v11, 3  ;;  %v1710_v20 = vadd.f32 %v8136_v31, %v1662_v39  ;;  %v1504_v52 = vadd.f32 %v1490_v42, %v1484_v54  ;;  %v8138_v25 = vld [vmem:[#allocation215_spill] sm:$0xff]  ;;  %v8141_v42 = vld [vmem:[#allocation193_spill] sm:$0xff]  ;;  %v8144_v31 = vld [vmem:[#allocation188_spill] sm:$0xff] }
 0x449   : > { %8133 = vst [vmem:[#allocation44_spill] sm:$0xff] %v6794_v14  ;;  %3284 = vrot.lane.b32.xlu1 %v6410_v41, %s3985_s19  ;;  %v3085_v47 = vadd.f32 %v3063_v18, %v6585_v2  ;;  %v1419_v55 = vrot.slane %v6783_v59, 4  ;;  %v6810_v4 = vmul.f32 0.0010283802, %v1313_v50  ;;  %v1342_v9 = vmul.f32 0.036000773, %v1312_v34 }
 0x44a   : > { %v6814_v35 = vmul.f32 0.109360695, %v1312_v34  ;;  %v1758_v5 = vadd.f32 %v8140_v1, %v1710_v20  ;;  %v1455_v39 = vrot.slane %v6787_v22, 5  ;;  %v1400_v41 = vmul.f32 0.21300554, %v1312_v34  ;;  %v8142_v22 = vld [vmem:[#allocation190_spill] sm:$0xff] }
 0x44b   : > { %3214 = vrot.lane.b32.xlu0 %v8135_v24, %s3983_s18  ;;  %8137 = vst [vmem:[#allocation55_spill] sm:$0xff] %v6810_v4  ;;  %v8139_v24 = vld [vmem:[#allocation183_spill] sm:$0xff]  ;;  %v6817_v58 = vadd.f32 %v3111_v17, %v3085_v47  ;;  %v6821_v2 = vmul.f32 0.109360695, %v6797_v48  ;;  %v1475_v50 = vrot.slane %v6783_v59, 6  ;;  %v1512_v17 = vadd.f32 %v1508_v19, %v1504_v52 }
 0x44c   : > { %v1615_v28 = vadd.f32 %v8139_v24, %v8138_v25  ;;  %v1330_v25 = vrot.slane %v1322_v12, 1  ;;  %v1318_v1 = vmul.f32 0.0010283802, %v1312_v34  ;;  %v1436_v20 = vmul.f32 0.26601174, %v1312_v34  ;;  %v8149_v4 = vld [vmem:[#allocation207_spill] sm:$0xff] }
 0x44d   : > { %v1660_v47 = vadd.f32 %v8142_v22, %v1612_v3  ;;  %v1350_v51 = vrot.slane %v1342_v9, 2  ;;  %v1418_v23 = vrot.slane %v1400_v41, 4  ;;  %v1386_v12 = vrot.slane %v6821_v2, 3  ;;  %v8146_v9 = vld [vmem:[#allocation230_spill] sm:$0xff] }
 0x44e   : > { %v1663_v54 = vadd.f32 %v8141_v42, %v1615_v28  ;;  %v1382_v28 = vrot.slane %v6814_v35, 3  ;;  %v8143_v42 = vld [vmem:[#allocation203_spill] sm:$0xff]  ;;  %v1338_v3 = vadd.f32 %v1330_v25, %v1318_v1  ;;  %v1474_v52 = vrot.slane %v1400_v41, 6  ;;  %v8150_v25 = vld [vmem:[#allocation240_spill] sm:$0xff] }
 0x44f   : > { %v1806_v59 = vadd.f32 %v8143_v42, %v1758_v5  ;;  %v3075_v49 = vpop.permute.xlu2 %3074  ;;  %v3141_v18 = vpop.permute.xlu1 %3140  ;;  %v8147_v42 = vrot.slane %v6731_v40, 1  ;;  %v1494_v41 = vrot.slane %v6814_v35, 7  ;;  %v6859_v40 = vmul.f32 0.21300554, %v6797_v48  ;;  %v8195_v35 = vld [vmem:[#allocation200_spill] sm:$0xff] }
 0x450   : > { %3282 = vrot.lane.b32.xlu2 %v6438_v38, %s3985_s19  ;;  %v1711_v14 = vadd.f32 %v8144_v31, %v1663_v54  ;;  %v8145_v38 = vld [vmem:[#allocation272_spill] sm:$0xff]  ;;  %v6838_v19 = vadd.f32 %v3141_v18, %v6738_v60  ;;  %v3117_v34 = vpop.permute.xlu0 %3116  ;;  %v1454_v54 = vrot.slane %v1436_v20, 5  ;;  %v8148_v31 = vld [vmem:[#allocation185_spill] sm:$0xff]  ;;  %v1384_v18 = vsel %vm715_vm0, %v1382_v28, %v1383_v53 }
 0x451   : > { %v1838_v22 = vadd.f32 %v8146_v9, %v1806_v59  ;;  %3278 = vrot.lane.b32.xlu1 %v6390_v44, %s3985_s19  ;;  %v3136_v5 = vadd.f32 %v3117_v34, %v6659_v57  ;;  %v6846_v24 = vadd.f32 %v8147_v42, %v1512_v17  ;;  %v8151_v44 = vrot.slane %v6681_v61, 3  ;;  %v8152_v17 = vld [vmem:[#allocation204_spill] sm:$0xff]  ;;  %v8155_v9 = vld [vmem:[#allocation222_spill] sm:$0xff] }
 0x452   : > { %v1759_v60 = vadd.f32 %v8149_v4, %v1711_v14  ;;  %v1358_v14 = vadd.f32 %v1350_v51, %v1338_v3  ;;  %v1420_v53 = vsel %vm752_vm1, %v1418_v23, %v1419_v55  ;;  %v6865_v4 = vsel %vm810_vm3, %v1474_v52, %v1475_v50  ;;  %v8157_v42 = vld [vmem:[#allocation192_spill] sm:$0xff]  ;;  %v8158_v51 = vld [vmem:[#allocation219_spill] sm:$0xff] }
 0x453   : > { %3248 = vrot.lane.b32.xlu0 %v8145_v38, %s3984_s15  ;;  %v1708_v38 = vadd.f32 %v8148_v31, %v1660_v47  ;;  %v1870_v1 = vadd.f32 %v8150_v25, %v1838_v22  ;;  %v6853_v59 = vadd.f32 %v3149_v62, %v3136_v5  ;;  %v1387_v57 = vsel %vm715_vm0, %v8151_v44, %v1386_v12  ;;  %v8153_v47 = vld [vmem:[#allocation225_spill] sm:$0xff]  ;;  %v8156_v22 = vld [vmem:[#allocation187_spill] sm:$0xff] }
 0x454   : > { %v1807_v34 = vadd.f32 %v8153_v47, %v1759_v60  ;;  %v8154_v62 = vld [vmem:[#allocation189_spill] sm:$0xff]  ;;  %v1456_v12 = vsel %vm789_vm2, %v1454_v54, %v1455_v39  ;;  %v1617_v5 = vadd.f32 %v8156_v22, %v8155_v9  ;;  %v1664_v31 = vadd.f32 %v8157_v42, %v6752_v46  ;;  %v8159_v50 = vld [vmem:[#allocation199_spill] sm:$0xff]  ;;  %v8161_v54 = vld [vmem:[#allocation202_spill] sm:$0xff] }
 0x455   : > { %v1756_v20 = vadd.f32 %v8152_v17, %v1708_v38  ;;  %v1661_v28 = vadd.f32 %v8154_v62, %v6705_v43  ;;  %v1395_v23 = vadd.f32 %v1387_v57, %v6748_v26  ;;  %v6879_v55 = vmul.f32 0.26601174, %v6797_v48  ;;  %v8160_v52 = vld [vmem:[#allocation235_spill] sm:$0xff]  ;;  %v8162_v44 = vld [vmem:[#allocation217_spill] sm:$0xff]  ;;  %v8165_v62 = vld [vmem:[#allocation186_spill] sm:$0xff] }
 0x456   : > { %v1902_v38 = vadd.f32 %v8160_v52, %v1870_v1  ;;  %v1422_v39 = vrot.slane %v6859_v40, 4  ;;  %v1712_v25 = vadd.f32 %v8161_v54, %v1664_v31  ;;  %v1839_v17 = vadd.f32 %v8162_v44, %v1807_v34  ;;  %v8163_v46 = vld [vmem:[#allocation273_spill] sm:$0xff]  ;;  %v8166_v1 = vld [vmem:[#allocation254_spill] sm:$0xff]  ;;  %v8171_v54 = vld [vmem:[#allocation196_spill] sm:$0xff] }
 0x457   : > { %v1804_v3 = vadd.f32 %v8158_v51, %v1756_v20  ;;  %v1709_v43 = vadd.f32 %v8159_v50, %v1661_v28  ;;  %v3071_v60 = vpop.permute.xlu1 %3070  ;;  %v1394_v20 = vadd.f32 %v1384_v18, %v1358_v14  ;;  %v8164_v47 = vld [vmem:[#allocation221_spill] sm:$0xff]  ;;  %v8168_v31 = vld [vmem:[#allocation182_spill] sm:$0xff]  ;;  %v8169_v50 = vld [vmem:[#allocation211_spill] sm:$0xff] }
 0x458   : > { %3286 = vrot.lane.b32.xlu2 %v6502_v32, %s3985_s19  ;;  %v3147_v32 = vpop.permute.xlu2 %3146  ;;  %v6889_v26 = vadd.f32 %v3071_v60, %v6582_v36  ;;  %v3027_v57 = vpop.permute.xlu0 %3026  ;;  %v1618_v28 = vadd.f32 %v8165_v62, %v8164_v47  ;;  %v1934_v9 = vadd.f32 %v8166_v1, %v1902_v38  ;;  %v8167_v22 = vld [vmem:[#allocation277_spill] sm:$0xff]  ;;  %v1665_v51 = vadd.f32 %v8168_v31, %v1617_v5  ;;  %v8170_v36 = vld [vmem:[#allocation239_spill] sm:$0xff]  ;;  %v8172_v14 = vld [vmem:[#allocation194_spill] sm:$0xff] }
 0x459   : > { %3250 = vrot.lane.b32.xlu1 %v8167_v22, %s3984_s15  ;;  %v3043_v42 = vadd.f32 %v3027_v57, %v6449_v0  ;;  %v1836_v52 = vadd.f32 %v8169_v50, %v1804_v3  ;;  %v1871_v60 = vadd.f32 %v8170_v36, %v1839_v17  ;;  %v1757_v44 = vadd.f32 %v8172_v14, %v1709_v43  ;;  %v8174_v0 = vld [vmem:[#allocation197_spill] sm:$0xff]  ;;  %v8175_v1 = vld [vmem:[#allocation236_spill] sm:$0xff]  ;;  %v8178_v36 = vld [vmem:[#allocation218_spill] sm:$0xff] }
 0x45a   : > { %v1666_v18 = vadd.f32 %v8171_v54, %v1618_v28  ;;  %v1760_v57 = vadd.f32 %v8174_v0, %v1712_v25  ;;  %v8176_v5 = vld [vmem:[#allocation249_spill] sm:$0xff]  ;;  %v1430_v3 = vadd.f32 %v1420_v53, %v1394_v20  ;;  %v8181_v14 = vld [vmem:[#allocation224_spill] sm:$0xff]  ;;  %v8183_v0 = vld [vmem:[#allocation191_spill] sm:$0xff] }
 0x45b   : > { %3246 = vrot.lane.b32.xlu0 %v8163_v46, %s3984_s15  ;;  %v8173_v46 = vld [vmem:[#allocation262_spill] sm:$0xff]  ;;  %v6906_v38 = vadd.f32 %v3075_v49, %v3043_v42  ;;  %v1868_v22 = vadd.f32 %v8175_v1, %v1836_v52  ;;  %v1903_v31 = vadd.f32 %v8176_v5, %v1871_v60  ;;  %v8177_v50 = vld [vmem:[#allocation201_spill] sm:$0xff]  ;;  %v1805_v43 = vadd.f32 %v8178_v36, %v1757_v44  ;;  %v8180_v42 = vld [vmem:[#allocation195_spill] sm:$0xff] }
 0x45c   : > { %v6904_v47 = vadd.f32 %v8173_v46, %v1934_v9  ;;  %v1713_v28 = vadd.f32 %v8177_v50, %v1665_v51  ;;  %v8179_v9 = vrot.slane %v6683_v16, 4  ;;  %v1667_v54 = vadd.f32 %v8180_v42, %v6781_v29  ;;  %v8182_v46 = vld [vmem:[#allocation246_spill] sm:$0xff]  ;;  %v8184_v53 = vld [vmem:[#allocation213_spill] sm:$0xff]  ;;  %v8185_v1 = vld [vmem:[#allocation231_spill] sm:$0xff] }
 0x45d   : > { %v1808_v25 = vadd.f32 %v8181_v14, %v1760_v57  ;;  %v1900_v52 = vadd.f32 %v8182_v46, %v1868_v22  ;;  %v1714_v60 = vadd.f32 %v8183_v0, %v1666_v18  ;;  %v1837_v5 = vadd.f32 %v8185_v1, %v1805_v43  ;;  %v8186_v36 = vld [vmem:[#allocation205_spill] sm:$0xff]  ;;  %v8188_v34 = vld [vmem:[#allocation244_spill] sm:$0xff] }
 0x45e   : > { %v1423_v49 = vsel %vm752_vm1, %v8179_v9, %v1422_v39  ;;  %v1761_v20 = vadd.f32 %v8184_v53, %v1713_v28  ;;  %v1985_v51 = vmul.f32 0.0075987587, %v6904_v47  ;;  %v1715_v62 = vadd.f32 %v8186_v36, %v1667_v54  ;;  %v8187_v39 = vld [vmem:[#allocation234_spill] sm:$0xff]  ;;  %v8191_v14 = vld [vmem:[#allocation241_spill] sm:$0xff]  ;;  %v8196_v0 = vld [vmem:[#allocation228_spill] sm:$0xff] }
 0x45f   : > { %v3121_v50 = vpop.permute.xlu1 %3120  ;;  %v1840_v9 = vadd.f32 %v8187_v39, %v1808_v25  ;;  %v1935_v29 = vadd.f32 %v8188_v34, %v1903_v31  ;;  %v1466_v22 = vadd.f32 %v1456_v12, %v1430_v3  ;;  %v6934_v28 = vadd.f32 %v1423_v49, %v1395_v23  ;;  %v8190_v34 = vld [vmem:[#allocation212_spill] sm:$0xff]  ;;  %v8192_v25 = vld [vmem:[#allocation261_spill] sm:$0xff]  ;;  %v8193_v23 = vld [vmem:[#allocation206_spill] sm:$0xff] }
 0x460   : > { %v3205_v44 = vpop.permute.xlu2 %3204  ;;  %v6932_v57 = vadd.f32 %v3121_v50, %v6700_v10  ;;  %v3115_v18 = vpop.permute.xlu0 %3114  ;;  %v8189_v42 = vrot.slane %v6772_v11, 7  ;;  %v1762_v31 = vadd.f32 %v8190_v34, %v1714_v60  ;;  %v1505_v12 = vadd.f32 %v6762_v21, %v6785_v56  ;;  %v8197_v60 = vld [vmem:[#allocation229_spill] sm:$0xff]  ;;  %v8204_v34 = vld [vmem:[#allocation255_spill] sm:$0xff] }
 0x461   : > { %v3135_v43 = vadd.f32 %v3115_v18, %v6802_v15  ;;  %v6947_v10 = vadd.f32 %v8192_v25, %v1935_v29  ;;  %v1809_v3 = vadd.f32 %v8193_v23, %v1761_v20  ;;  %v8194_v15 = vld [vmem:[#allocation226_spill] sm:$0xff]  ;;  %v1993_v11 = vrot.slane %v1985_v51, 1  ;;  %v8199_v36 = vld [vmem:[#allocation233_spill] sm:$0xff]  ;;  %v8202_v51 = vld [vmem:[#allocation248_spill] sm:$0xff] }
 0x462   : > { %v6942_v54 = vsel %vm831_vm4, %v1494_v41, %v8189_v42  ;;  %v1869_v49 = vadd.f32 %v8194_v15, %v1837_v5  ;;  %v1763_v41 = vadd.f32 %v8195_v35, %v1715_v62  ;;  %v1810_v53 = vadd.f32 %v8196_v0, %v1762_v31  ;;  %v8200_v29 = vld [vmem:[#allocation245_spill] sm:$0xff]  ;;  %v8201_v5 = vld [vmem:[#allocation227_spill] sm:$0xff] }
 0x463   : > { %3288 = vrot.lane.b32.xlu0 %v6497_v7, %s3985_s19  ;;  %v1932_v7 = vadd.f32 %v8191_v14, %v1900_v52  ;;  %v6953_v46 = vadd.f32 %v3147_v32, %v3135_v43  ;;  %v1872_v1 = vadd.f32 %v8197_v60, %v1840_v9  ;;  %v8198_v52 = vld [vmem:[#allocation259_spill] sm:$0xff]  ;;  %v1841_v39 = vadd.f32 %v8199_v36, %v1809_v3  ;;  %v8205_v3 = vld [vmem:[#allocation237_spill] sm:$0xff] }
 0x464   : > { %v1901_v21 = vadd.f32 %v8200_v29, %v1869_v49  ;;  %v1981_v56 = vmul.f32 0.0010283802, %v6904_v47  ;;  %v2005_v20 = vmul.f32 0.036000773, %v6904_v47  ;;  %v1811_v32 = vadd.f32 %v8201_v5, %v1763_v41  ;;  %v8203_v43 = vld [vmem:[#allocation243_spill] sm:$0xff]  ;;  %v8206_v49 = vld [vmem:[#allocation258_spill] sm:$0xff] }
 0x465   : > { %v6959_v50 = vadd.f32 %v8198_v52, %v1932_v7  ;;  %v1904_v18 = vadd.f32 %v8202_v51, %v1872_v1  ;;  %v6968_v62 = vmul.f32 0.109360695, %v6947_v10  ;;  %v6971_v9 = vmul.f32 0.109360695, %v6904_v47  ;;  %v8213_v51 = vld [vmem:[#allocation253_spill] sm:$0xff] }
 0x466   : > { %v1873_v42 = vadd.f32 %v8203_v43, %v1841_v39  ;;  %v1933_v31 = vadd.f32 %v8204_v34, %v1901_v21  ;;  %v2001_v14 = vadd.f32 %v1993_v11, %v1981_v56  ;;  %v6978_v23 = vadd.f32 %v6865_v4, %v1466_v22  ;;  %v8207_v11 = vld [vmem:[#allocation223_spill] sm:$0xff]  ;;  %v8209_v56 = vld [vmem:[#allocation238_spill] sm:$0xff]  ;;  %v8214_v34 = vld [vmem:[#allocation257_spill] sm:$0xff] }
 0x467   : > { %v3177_v25 = vpop.permute.xlu1 %3176  ;;  %v1843_v15 = vadd.f32 %v8205_v3, %v1811_v32  ;;  %v1936_v35 = vadd.f32 %v8206_v49, %v1904_v18  ;;  %v1984_v41 = vmul.f32 0.0075987587, %v6959_v50  ;;  %v1842_v1 = vadd.f32 %v8207_v11, %v1810_v53  ;;  %v8215_v11 = vld [vmem:[#allocation264_spill] sm:$0xff] }
 0x468   : > { %v6975_v7 = vpop.permute.xlu2 %3150  ;;  %v6986_v0 = vadd.f32 %v3177_v25, %v6746_v33  ;;  %v3173_v60 = vpop.permute.xlu0 %3172  ;;  %v2013_v52 = vrot.slane %v2005_v20, 2  ;;  %v1513_v4 = vadd.f32 %v6663_v30, %v1505_v12  ;;  %v2044_v22 = vrot.slane %v6968_v62, 3  ;;  %v8208_v33 = vld [vmem:[#allocation250_spill] sm:$0xff]  ;;  %v8212_v12 = vld [vmem:[#allocation232_spill] sm:$0xff] }
 0x469   : > { %v3196_v36 = vadd.f32 %v3173_v60, %v6838_v19  ;;  %v6993_v39 = vmul.f32 0.21300554, %v6947_v10  ;;  %v2043_v29 = vrot.slane %v6971_v9, 3  ;;  %v7000_v21 = vadd.f32 %v8208_v33, %v1933_v31  ;;  %v8211_v19 = vld [vmem:[#allocation242_spill] sm:$0xff] }
 0x46a   : > { %v1905_v53 = vadd.f32 %v8209_v56, %v1873_v42  ;;  %v2021_v20 = vadd.f32 %v2013_v52, %v2001_v14  ;;  %v1874_v30 = vadd.f32 %v8211_v19, %v1842_v1  ;;  %v1875_v32 = vadd.f32 %v8212_v12, %v1843_v15  ;;  %v8218_v56 = vld [vmem:[#allocation251_spill] sm:$0xff]  ;;  %v8219_v19 = vld [vmem:[#allocation252_spill] sm:$0xff] }
 0x46b   : > { %3290 = vrot.lane.b32.xlu0 %v6414_v63, %s3985_s19  ;;  %v6997_v63 = vmul.f32 0.21300554, %v6904_v47  ;;  %v7003_v5 = vadd.f32 %v3205_v44, %v3196_v36  ;;  %v7008_v18 = vadd.f32 %v8213_v51, %v1936_v35  ;;  %v1992_v43 = vrot.slane %v1984_v41, 1 }
 0x46c   : > { %v1937_v25 = vadd.f32 %v8214_v34, %v1905_v53  ;;  %v1980_v3 = vmul.f32 0.0010283802, %v6959_v50  ;;  %v2004_v31 = vmul.f32 0.036000773, %v6959_v50  ;;  %v2099_v49 = vmul.f32 0.26601174, %v6947_v10 }
 0x46d   : > { %8210 = vst [vmem:[#allocation75_spill] sm:$0xff] %v7003_v5  ;;  %v2080_v42 = vrot.slane %v6993_v39, 4  ;;  %v2045_v44 = vsel %vm715_vm0, %v2043_v29, %v2044_v22  ;;  %v2079_v14 = vrot.slane %v6997_v63, 4  ;;  %v2098_v15 = vmul.f32 0.26601174, %v6904_v47 }
 0x46e   : > { %v7019_v35 = vmul.f32 0.109360695, %v7000_v21  ;;  %v7022_v41 = vmul.f32 0.109360695, %v6959_v50  ;;  %v2057_v60 = vadd.f32 %v2045_v44, %v2021_v20  ;;  %v7025_v1 = vadd.f32 %v8215_v11, %v1937_v25 }
 0x46f   : > { %v3143_v36 = vpop.permute.xlu1 %3142  ;;  %v7030_v33 = vmul.f32 0.21300554, %v7000_v21  ;;  %v1986_v22 = vmul.f32 0.0075987587, %v7008_v18  ;;  %v2000_v29 = vadd.f32 %v1992_v43, %v1980_v3  ;;  %v1907_v53 = vadd.f32 %v8218_v56, %v1875_v32 }
 0x470   : > { %v7027_v52 = vpop.permute.xlu2 %3184  ;;  %v7034_v47 = vadd.f32 %v3143_v36, %v6817_v58  ;;  %v1906_v12 = vadd.f32 %v8219_v19, %v1874_v30  ;;  %v2097_v20 = vmul.f32 0.26601174, %v7000_v21  ;;  %v8220_v51 = vrot.slane %v6651_v6, 1 }
 0x471   : > { %8216 = vst [vmem:[#allocation51_spill] sm:$0xff] %v7027_v52  ;;  %v2012_v25 = vrot.slane %v2004_v31, 2  ;;  %v2116_v44 = vrot.slane %v2099_v49, 5  ;;  %v2081_v11 = vsel %vm752_vm1, %v2079_v14, %v2080_v42  ;;  %v2115_v17 = vrot.slane %v2098_v15, 5  ;;  %v8221_v14 = vld [vmem:[#allocation247_spill] sm:$0xff] }
 0x472   : > { %8217 = vst [vmem:[#allocation54_spill] sm:$0xff] %v7034_v47  ;;  %v1533_v34 = vadd.f32 %v8220_v51, %v1513_v4  ;;  %v2040_v52 = vrot.slane %v7022_v41, 3  ;;  %v7044_v43 = vmul.f32 0.21300554, %v6959_v50  ;;  %v2093_v58 = vadd.f32 %v2081_v11, %v2057_v60 }
 0x473   : > { %v7047_v32 = vmul.f32 0.109360695, %v7025_v1  ;;  %v2041_v30 = vrot.slane %v7019_v35, 3  ;;  %v2077_v3 = vrot.slane %v7030_v33, 4  ;;  %v1994_v6 = vrot.slane %v1986_v22, 1 }
 0x474   : > { %v2020_v4 = vadd.f32 %v2012_v25, %v2000_v29  ;;  %v1982_v31 = vmul.f32 0.0010283802, %v7008_v18  ;;  %v2006_v49 = vmul.f32 0.036000773, %v7008_v18  ;;  %v7054_v42 = vmul.f32 0.109360695, %v7008_v18 }
 0x475   : > { %v1938_v15 = vadd.f32 %v8221_v14, %v1906_v12  ;;  %v2096_v60 = vmul.f32 0.26601174, %v6959_v50  ;;  %v2136_v36 = vrot.slane %v6993_v39, 6  ;;  %v2117_v56 = vsel %vm789_vm2, %v2115_v17, %v2116_v44 }
 0x476   : > { %v2135_v19 = vrot.slane %v6997_v63, 6  ;;  %v2042_v22 = vsel %vm715_vm0, %v2040_v52, %v2041_v30  ;;  %v2076_v29 = vrot.slane %v7044_v43, 4  ;;  %v2129_v51 = vadd.f32 %v2117_v56, %v2093_v58  ;;  %v8223_v52 = vld [vmem:[#allocation263_spill] sm:$0xff] }
 0x477   : > { %v2047_v25 = vrot.slane %v7047_v32, 3  ;;  %v3181_v47 = vpop.permute.xlu1 %3180  ;;  %v2002_v5 = vadd.f32 %v1994_v6, %v1982_v31  ;;  %v7067_v12 = vmul.f32 0.21300554, %v7008_v18  ;;  %v2056_v50 = vadd.f32 %v2042_v22, %v2020_v4 }
 0x478   : > { %v7064_v11 = vpop.permute.xlu2 %3240  ;;  %v7070_v39 = vadd.f32 %v3181_v47, %v6853_v59  ;;  %v2014_v17 = vrot.slane %v2006_v49, 2  ;;  %v2046_v63 = vrot.slane %v7054_v42, 3  ;;  %v7074_v44 = vadd.f32 %v8223_v52, %v1938_v15 }
 0x479   : > { %v7077_v58 = vmul.f32 0.21300554, %v7025_v1  ;;  %v2112_v30 = vrot.slane %v2096_v60, 5  ;;  %v2156_v14 = vrot.slane %v6968_v62, 7  ;;  %v2137_v6 = vsel %vm810_vm3, %v2135_v19, %v2136_v36  ;;  %v8224_v19 = vld [vmem:[#allocation260_spill] sm:$0xff] }
 0x47a   : > { %8222 = vst [vmem:[#allocation49_spill] sm:$0xff] %v7070_v39  ;;  %v2155_v31 = vrot.slane %v6971_v9, 7  ;;  %v3119_v4 = vpop.permute.xlu0 %3118  ;;  %v2078_v59 = vsel %vm752_vm1, %v2076_v29, %v2077_v3  ;;  %v2149_v47 = vadd.f32 %v2137_v6, %v2129_v51  ;;  %v2048_v49 = vsel %vm715_vm0, %v2046_v63, %v2047_v25 }
 0x47b   : > { %v3137_v56 = vadd.f32 %v3119_v4, %v6889_v26  ;;  %v2113_v15 = vrot.slane %v2097_v20, 5  ;;  %v2022_v22 = vadd.f32 %v2014_v17, %v2002_v5  ;;  %v2100_v52 = vmul.f32 0.26601174, %v7008_v18 }
 0x47c   : > { %v2092_v39 = vadd.f32 %v2078_v59, %v2056_v50  ;;  %v1987_v60 = vmul.f32 0.0075987587, %v7074_v44  ;;  %v2083_v62 = vrot.slane %v7077_v58, 4  ;;  %v2101_v36 = vmul.f32 0.26601174, %v7025_v1 }
 0x47d   : > { %v7090_v9 = vadd.f32 %v6975_v7, %v3137_v56  ;;  %v2132_v3 = vrot.slane %v7044_v43, 6  ;;  %v1939_v29 = vadd.f32 %v8224_v19, %v1907_v53  ;;  %v2157_v26 = vsel %vm831_vm4, %v2155_v31, %v2156_v14 }
 0x47e   : > { %v2058_v20 = vadd.f32 %v2048_v49, %v2022_v22  ;;  %v2082_v5 = vrot.slane %v7067_v12, 4  ;;  %v2114_v18 = vsel %vm789_vm2, %v2112_v30, %v2113_v15  ;;  %v2169_v51 = vadd.f32 %v2157_v26, %v2149_v47  ;;  %v8226_v47 = vld [vmem:[#allocation256_spill] sm:$0xff] }
 0x47f   : > { %v8225_v50 = vrot.slane %v6665_v8, 2  ;;  %v2133_v7 = vrot.slane %v7030_v33, 6  ;;  %v2118_v63 = vrot.slane %v2100_v52, 5  ;;  %v2128_v43 = vadd.f32 %v2114_v18, %v2092_v39 }
 0x480   : > { %v7097_v25 = vpop.permute.xlu2 %3206  ;;  %v2173_v53 = vmul.f32 0.036000773, %v6947_v10  ;;  %v2181_v14 = vmul.f32 0.0075987587, %v6947_v10  ;;  %v1995_v6 = vrot.slane %v1987_v60, 1  ;;  %v2084_v31 = vsel %vm752_vm1, %v2082_v5, %v2083_v62 }
 0x481   : > { %v7101_v17 = vadd.f32 %v8225_v50, %v1533_v34  ;;  %v2119_v4 = vrot.slane %v2101_v36, 5  ;;  %v2134_v30 = vsel %vm810_vm3, %v2132_v3, %v2133_v7  ;;  %v2152_v59 = vrot.slane %v7022_v41, 7 }
 0x482   : > { %v7110_v8 = vadd.f32 %v8226_v47, %v1939_v29  ;;  %v2094_v34 = vadd.f32 %v2084_v31, %v2058_v20  ;;  %v3153_v49 = vpop.permute.xlu0 %3152  ;;  %v2177_v33 = vadd.f32 %v2173_v53, %v2169_v51  ;;  %v1983_v39 = vmul.f32 0.0010283802, %v7074_v44 }
 0x483   : > { %v2007_v56 = vmul.f32 0.036000773, %v7074_v44  ;;  %v7115_v15 = vadd.f32 %v3153_v49, %v6932_v57  ;;  %v3123_v22 = vpop.permute.xlu1 %3122  ;;  %v2148_v52 = vadd.f32 %v2134_v30, %v2128_v43  ;;  %v2201_v60 = vmul.f32 0.0010283802, %v6947_v10 }
 0x484   : > { %v7119_v62 = vmul.f32 0.109360695, %v7074_v44  ;;  %v7122_v41 = vadd.f32 %v3123_v22, %v6906_v38  ;;  %v2189_v36 = vrot.slane %v2181_v14, 1  ;;  %v2003_v3 = vadd.f32 %v1995_v6, %v1983_v39 }
 0x485   : > { %v2120_v19 = vsel %vm789_vm2, %v2118_v63, %v2119_v4  ;;  %v2139_v29 = vrot.slane %v7077_v58, 6  ;;  %v2153_v26 = vrot.slane %v7019_v35, 7  ;;  %v7128_v57 = vmul.f32 0.109360695, %v7110_v8 }
 0x486   : > { %v2130_v20 = vadd.f32 %v2120_v19, %v2094_v34  ;;  %v1506_v10 = vadd.f32 %v6942_v54, %v6978_v23  ;;  %v2138_v5 = vrot.slane %v7067_v12, 6  ;;  %v2015_v18 = vrot.slane %v2007_v56, 2 }
 0x487   : > { %v2197_v51 = vadd.f32 %v2189_v36, %v2177_v33  ;;  %v3555_v50 = vmul.f32 %v7101_v17, %v7101_v17  ;;  %v2154_v58 = vsel %vm831_vm4, %v2152_v59, %v2153_v26  ;;  %v2209_v7 = vrot.slane %v2201_v60, 2 }
 0x488   : > { %v2049_v35 = vrot.slane %v7119_v62, 3  ;;  %v7140_v63 = vmul.f32 0.21300554, %v7074_v44  ;;  %v2168_v43 = vadd.f32 %v2154_v58, %v2148_v52  ;;  %v2023_v53 = vadd.f32 %v2015_v18, %v2003_v3 }
 0x489   : > { %v2140_v54 = vsel %vm810_vm3, %v2138_v5, %v2139_v29  ;;  %v2159_v23 = vrot.slane %v7047_v32, 7  ;;  %v2172_v12 = vmul.f32 0.036000773, %v7000_v21  ;;  %v2050_v14 = vrot.slane %v7128_v57, 3 }
 0x48a   : > { %v7133_v38 = vpop.permute.xlu2 %3244  ;;  %v7147_v6 = vmul.f32 0.21300554, %v7110_v8  ;;  %v2150_v31 = vadd.f32 %v2140_v54, %v2130_v20  ;;  %v3209_v4 = vpop.permute.xlu0 %3208  ;;  %v2180_v30 = vmul.f32 0.0075987587, %v7000_v21  ;;  %v2158_v59 = vrot.slane %v7054_v42, 7 }
 0x48b   : > { %v7152_v47 = vadd.f32 %v3209_v4, %v6986_v0  ;;  %v7154_v34 = vpop.permute.xlu1 %3178  ;;  %v2217_v49 = vadd.f32 %v2209_v7, %v2197_v51  ;;  %v8227_v32 = vrot.slane %v6879_v55, 5  ;;  %v8228_v33 = vrot.slane %v6685_v37, 5 }
 0x48c   : > { %v2051_v56 = vsel %vm715_vm0, %v2049_v35, %v2050_v14  ;;  %v2085_v22 = vrot.slane %v7140_v63, 4  ;;  %v2102_v52 = vmul.f32 0.26601174, %v7074_v44  ;;  %v2176_v42 = vadd.f32 %v2172_v12, %v2168_v43 }
 0x48d   : > { %v1459_v39 = vsel %vm789_vm2, %v8228_v33, %v8227_v32  ;;  %v2059_v0 = vadd.f32 %v2051_v56, %v2023_v53  ;;  %v2160_v60 = vsel %vm831_vm4, %v2158_v59, %v2159_v23  ;;  %v3567_v36 = vsub.f32 %v6400_v13, %v3555_v50 }
 0x48e   : > { %v2086_v55 = vrot.slane %v7147_v6, 4  ;;  %v2103_v37 = vmul.f32 0.26601174, %v7110_v8  ;;  %v2170_v3 = vadd.f32 %v2160_v60, %v2150_v31  ;;  %v1514_v19 = vadd.f32 %v6792_v45, %v1506_v10  ;;  %v8229_v45 = vld [vmem:[#allocation39_spill] sm:$0xff]  ;;  %v8233_v31 = vld [vmem:[#allocation44_spill] sm:$0xff] }
 0x48f   : > { %v1467_v29 = vadd.f32 %v1459_v39, %v6934_v28  ;;  %v2188_v44 = vrot.slane %v2180_v30, 1  ;;  %v2200_v26 = vmul.f32 0.0010283802, %v7000_v21  ;;  %v3563_v5 = vsub.f32 %v2217_v49, %v6556_v27 }
 0x490   : > { %v2087_v13 = vsel %vm752_vm1, %v2085_v22, %v2086_v55  ;;  %v2121_v18 = vrot.slane %v2102_v52, 5  ;;  %v2174_v51 = vmul.f32 0.036000773, %v7025_v1  ;;  %v2182_v58 = vmul.f32 0.0075987587, %v7025_v1 }
 0x491   : > { %v2095_v7 = vadd.f32 %v2087_v13, %v2059_v0  ;;  %v8230_v10 = vrot.slane %v8229_v45, 2  ;;  %v2196_v28 = vadd.f32 %v2188_v44, %v2176_v42  ;;  %v3584_v21 = vadd.f32 %v3567_v36, %v3563_v5  ;;  %v8235_v36 = vld [vmem:[#allocation55_spill] sm:$0xff] }
 0x492   : > { %v7175_v20 = vpop.permute.xlu2 %3186  ;;  %v2122_v43 = vrot.slane %v2103_v37, 5  ;;  %v2178_v53 = vadd.f32 %v2174_v51, %v2170_v3  ;;  %v7186_v54 = vpop.permute.xlu0 %3174  ;;  %v8231_v23 = vrot.slane %v6859_v40, 6  ;;  %v8232_v12 = vrot.slane %v6683_v16, 6  ;;  %v8237_v37 = vld [vmem:[#allocation28_spill] sm:$0xff] }
 0x493   : > { %v7184_v35 = vadd.f32 %v8230_v10, %v6846_v24  ;;  %v8234_v4 = vrot.slane %v8233_v31, 1  ;;  %v2208_v59 = vrot.slane %v2200_v26, 2  ;;  %v2141_v24 = vrot.slane %v7140_v63, 6  ;;  %v7196_v49 = vpop.permute.xlu1 %3236  ;;  %v8241_v26 = vld [vmem:[#allocation45_spill] sm:$0xff]  ;;  %v8244_v31 = vld [vmem:[#allocation31_spill] sm:$0xff] }
 0x494   : > { %v1479_v14 = vsel %vm810_vm3, %v8232_v12, %v8231_v23  ;;  %v3605_v33 = vadd.f32 %v3555_v50, %v6556_v27  ;;  %v2123_v39 = vsel %vm789_vm2, %v2121_v18, %v2122_v43  ;;  %v2190_v56 = vrot.slane %v2182_v58, 1 }
 0x495   : > { %v1534_v30 = vadd.f32 %v8234_v4, %v1514_v19  ;;  %v1487_v32 = vadd.f32 %v1479_v14, %v1467_v29  ;;  %v2202_v40 = vmul.f32 0.0010283802, %v7025_v1  ;;  %v7202_v16 = vstv %s7164_s23  ;;  %v8238_v1 = vld [vmem:[#allocation17_spill] sm:$0xff]  ;;  %v8240_v29 = vld [vmem:[#allocation34_spill] sm:$0xff] }
 0x496   : > { %v2131_v22 = vadd.f32 %v2123_v39, %v2095_v7  ;;  %v2216_v52 = vadd.f32 %v2208_v59, %v2196_v28  ;;  %v3554_v42 = vmul.f32 %v7184_v35, %v7184_v35  ;;  %v3588_v0 = vadd.f32 %v3584_v21, %v7202_v16 }
 0x497   : > { %v2142_v63 = vrot.slane %v7147_v6, 6  ;;  %v2198_v60 = vadd.f32 %v2190_v56, %v2178_v53  ;;  %v8236_v55 = vrot.slane %v8235_v36, 2  ;;  %v7213_v50 = vstv %s7171_s24 }
 0x498   : > { %v8239_v3 = vrot.slane %v8238_v1, 2  ;;  %v3550_v44 = vmul.f32 %v8240_v29, %v8240_v29  ;;  %v3566_v5 = vsub.f32 %v8241_v26, %v3554_v42  ;;  %v3609_v13 = vadd.f32 %v3605_v33, %v7213_v50 }
 0x499   : > { %v7210_v27 = vadd.f32 %v8236_v55, %v1534_v30  ;;  %v2143_v6 = vsel %vm810_vm3, %v2141_v24, %v2142_v63  ;;  %v2161_v18 = vrot.slane %v7119_v62, 7  ;;  %v2210_v51 = vrot.slane %v2202_v40, 2  ;;  %v8245_v62 = vld [vmem:[#allocation53_spill] sm:$0xff]  ;;  %v8247_v40 = vld [vmem:[#allocation50_spill] sm:$0xff] }
 0x49a   : > { %v7218_v19 = vadd.f32 %v8239_v3, %v8237_v37  ;;  %v7226_v58 = vpop.permute.xlu2 %3242  ;;  %v8242_v7 = vrot.slane %v6821_v2, 7  ;;  %v8243_v45 = vrot.slane %v6681_v61, 7  ;;  %v2151_v28 = vadd.f32 %v2143_v6, %v2131_v22  ;;  %v8246_v2 = vld [vmem:[#allocation23_spill] sm:$0xff] }
 0x49b   : > { %v3562_v43 = vsub.f32 %v2216_v52, %v3550_v44  ;;  %v3613_v53 = vmul.f32 %v3609_v13, %v3588_v0  ;;  %v2162_v23 = vrot.slane %v7128_v57, 7  ;;  %v2218_v12 = vadd.f32 %v2210_v51, %v2198_v60 }
 0x49c   : > { %v1499_v10 = vsel %vm831_vm4, %v8243_v45, %v8242_v7  ;;  %v851_v4 = vadd.f32 %v8245_v62, %v8244_v31  ;;  %v3556_v30 = vmul.f32 %v7210_v27, %v7210_v27  ;;  %v855_v59 = vmul.f32 0.036000773, %v8246_v2 }
 0x49d   : > { %v1507_v21 = vadd.f32 %v1499_v10, %v1487_v32  ;;  %v7234_v14 = vpop.permute.xlu0 %3212  ;;  %v1511_v61 = vmul.f32 0.036000773, %v6797_v48  ;;  %v1519_v24 = vmul.f32 0.0075987587, %v6797_v48  ;;  %v7243_v32 = vpop.permute.xlu1 %3182  ;;  %v3583_v33 = vadd.f32 %v3566_v5, %v3562_v43 }
 0x49e   : > { %v863_v57 = vmul.f32 0.0075987587, %v8246_v2  ;;  %v2163_v39 = vsel %vm831_vm4, %v2161_v18, %v2162_v23  ;;  %v3552_v56 = vmul.f32 %v7218_v19, %v7218_v19  ;;  %v3568_v22 = vsub.f32 %v8247_v40, %v3556_v30 }
 0x49f   : > { %v2171_v52 = vadd.f32 %v2163_v39, %v2151_v28  ;;  %v1515_v0 = vadd.f32 %v1511_v61, %v1507_v21  ;;  %v3604_v63 = vadd.f32 %v3554_v42, %v3550_v44  ;;  %v7250_v60 = vadd.f32 1e-15, %v3613_v53 }
 0x4a0   : > { %v859_v36 = vadd.f32 %v855_v59, %v851_v4  ;;  %v1539_v55 = vmul.f32 0.0010283802, %v6797_v48  ;;  %v3564_v37 = vsub.f32 %v2218_v12, %v3552_v56  ;;  %v1527_v1 = vrot.slane %v1519_v24, 1 }
 0x4a1   : > { %v2175_v3 = vmul.f32 0.036000773, %v7110_v8  ;;  %v2183_v26 = vmul.f32 0.0075987587, %v7110_v8  ;;  %v3587_v5 = vadd.f32 %v3583_v33, %v7202_v16  ;;  %v871_v13 = vrot.slane %v863_v57, 1  ;;  %v8248_v33 = vld [vmem:[#allocation59_spill] sm:$0xff] }
 0x4a2   : > { %v883_v6 = vmul.f32 0.0010283802, %v8246_v2  ;;  %v3585_v18 = vadd.f32 %v3568_v22, %v3564_v37  ;;  %v1535_v51 = vadd.f32 %v1527_v1, %v1515_v0  ;;  %v3608_v42 = vadd.f32 %v3604_v63, %v7213_v50  ;;  %v7261_v48 = vpop.permute.xlu2 %3218 }
 0x4a3   : > { %v2179_v7 = vadd.f32 %v2175_v3, %v2171_v52  ;;  %3864 = vrcp.f32 %v7250_v60  ;;  %v879_v45 = vadd.f32 %v871_v13, %v859_v36  ;;  %v3606_v10 = vadd.f32 %v3556_v30, %v3552_v56 }
 0x4a4   : > { %v2191_v28 = vrot.slane %v2183_v26, 1  ;;  %v2203_v21 = vmul.f32 0.0010283802, %v7110_v8  ;;  %v1547_v53 = vrot.slane %v1539_v55, 2  ;;  %v3612_v23 = vmul.f32 %v3608_v42, %v3587_v5 }
 0x4a5   : > { %v7259_v44 = vpop.permute.xlu0 %3154  ;;  %v7264_v43 = vpop.permute.xlu1 %3216  ;;  %v7268_v12 = vmul.f32 %v7184_v35, %v8240_v29  ;;  %v3589_v31 = vadd.f32 %v3585_v18, %v7202_v16  ;;  %v891_v62 = vrot.slane %v883_v6, 2  ;;  %v3610_v59 = vadd.f32 %v3606_v10, %v7213_v50  ;;  %v8249_v6 = vld [vmem:[#allocation80_spill] sm:$0xff] }
 0x4a6   : > { %v7271_v4 = vadd.f32 %v1547_v53, %v1535_v51  ;;  %v2199_v2 = vadd.f32 %v2191_v28, %v2179_v7  ;;  %v2211_v61 = vrot.slane %v2203_v21, 2  ;;  %v7278_v24 = vadd.f32 1e-15, %v3612_v23 }
 0x4a7   : > { %v7276_v8 = vadd.f32 %v891_v62, %v879_v45  ;;  %v7282_v57 = vmul.f32 %v7101_v17, %v8248_v33  ;;  %v3591_v35 = vmul.f32 2.0, %v7268_v12  ;;  %v3614_v29 = vmul.f32 %v3610_v59, %v3589_v31 }
 0x4a8   : > { %v3199_v39 = vadd.f32 %v7154_v34, %v6953_v46  ;;  %v2219_v56 = vadd.f32 %v2211_v61, %v2199_v2  ;;  %v3557_v40 = vmul.f32 %v7271_v4, %v7271_v4  ;;  %v3262_v52 = vadd.f32 %v7064_v11, %v7152_v47 }
 0x4a9   : > { %v7274_v30 = vpop.eup %3864  ;;  %v3553_v36 = vmul.f32 %v7276_v8, %v7276_v8  ;;  %3866 = vrcp.f32 %v7278_v24  ;;  %v3592_v34 = vmul.f32 2.0, %v7282_v57  ;;  %v7298_v37 = vadd.f32 %v7213_v50, %v3591_v35 }
 0x4aa   : > { %v3636_v0 = vmul.f32 %v7274_v30, %v7250_v60  ;;  %v3283_v55 = vpop.permute.xlu2 %3282  ;;  %v7300_v1 = vadd.f32 1e-15, %v3614_v29  ;;  %v7305_v47 = vmul.f32 %v7210_v27, %v7218_v19  ;;  %v3569_v18 = vsub.f32 %v8249_v6, %v3557_v40 }
 0x4ab   : > { %v3565_v3 = vsub.f32 %v2219_v56, %v3553_v36  ;;  %v3607_v26 = vadd.f32 %v3557_v40, %v3553_v36  ;;  %v3646_v10 = vand.u32 2147483648, %v7250_v60  ;;  %vm3640_vm5 = vweird.f32 %v7250_v60  ;;  %v8250_v40 = vld [vmem:[#allocation75_spill] sm:$0xff] }
 0x4ac   : > { %v3637_v51 = vsub.f32 1.0, %v3636_v0  ;;  %3868 = vrcp.f32 %v7300_v1  ;;  %vm3641_vm6 = vweird.f32 %v7274_v30  ;;  %vm3625_vm10 = vweird.f32 %v7278_v24 }
 0x4ad   : > { %v3211_v22 = vpop.permute.xlu0 %3210  ;;  %v3281_v17 = vpop.permute.xlu1 %3280  ;;  %v3586_v59 = vadd.f32 %v3569_v18, %v3565_v3  ;;  %vm7343_vm7 = vmor %vm3640_vm5, %vm3641_vm6  ;;  %vm3655_vm12 = vweird.f32 %v7300_v1  ;;  %vm3698_vm6 = vcmask 0  }
 0x4ae   : > { %v3231_v63 = vadd.f32 %v3211_v22, %v3199_v39  ;;  %v3302_v46 = vadd.f32 %v3281_v17, %v3262_v52  ;;  %v3638_v61 = vmul.f32 %v7274_v30, %v3637_v51  ;;  %v3260_v22 = vadd.f32 %v7196_v49, %v8250_v40 }
 0x4af   : > { %v7312_v27 = vpop.eup %3866  ;;  %v3647_v40 = vor.u32 1.1754944e-38, %v3646_v10 }
 0x4b0   : > { %v3263_v11 = vadd.f32 %v7226_v58, %v3231_v63  ;;  %v3313_v5 = vmul.f32 0.0075987587, %v3302_v46  ;;  %v3333_v13 = vmul.f32 0.036000773, %v3302_v46  ;;  %v3309_v42 = vmul.f32 0.0010283802, %v3302_v46 }
 0x4b1   : > { %v3354_v45 = vmul.f32 0.109360695, %v3302_v46  ;;  %v3390_v21 = vmul.f32 0.21300554, %v3302_v46  ;;  %v3426_v58 = vmul.f32 0.26601174, %v3302_v46  ;;  %v3621_v63 = vmul.f32 %v7312_v27, %v7278_v24 }
 0x4b2   : > { %v7308_v7 = vadd.f32 %v3283_v55, %v3263_v11  ;;  %v3321_v28 = vrot.slane %v3313_v5, 1  ;;  %v3341_v62 = vrot.slane %v3333_v13, 2  ;;  %v7325_v11 = vpop.eup %3868  ;;  %v3639_v13 = vadd.f32 %v7274_v30, %v3638_v61 }
 0x4b3   : > { %v3371_v17 = vrot.slane %v3354_v45, 3  ;;  %v3407_v36 = vrot.slane %v3390_v21, 4  ;;  %v3443_v55 = vrot.slane %v3426_v58, 5  ;;  %v3463_v46 = vrot.slane %v3390_v21, 6  ;;  %v8251_v58 = vld [vmem:[#allocation49_spill] sm:$0xff] }
 0x4b4   : > { %v3355_v19 = vmul.f32 0.109360695, %v7308_v7  ;;  %v3391_v53 = vmul.f32 0.21300554, %v7308_v7  ;;  %v3427_v23 = vmul.f32 0.26601174, %v7308_v7  ;;  %v3329_v31 = vadd.f32 %v3321_v28, %v3309_v42 }
 0x4b5   : > { %v3277_v2 = vpop.permute.xlu0 %3276  ;;  %v7319_v56 = vpop.permute.xlu1 %3238  ;;  %v3483_v3 = vrot.slane %v3354_v45, 7  ;;  %v3590_v21 = vadd.f32 %v3586_v59, %v7202_v16  ;;  %v3644_v45 = vand.u32 2147483647, %v7250_v60  ;;  %vm3626_vm9 = vweird.f32 %v7312_v27 }
 0x4b6   : > { %v3372_v33 = vrot.slane %v3355_v19, 3  ;;  %v3408_v35 = vrot.slane %v3391_v53, 4  ;;  %v3444_v29 = vrot.slane %v3427_v23, 5  ;;  %v3464_v39 = vrot.slane %v3391_v53, 6  ;;  %vm7424_vm11 = vmor %vm3625_vm10, %vm3626_vm9 }
 0x4b7   : > { %v3484_v52 = vrot.slane %v3355_v19, 7  ;;  %v3349_v0 = vadd.f32 %v3341_v62, %v3329_v31  ;;  %v3300_v5 = vadd.f32 %v3277_v2, %v3260_v22  ;;  %v3232_v19 = vadd.f32 %v7234_v14, %v8251_v58  ;;  %v8255_v58 = vld [vmem:[#allocation51_spill] sm:$0xff] }
 0x4b8   : > { %v3373_v6 = vsel %vm715_vm0, %v3371_v17, %v3372_v33  ;;  %v3409_v49 = vsel %vm752_vm1, %v3407_v36, %v3408_v35  ;;  %v3445_v18 = vsel %vm789_vm2, %v3443_v55, %v3444_v29  ;;  %v3465_v51 = vsel %vm810_vm3, %v3463_v46, %v3464_v39 }
 0x4b9   : > { %v3385_v42 = vadd.f32 %v3373_v6, %v3349_v0  ;;  %v3485_v28 = vsel %vm831_vm4, %v3483_v3, %v3484_v52  ;;  %v7339_v53 = vadd.f32 %v7213_v50, %v3592_v34  ;;  %v3622_v23 = vsub.f32 1.0, %v3621_v63  ;;  %v8254_v34 = vld [vmem:[#allocation54_spill] sm:$0xff] }
 0x4ba   : > { %v7349_v62 = vmul.f32 %v7325_v11, %v7300_v1  ;;  %v3312_v59 = vmul.f32 0.0075987587, %v3300_v5  ;;  %v3611_v33 = vadd.f32 %v3607_v26, %v7213_v50  ;;  %v3643_v14 = vsel %vm7343_vm7, %v7274_v30, %v3639_v13 }
 0x4bb   : > { %v3421_v2 = vadd.f32 %v3409_v49, %v3385_v42  ;;  %v3197_v60 = vadd.f32 %v7186_v54, %v8254_v34  ;;  %v7358_v29 = vmul.f32 2.0, %v7305_v47  ;;  %v3629_v39 = vand.u32 2147483647, %v7278_v24 }
 0x4bc   : > { %v7361_v52 = vmul.f32 %v3611_v33, %v3590_v21  ;;  %v3631_v0 = vand.u32 2147483648, %v7278_v24  ;;  %vm3645_vm8 = vcmp.eq.f32.partialorder %v3644_v45, 8.507059e+37  ;;  %v3264_v26 = vadd.f32 %v7133_v38, %v3232_v19 }
 0x4bd   : > { %v3215_v61 = vpop.permute.xlu0 %3214  ;;  %v3285_v35 = vpop.permute.xlu1 %3284  ;;  %v3457_v22 = vadd.f32 %v3445_v18, %v3421_v2  ;;  %v7366_v30 = vmul.f32 %v7312_v27, %v3622_v23  ;;  %v7368_v63 = vsel %vm3645_vm8, %v3647_v40, %v3643_v14  ;;  %v3652_v54 = vsub.f32 1.0, %v7349_v62 }
 0x4be   : > { %v3509_v17 = vmul.f32 0.0075987587, %v7308_v7  ;;  %v3529_v36 = vmul.f32 0.0010283802, %v7308_v7  ;;  %v3320_v55 = vrot.slane %v3312_v59, 1  ;;  %v3229_v13 = vadd.f32 %v7097_v25, %v3197_v60 }
 0x4bf   : > { %v3477_v10 = vadd.f32 %v3465_v51, %v3457_v22  ;;  %v3332_v46 = vmul.f32 0.036000773, %v3300_v5  ;;  %v3352_v3 = vmul.f32 0.109360695, %v3300_v5  ;;  %v3304_v6 = vadd.f32 %v3285_v35, %v3264_v26 }
 0x4c0   : > { %v3308_v49 = vmul.f32 0.0010283802, %v3300_v5  ;;  %v3388_v38 = vmul.f32 0.21300554, %v3300_v5  ;;  %v3424_v18 = vmul.f32 0.26601174, %v3300_v5  ;;  %v3201_v21 = vadd.f32 %v7243_v32, %v7090_v9 }
 0x4c1   : > { %v3497_v42 = vadd.f32 %v3485_v28, %v3477_v10  ;;  %v3171_v45 = vadd.f32 %v7259_v44, %v7122_v41  ;;  %v3202_v19 = vadd.f32 %v8255_v58, %v7115_v15  ;;  %v3501_v51 = vmul.f32 0.036000773, %v7308_v7 }
 0x4c2   : > { %v3517_v23 = vrot.slane %v3509_v17, 1  ;;  %v3537_v31 = vrot.slane %v3529_v36, 2  ;;  %v3328_v2 = vadd.f32 %v3320_v55, %v3308_v49  ;;  %v3261_v25 = vadd.f32 %v7319_v56, %v3229_v13 }
 0x4c3   : > { %v3340_v33 = vrot.slane %v3332_v46, 2  ;;  %v3368_v5 = vrot.slane %v3352_v3, 3  ;;  %v3314_v28 = vmul.f32 0.0075987587, %v3304_v6  ;;  %v3505_v34 = vadd.f32 %v3501_v51, %v3497_v42 }
 0x4c4   : > { %v3404_v9 = vrot.slane %v3388_v38, 4  ;;  %v3440_v32 = vrot.slane %v3424_v18, 5  ;;  %v3460_v60 = vrot.slane %v3388_v38, 6  ;;  %v3480_v44 = vrot.slane %v3352_v3, 7 }
 0x4c5   : > { %v3249_v59 = vpop.permute.xlu0 %3248  ;;  %v3279_v14 = vpop.permute.xlu1 %3278  ;;  %v3233_v35 = vadd.f32 %v3215_v61, %v3201_v21  ;;  %v3310_v15 = vmul.f32 0.0010283802, %v3304_v6  ;;  %v3525_v40 = vadd.f32 %v3517_v23, %v3505_v34  ;;  %v3348_v7 = vadd.f32 %v3340_v33, %v3328_v2 }
 0x4c6   : > { %v3301_v41 = vadd.f32 %v3279_v14, %v3261_v25  ;;  %v3322_v36 = vrot.slane %v3314_v28, 1  ;;  %v3334_v56 = vmul.f32 0.036000773, %v3304_v6  ;;  %v3356_v10 = vmul.f32 0.109360695, %v3304_v6  ;;  %v3287_v25 = vpop.permute.xlu2 %3286 }
 0x4c7   : > { %v3545_v55 = vadd.f32 %v3537_v31, %v3525_v40  ;;  %v3392_v58 = vmul.f32 0.21300554, %v3304_v6  ;;  %v3428_v18 = vmul.f32 0.26601174, %v3304_v6  ;;  %v3203_v6 = vadd.f32 %v7175_v20, %v3171_v45 }
 0x4c8   : > { %v3353_v22 = vmul.f32 0.109360695, %v3301_v41  ;;  %v3389_v26 = vmul.f32 0.21300554, %v3301_v41  ;;  %v3425_v17 = vmul.f32 0.26601174, %v3301_v41  ;;  %v3234_v34 = vadd.f32 %v7264_v43, %v3202_v19 }
 0x4c9   : > { %v3571_v3 = vsub.f32 %v3545_v55, %v7282_v57  ;;  %v3330_v57 = vadd.f32 %v3322_v36, %v3310_v15  ;;  %v3342_v40 = vrot.slane %v3334_v56, 2  ;;  %v3486_v55 = vrot.slane %v3356_v10, 7 }
 0x4ca   : > { %v3369_v46 = vrot.slane %v3353_v22, 3  ;;  %v3405_v13 = vrot.slane %v3389_v26, 4  ;;  %v3441_v49 = vrot.slane %v3425_v17, 5  ;;  %v3461_v42 = vrot.slane %v3389_v26, 6 }
 0x4cb   : > { %v3481_v38 = vrot.slane %v3353_v22, 7  ;;  %v3575_v14 = vmul.f32 2.0, %v3571_v3  ;;  %v3410_v26 = vrot.slane %v3392_v58, 4  ;;  %v3466_v17 = vrot.slane %v3392_v58, 6 }
 0x4cc   : > { %v3370_v61 = vsel %vm715_vm0, %v3368_v5, %v3369_v46  ;;  %v3406_v21 = vsel %vm752_vm1, %v3404_v9, %v3405_v13  ;;  %v3442_v51 = vsel %vm789_vm2, %v3440_v32, %v3441_v49  ;;  %v3462_v23 = vsel %vm810_vm3, %v3460_v60, %v3461_v42 }
 0x4cd   : > { %v3247_v2 = vpop.permute.xlu0 %3246  ;;  %v3384_v31 = vadd.f32 %v3370_v61, %v3348_v7  ;;  %v3482_v33 = vsel %vm831_vm4, %v3480_v44, %v3481_v38  ;;  %v3374_v5 = vrot.slane %v3356_v10, 3  ;;  %v3580_v32 = vadd.f32 %v7202_v16, %v3575_v14 }
 0x4ce   : > { %v3265_v28 = vadd.f32 %v3247_v2, %v3233_v35  ;;  %v3446_v60 = vrot.slane %v3428_v18, 5  ;;  %v3350_v13 = vadd.f32 %v3342_v40, %v3330_v57  ;;  %v3266_v49 = vadd.f32 %v3249_v59, %v3234_v34  ;;  %v3251_v34 = vpop.permute.xlu1 %3250 }
 0x4cf   : > { %v3420_v22 = vadd.f32 %v3406_v21, %v3384_v31  ;;  %v3508_v20 = vmul.f32 0.0075987587, %v3301_v41  ;;  %v3601_v43 = vmul.f32 %v7339_v53, %v3580_v32  ;;  %v3500_v56 = vmul.f32 0.036000773, %v3301_v41 }
 0x4d0   : > { %v3305_v9 = vadd.f32 %v3287_v25, %v3265_v28  ;;  %v3528_v42 = vmul.f32 0.0010283802, %v3301_v41  ;;  %v7398_v41 = vadd.f32 1e-15, %v7361_v52  ;;  %vm3656_vm13 = vweird.f32 %v7325_v11 }
 0x4d1   : > { %v3456_v7 = vadd.f32 %v3442_v51, %v3420_v22  ;;  %v3516_v25 = vrot.slane %v3508_v20, 1  ;;  %v7401_v31 = vmul.f32 %v7368_v63, %v3601_v43  ;;  %v3624_v63 = vadd.f32 %v7312_v27, %v7366_v30  ;;  %vm7445_vm15 = vmor %vm3655_vm12, %vm3656_vm13 }
 0x4d2   : > { %v3357_v46 = vmul.f32 0.109360695, %v3305_v9  ;;  %v3393_v44 = vmul.f32 0.21300554, %v3305_v9  ;;  %v3429_v35 = vmul.f32 0.26601174, %v3305_v9  ;;  %3870 = vrcp.f32 %v7398_v41 }
 0x4d3   : > { %v3476_v45 = vadd.f32 %v3462_v23, %v3456_v7  ;;  %v3536_v28 = vrot.slane %v3528_v42, 2  ;;  %v3530_v22 = vmul.f32 0.0010283802, %v3305_v9  ;;  %v3502_v52 = vmul.f32 0.036000773, %v3305_v9 }
 0x4d4   : > { %v3375_v19 = vrot.slane %v3357_v46, 3  ;;  %v3411_v15 = vrot.slane %v3393_v44, 4  ;;  %v3447_v36 = vrot.slane %v3429_v35, 5  ;;  %v3467_v38 = vrot.slane %v3393_v44, 6 }
 0x4d5   : > { %v3487_v3 = vrot.slane %v3357_v46, 7  ;;  %v3289_v18 = vpop.permute.xlu0 %3288  ;;  %v3496_v58 = vadd.f32 %v3482_v33, %v3476_v45  ;;  %v3235_v33 = vadd.f32 %v7261_v48, %v3203_v6  ;;  %v3653_v42 = vmul.f32 %v7325_v11, %v3652_v54 }
 0x4d6   : > { %v3376_v10 = vsel %vm715_vm0, %v3374_v5, %v3375_v19  ;;  %v3412_v61 = vsel %vm752_vm1, %v3410_v26, %v3411_v15  ;;  %v3448_v21 = vsel %vm789_vm2, %v3446_v60, %v3447_v36  ;;  %v3468_v51 = vsel %vm810_vm3, %v3466_v17, %v3467_v38 }
 0x4d7   : > { %v3386_v59 = vadd.f32 %v3376_v10, %v3350_v13  ;;  %v3488_v53 = vsel %vm831_vm4, %v3486_v55, %v3487_v3  ;;  %v3306_v23 = vadd.f32 %v3289_v18, %v3266_v49  ;;  %v3504_v2 = vadd.f32 %v3500_v56, %v3496_v58 }
 0x4d8   : > { %v3510_v5 = vmul.f32 0.0075987587, %v3305_v9  ;;  %v3267_v7 = vadd.f32 %v3251_v34, %v3235_v33  ;;  %v3538_v49 = vrot.slane %v3530_v22, 2  ;;  %v7413_v10 = vpop.eup %3870  ;;  %v3659_v22 = vand.u32 2147483647, %v7300_v1 }
 0x4d9   : > { %v3422_v14 = vadd.f32 %v3412_v61, %v3386_v59  ;;  %v3315_v57 = vmul.f32 0.0075987587, %v3306_v23  ;;  %v3524_v40 = vadd.f32 %v3516_v25, %v3504_v2  ;;  %v3335_v32 = vmul.f32 0.036000773, %v3306_v23 }
 0x4da   : > { %v3358_v17 = vmul.f32 0.109360695, %v3306_v23  ;;  %v3394_v55 = vmul.f32 0.21300554, %v3306_v23  ;;  %v3311_v6 = vmul.f32 0.0010283802, %v3306_v23 }
 0x4db   : > { %v3458_v26 = vadd.f32 %v3448_v21, %v3422_v14  ;;  %v3323_v60 = vrot.slane %v3315_v57, 1  ;;  %v3430_v46 = vmul.f32 0.26601174, %v3306_v23  ;;  %v3544_v35 = vadd.f32 %v3536_v28, %v3524_v40 }
 0x4dc   : > { %v3518_v13 = vrot.slane %v3510_v5, 1  ;;  %v3343_v20 = vrot.slane %v3335_v32, 2  ;;  %v3377_v9 = vrot.slane %v3358_v17, 3  ;;  %v3413_v15 = vrot.slane %v3394_v55, 4 }
 0x4dd   : > { %v3478_v48 = vadd.f32 %v3468_v51, %v3458_v26  ;;  %v3291_v44 = vpop.permute.xlu0 %3290  ;;  %v3331_v19 = vadd.f32 %v3323_v60, %v3311_v6  ;;  %v3449_v3 = vrot.slane %v3430_v46, 5  ;;  %v3469_v18 = vrot.slane %v3394_v55, 6 }
 0x4de   : > { %v3307_v43 = vadd.f32 %v3291_v44, %v3267_v7  ;;  %v3570_v58 = vsub.f32 %v3544_v35, %v7268_v12  ;;  %v3489_v23 = vrot.slane %v3358_v17, 7  ;;  %v3654_v5 = vadd.f32 %v7325_v11, %v3653_v42 }
 0x4df   : > { %v3498_v45 = vadd.f32 %v3488_v53, %v3478_v48  ;;  %v3351_v53 = vadd.f32 %v3343_v20, %v3331_v19  ;;  %v3628_v17 = vsel %vm7424_vm11, %v7312_v27, %v3624_v63  ;;  %vm3630_vm14 = vcmp.eq.f32.partialorder %v3629_v39, 8.507059e+37 }
 0x4e0   : > { %v3359_v36 = vmul.f32 0.109360695, %v3307_v43  ;;  %v3395_v56 = vmul.f32 0.21300554, %v3307_v43  ;;  %v3431_v30 = vmul.f32 0.26601174, %v3307_v43  ;;  %v3666_v7 = vmul.f32 %v7413_v10, %v7398_v41 }
 0x4e1   : > { %v3506_v38 = vadd.f32 %v3502_v52, %v3498_v45  ;;  %v3574_v57 = vmul.f32 2.0, %v3570_v58  ;;  %v3632_v55 = vor.u32 1.1754944e-38, %v3631_v0  ;;  %v3661_v52 = vand.u32 2147483648, %v7300_v1 }
 0x4e2   : > { %v3378_v61 = vrot.slane %v3359_v36, 3  ;;  %v3414_v21 = vrot.slane %v3395_v56, 4  ;;  %v3450_v59 = vrot.slane %v3431_v30, 5  ;;  %v3470_v51 = vrot.slane %v3395_v56, 6 }
 0x4e3   : > { %v3490_v2 = vrot.slane %v3359_v36, 7  ;;  %v3526_v25 = vadd.f32 %v3518_v13, %v3506_v38  ;;  %v3579_v60 = vadd.f32 %v7202_v16, %v3574_v57  ;;  %v3598_v27 = vadd.f32 %v7213_v50, %v7358_v29 }
 0x4e4   : > { %v3379_v33 = vsel %vm715_vm0, %v3377_v9, %v3378_v61  ;;  %v3415_v62 = vsel %vm752_vm1, %v3413_v15, %v3414_v21  ;;  %v3451_v54 = vsel %vm789_vm2, %v3449_v3, %v3450_v59  ;;  %v3471_v28 = vsel %vm810_vm3, %v3469_v18, %v3470_v51 }
 0x4e5   : > { %v3387_v14 = vadd.f32 %v3379_v33, %v3351_v53  ;;  %v3491_v12 = vsel %vm831_vm4, %v3489_v23, %v3490_v2  ;;  %v3546_v34 = vadd.f32 %v3538_v49, %v3526_v25  ;;  %vm3680_vm0 = vcmask 46080  }
 0x4e6   : > { %v3633_v39 = vsel %vm3630_vm14, %v3632_v55, %v3628_v17  ;;  %v3658_v24 = vsel %vm7445_vm15, %v7325_v11, %v3654_v5  ;;  %vm3660_vm1 = vcmp.eq.f32.partialorder %v3659_v22, 8.507059e+37  ;;  %v3511_v1 = vmul.f32 0.0075987587, %v3307_v43 }
 0x4e7   : > { %v3423_v32 = vadd.f32 %v3415_v62, %v3387_v14  ;;  %v3572_v26 = vsub.f32 %v3546_v34, %v7305_v47  ;;  %v3600_v47 = vmul.f32 %v7298_v37, %v3579_v60  ;;  %v3503_v37 = vmul.f32 0.036000773, %v3307_v43 }
 0x4e8   : > { %v3662_v35 = vor.u32 1.1754944e-38, %v3661_v52  ;;  %v3667_v13 = vsub.f32 1.0, %v3666_v7  ;;  %v3682_v49 = vsel %vm3680_vm0, %v7401_v31, 0.0  ;;  %v3531_v45 = vmul.f32 0.0010283802, %v3307_v43 }
 0x4e9   : > { %v3459_v48 = vadd.f32 %v3451_v54, %v3423_v32  ;;  %v3576_v6 = vmul.f32 2.0, %v3572_v26  ;;  %v3634_v44 = vmul.f32 %v3633_v39, %v3600_v47  ;;  %v3519_v11 = vrot.slane %v3511_v1, 1 }
 0x4ea   : > { %v3663_v9 = vsel %vm3660_vm1, %v3662_v35, %v3658_v24  ;;  %v3561_v30 = vmul.f32 %v7271_v4, %v7276_v8  ;;  %v3539_v38 = vrot.slane %v3531_v45, 2  ;;  %v3668_v3 = vmul.f32 %v7413_v10, %v3667_v13 }
 0x4eb   : > { %v3479_v0 = vadd.f32 %v3471_v28, %v3459_v48  ;;  %v3581_v63 = vadd.f32 %v7202_v16, %v3576_v6  ;;  %v3681_v19 = vsel %vm3680_vm0, %v3634_v44, 0.0  ;;  %vm3671_vm2 = vweird.f32 %v7413_v10 }
 0x4ec   : > { %v3683_v15 = vadd.f32 %v3682_v49, %v3681_v19  ;;  %v3594_v61 = vmul.f32 2.0, %v3561_v30  ;;  %v3669_v21 = vadd.f32 %v7413_v10, %v3668_v3  ;;  %v3676_v59 = vand.u32 2147483648, %v7398_v41 }
 0x4ed   : > { %v3499_v20 = vadd.f32 %v3491_v12, %v3479_v0  ;;  %v3602_v29 = vmul.f32 %v3598_v27, %v3581_v63  ;;  %vm3670_vm3 = vweird.f32 %v7398_v41  ;;  %v3674_v4 = vand.u32 2147483647, %v7398_v41 }
 0x4ee   : > { %vm3672_vm4 = vmor %vm3670_vm3, %vm3671_vm2  ;;  %v3599_v53 = vadd.f32 %v7213_v50, %v3594_v61  ;;  %v3677_v2 = vor.u32 1.1754944e-38, %v3676_v59 }
 0x4ef   : > { %v3507_v36 = vadd.f32 %v3503_v37, %v3499_v20  ;;  %v3664_v56 = vmul.f32 %v3663_v9, %v3602_v29  ;;  %v3673_v23 = vsel %vm3672_vm4, %v7413_v10, %v3669_v21  ;;  %vm3675_vm5 = vcmp.eq.f32.partialorder %v3674_v4, 8.507059e+37 }
 0x4f0   : > { %v3678_v33 = vsel %vm3675_vm5, %v3677_v2, %v3673_v23 }
 0x4f1   : > { %v3527_v42 = vadd.f32 %v3519_v11, %v3507_v36  ;;  %v3684_v18 = vsel %vm3680_vm0, %v3664_v56, 0.0 }
 0x4f2   : > { %v3685_v31 = vadd.f32 %v3684_v18, %v3683_v15 }
 0x4f3   : > { %v3547_v58 = vadd.f32 %v3539_v38, %v3527_v42 }
 0x4f5   : > { %v3573_v43 = vsub.f32 %v3547_v58, %v3561_v30 }
 0x4f7   : > { %v3577_v51 = vmul.f32 2.0, %v3573_v43 }
 0x4f9   : > { %v3582_v8 = vadd.f32 %v7202_v16, %v3577_v51 }
 0x4fb   : > { %v3603_v25 = vmul.f32 %v3599_v53, %v3582_v8 }
 0x4fd   : > { %v3679_v62 = vmul.f32 %v3678_v33, %v3603_v25 }
 0x4ff   : > { %v3686_v54 = vsel %vm3680_vm0, %v3679_v62, 0.0 }
 0x500   : > { %v3687_v28 = vadd.f32 %v3686_v54, %v3685_v31 }
 0x502   : > { %3688 = vadd.xlane.f32.xlu1 %v3687_v28 }
 0x575   : > { %v3689_v14 = vpop.xlane.xlu1 %3688 }
 0x576   : > { %v3690_v12 = vrot.slane %v3689_v14, 4 }
 0x578   : > { %v3691_v41 = vadd.f32 %v3690_v12, %v3689_v14 }
 0x57a   : > { %v3692_v34 = vrot.slane %v3691_v41, 2 }
 0x57c   : > { %v3693_v57 = vadd.f32 %v3692_v34, %v3691_v41 }
 0x57e   : > { %v3694_v16 = vrot.slane %v3693_v57, 1 }
 0x580   : > { %v3695_v40 = vadd.f32 %v3694_v16, %v3693_v57 }
 0x582   : > { %3800 = vpush %v3695_v40 }
 0x5b3   : > { %s3801_s29 = spop %3800 }
 0x5b4   : > { %v3697_v50 = vstv %s3801_s29 }
 0x5b5   : > { %3699 = vst.msk [vmem:[%s222_s28] sm:$0x1] %vm3698_vm6, %v3697_v50 }
 0x5b6 PF: > { %p14_p5 = scmp.ge.s32.totalorder %s4024_s17, 4   ;;  %s8260_s12 = smov %s3963_s13 }
 0x5b7   : > { %s8261_s13 = smov %s3967_s14  ;;  %s8262_s14 = smov %s4032_s20 }
 0x5b8   : > { %s8263_s15 = smov %s4024_s17  ;;  %16 = sbr.rel (!%p14_p5) target bundleno = 4 (0x4), region = 80 }
 0x5bd   :  { %3717 = vsyncpa [#allocation3], 1 }
 0x5be   :  { %3719 = vsyncpa [#allocation3 + $0x1], 1 }
 0x5bf   :  { %3720 = vsyncpa [#allocation4], 1 }
 0x5c0   :  { %3722 = vsyncpa [#allocation4 + $0x1], 1 }

</bundles_post_ra>
